<compile_context>
chip_gen: v6e
topology: v6e:2x2x1
jax: 0.10.0
libtpu: 0.0.40
codegen_flags: <defaults>
</compile_context>

<pallas_src>
import functools
import numpy as np
import jax
import jax.numpy as jnp
from jax.experimental import pallas as pl
from jax.experimental.pallas import tpu as pltpu

# ---------------- synthetic (scaled-down) configuration ----------------
IMG_H = 76          # module arg img_h
IMG_W = 76          # module arg img_w
EDGE = 10           # module default edge
PATCH = 14          # dinov2 patch size (fixed by the module)
EMBED = 64          # synthetic embedding_size (real dinov2_b = 768)
DEPTH = 2           # synthetic number of transformer blocks (real = 12)
HEADS = 4           # synthetic number of heads
MLP_RATIO = 4
SEG_DIM = 16        # module default dim
NUM_CLS = 5         # module arg num_cls
IN_CH = 3           # RGB input expected by the backbone patch embed

LN_EPS = 1e-6       # DINOv2 LayerNorm eps
INV_SQRT2 = float(1.0 / np.sqrt(2.0))


def _round_up(x, m):
    return ((x + m - 1) // m) * m


@functools.lru_cache(maxsize=None)
def _is_multi_tc_chip():
    """True on chips with 2 TensorCores per Pallas device (v7x)."""
    try:
        kind = jax.devices()[0].device_kind.lower()
    except Exception:
        return False
    return ('v7' in kind) or kind.startswith('tpu7')


# ======================= fully fused ViT backbone =======================

def fused_backbone(patches2d, params, batch, n_pad, n_real):
    """Patch-embed + cls/pos + DEPTH blocks + final LN in ONE pallas_call.

    patches2d: (B*N_pad, C*PATCH*PATCH) bf16 im2col patches; row 0 and rows
               [1+P, N_pad) of every batch item are zero.
    Returns (B*N_pad, EMBED) float32 normalized tokens (padded rows are 0).
    """
    D = EMBED
    Hm = MLP_RATIO * D
    hd = D // HEADS
    Kp = patches2d.shape[1]

    # v7x: one batch element per TensorCore.  v5e/v6e: collapse batch into the
    # token axis so every linear-layer matmul has 2x the sublane occupancy.
    grid_n = batch if (_is_multi_tc_chip() and batch > 1) else 1
    bs_per = batch // grid_n
    rows = bs_per * n_pad
    BD = HEADS * n_pad

    blk = params['blocks']
    inputs = [patches2d, params['tok_base'], params['patch_wmat'],
              blk['ln1_g'], blk['ln1_b'], blk['qkv_w'], blk['qkv_b'],
              blk['proj_w'], blk['proj_b'], blk['ls1'],
              blk['ln2_g'], blk['ln2_b'], blk['fc1_w'], blk['fc1_b'],
              blk['fc2_w'], blk['fc2_b'], blk['ls2'],
              params['norm_g'], params['norm_b']]

    def kernel(p_ref, base_ref, pw_ref,
               ln1g, ln1b, qkvw, qkvb, projw, projb, ls1,
               ln2g, ln2b, fc1w, fc1b, fc2w, fc2b, ls2,
               fing, finb, o_ref):

        def ln(v, g, b):
            mu = jnp.mean(v, axis=-1, keepdims=True)
            var = jnp.mean(jnp.square(v - mu), axis=-1, keepdims=True)
            return (v - mu) * jax.lax.rsqrt(var + LN_EPS) * g + b

        # ---- compile-time-constant masks (comparisons only, no vector div) ----
        rowv = jax.lax.broadcasted_iota(jnp.int32, (rows, 1), 0)
        tok_valid = jnp.zeros((rows, 1), jnp.bool_)
        for bb in range(bs_per):
            tok_valid = tok_valid | ((rowv >= bb * n_pad) &
                                     (rowv < bb * n_pad + n_real))
        token_mask = tok_valid.astype(jnp.float32)

        # block-diagonal head mask in (HEADS*N_pad, D): (r, c) in-block iff
        # r // n_pad == c // hd   (used to mask head-tiled K and V).
        bd_r = jax.lax.broadcasted_iota(jnp.int32, (BD, D), 0)
        bd_c = jax.lax.broadcasted_iota(jnp.int32, (BD, D), 1)
        bd_b = jnp.zeros((BD, D), jnp.bool_)
        for h in range(HEADS):
            bd_b = bd_b | ((bd_r >= h * n_pad) & (bd_r < (h + 1) * n_pad) &
                           (bd_c >= h * hd) & (bd_c < (h + 1) * hd))
        bd_mask = bd_b.astype(jnp.bfloat16)

        # key-validity mask on scores (N_pad, HEADS*N_pad): padded keys masked.
        colv = jax.lax.broadcasted_iota(jnp.int32, (n_pad, BD), 1)
        key_valid = jnp.zeros((n_pad, BD), jnp.bool_)
        for h in range(HEADS):
            key_valid = key_valid | ((colv >= h * n_pad) &
                                     (colv < h * n_pad + n_real))

        base = base_ref[...]
        if bs_per > 1:
            base = jnp.concatenate([base] * bs_per, axis=0)

        # ---- patch embed (+ cls/pos/patch-bias via pre-folded base) ----
        x = jnp.dot(p_ref[...], pw_ref[...],
                    preferred_element_type=jnp.float32) + base

        for d in range(DEPTH):
            # ---- attention branch (pre-LN) ----
            y = ln(x, ln1g[d], ln1b[d])
            qkv = jnp.dot(y.astype(jnp.bfloat16), qkvw[d],
                          preferred_element_type=jnp.float32) + qkvb[d]
            att = []
            for bb in range(bs_per):
                sl = slice(bb * n_pad, (bb + 1) * n_pad)
                q = qkv[sl, 0:D].astype(jnp.bfloat16)        # scale folded in W_q
                k = qkv[sl, D:2 * D].astype(jnp.bfloat16)
                v = qkv[sl, 2 * D:3 * D].astype(jnp.bfloat16)
                kbig = jnp.concatenate([k] * HEADS, axis=0) * bd_mask   # (BD, D)
                vbig = jnp.concatenate([v] * HEADS, axis=0) * bd_mask   # (BD, D)
                # all-head scores side by side along lanes: (N_pad, HEADS*N_pad)
                s = jax.lax.dot_general(q, kbig, (((1,), (1,)), ((), ())),
                                        preferred_element_type=jnp.float32)
                s = jnp.where(key_valid, s, jnp.float32(-1e30))
                m = jnp.max(s, axis=-1, keepdims=True)       # row max (per-head safe)
                e = jnp.exp(s - m).astype(jnp.bfloat16)
                num = jnp.dot(e, vbig, preferred_element_type=jnp.float32)
                den = jnp.dot(e, bd_mask, preferred_element_type=jnp.float32)
                att.append(num * pl.reciprocal(den, approx=True))
            a = att[0] if bs_per == 1 else jnp.concatenate(att, axis=0)
            a = jnp.dot(a.astype(jnp.bfloat16), projw[d],
                        preferred_element_type=jnp.float32) + projb[d]
            x = x + ls1[d] * a                               # LayerScale(init=1.0)

            # ---- MLP branch (pre-LN) ----
            y = ln(x, ln2g[d], ln2b[d])
            hm = jnp.dot(y.astype(jnp.bfloat16), fc1w[d],
                         preferred_element_type=jnp.float32) + fc1b[d]
            hm = 0.5 * hm * (1.0 + jax.lax.erf(hm * INV_SQRT2))   # exact GELU
            hm = jnp.dot(hm.astype(jnp.bfloat16), fc2w[d],
                         preferred_element_type=jnp.float32) + fc2b[d]
            x = (x + ls2[d] * hm) * token_mask               # padded rows stay 0

        # backbone final LayerNorm (fused)
        o_ref[...] = ln(x, fing[...], finb[...]) * token_mask

    def wspec(a):
        zeros = (0,) * a.ndim
        return pl.BlockSpec(a.shape, lambda g, _z=zeros: _z)

    in_specs = ([pl.BlockSpec((rows, Kp), lambda g: (g, 0))]
                + [wspec(a) for a in inputs[1:]])
    out_spec = pl.BlockSpec((rows, D), lambda g: (g, 0))

    # advisory cost estimate so XLA overlaps the im2col/gather glue around us
    tokens = batch * n_pad
    w_bytes = sum(int(np.prod(a.shape)) * a.dtype.itemsize for a in inputs[1:])
    flops = 2 * tokens * Kp * D
    flops += DEPTH * 2 * tokens * (D * 3 * D + D * D + 2 * D * Hm)
    flops += DEPTH * batch * 3 * 2 * n_pad * D * BD
    trans = DEPTH * batch * n_pad * (BD + Hm)
    cost = pl.CostEstimate(
        flops=int(flops), transcendentals=int(trans),
        bytes_accessed=int(tokens * Kp * 2 + tokens * D * 4 + w_bytes))

    return pl.pallas_call(
        kernel,
        out_shape=jax.ShapeDtypeStruct((batch * n_pad, D), jnp.float32),
        grid=(grid_n,),
        in_specs=in_specs,
        out_specs=out_spec,
        compiler_params=pltpu.CompilerParams(dimension_semantics=("parallel",)),
        cost_estimate=cost,
    )(*inputs)


# ======================= lane-dense 3x3 conv =======================

def pallas_conv3x3(x, wmat_bf16, b, cout):
    """Conv2d(Cin, Cout, 3, padding=1) as out[Cout, B*H*W] = W[Cout,C*9] @ col.

    The spatial axis sits on the 128-lane axis so output stores are lane-dense.
    """
    B, C, H, W = x.shape
    xb = x.astype(jnp.bfloat16)                                 # bf16 im2col: half HBM
    xp = jnp.pad(xb, ((0, 0), (0, 0), (1, 1), (1, 1)))
    taps = [xp[:, :, kh:kh + H, kw:kw + W] for kh in range(3) for kw in range(3)]
    col = jnp.stack(taps, axis=2)                               # (B, C, 9, H, W)
    col = col.transpose(1, 2, 0, 3, 4).reshape(C * 9, B * H * W)
    K, S = col.shape
    if S % 128 != 0:                                            # fallback only
        Sp = _round_up(S, 128)
        col = jnp.pad(col, ((0, 0), (0, Sp - S)))
    else:
        Sp = S
    # >=2 parallel tiles keep both v7x TensorCores busy; everything fits VMEM.
    ntiles = 2 if (Sp % 256 == 0) else 1
    TN = Sp // ntiles
    b2 = b.reshape(cout, 1).astype(jnp.float32)

    def kernel(w_ref, c_ref, b_ref, o_ref):
        o_ref[...] = jnp.dot(w_ref[...], c_ref[...],
                             preferred_element_type=jnp.float32) + b_ref[...]

    cost = pl.CostEstimate(flops=2 * cout * K * Sp, transcendentals=0,
                           bytes_accessed=K * Sp * 2 + cout * K * 2 + cout * Sp * 4)

    out = pl.pallas_call(
        kernel,
        out_shape=jax.ShapeDtypeStruct((cout, Sp), jnp.float32),
        grid=(ntiles,),
        in_specs=[pl.BlockSpec((cout, K), lambda j: (0, 0)),
                  pl.BlockSpec((K, TN), lambda j: (0, j)),
                  pl.BlockSpec((cout, 1), lambda j: (0, 0))],
        out_specs=pl.BlockSpec((cout, TN), lambda j: (0, j)),
        compiler_params=pltpu.CompilerParams(dimension_semantics=("parallel",)),
        cost_estimate=cost,
    )(wmat_bf16, col, b2)
    if Sp != S:
        out = out[:, :S]
    return out.reshape(cout, B, H, W).transpose(1, 0, 2, 3)


# ======================= XLA glue =======================

def nearest_resize_nchw(x, out_h, out_w):
    """PyTorch nn.Upsample(size=..., mode='nearest') semantics (NCHW)."""
    # TODO(synk): nearest-neighbor gather stays in XLA (pure index gather).
    _, _, H, W = x.shape
    idx_h = np.minimum(np.floor(np.arange(out_h) * (H / out_h)).astype(np.int64), H - 1)
    idx_w = np.minimum(np.floor(np.arange(out_w) * (W / out_w)).astype(np.int64), W - 1)
    return x[:, :, idx_h, :][:, :, :, idx_w]


def backbone_forward_features(params, x):
    """Returns x_norm_patchtokens: (B, num_patches, EMBED)."""
    B, C, Hh, Ww = x.shape
    Hp, Wp = Hh // PATCH, Ww // PATCH
    P = Hp * Wp
    n_real = 1 + P                  # cls token + patches (num_register_tokens == 0)
    n_pad = _round_up(n_real, 8)    # one-time sublane-aligned padding (17 -> 24)

    # im2col for the 14x14/stride-14 patch-embed conv; row 0 (cls slot) and the
    # padded token rows are zero so the fused kernel adds cls/pos from `tok_base`.
    patches = (x.astype(jnp.bfloat16)
                .reshape(B, C, Hp, PATCH, Wp, PATCH)
                .transpose(0, 2, 4, 1, 3, 5)
                .reshape(B, P, C * PATCH * PATCH))
    patches = jnp.pad(patches, ((0, 0), (1, n_pad - 1 - P), (0, 0)))
    patches2d = patches.reshape(B * n_pad, C * PATCH * PATCH)

    out = fused_backbone(patches2d, params, B, n_pad, n_real)
    out = out.reshape(B, n_pad, EMBED)[:, 1:n_real, :]   # x_norm_patchtokens
    return out


def dino2seg_forward(params, x, mode='mapping'):
    # self.upsample = nn.Upsample((h, w))
    h = (IMG_H - 2 * EDGE) // 14 * 14
    w = (IMG_W - 2 * EDGE) // 14 * 14
    x = nearest_resize_nchw(x, h, w)
    bs = x.shape[0]
    mask_h, mask_w = x.shape[2] // PATCH, x.shape[3] // PATCH

    out = backbone_forward_features(params, x.astype(jnp.float32))
    # NOTE: raw reshape (not transpose), exactly as in the PyTorch module.
    out = out.reshape(bs, EMBED, mask_h, mask_w)

    # segmentation_conv[0]: Upsample(scale_factor=4)
    y = jnp.repeat(jnp.repeat(out, 4, axis=2), 4, axis=3)
    # segmentation_conv[1]: Conv2d(EMBED, SEG_DIM, 3, padding=1)
    y = pallas_conv3x3(y, params['conv1_wmat'], params['conv1_b'], SEG_DIM)
    # segmentation_conv[2]: Upsample((img_h-2*edge, img_w-2*edge))
    y = nearest_resize_nchw(y, IMG_H - 2 * EDGE, IMG_W - 2 * EDGE)

    if mode == 'mapping':
        return y
    # segmentation_conv[3]: Conv2d(SEG_DIM, NUM_CLS, 3, padding=1); argmax over channels
    y = pallas_conv3x3(y, params['conv2_wmat'], params['conv2_b'], NUM_CLS)
    return jnp.argmax(y, axis=1).squeeze()


# ======================= deterministic parameter init =======================

def init_params(key):
    keys = iter(jax.random.split(key, 256))

    def nrm(shape, scale=0.02, dtype=jnp.float32):
        return (scale * jax.random.normal(next(keys), shape, jnp.float32)).astype(dtype)

    D, Hm = EMBED, MLP_RATIO * EMBED
    hd = D // HEADS
    Hp = (IMG_H - 2 * EDGE) // 14
    Wp = (IMG_W - 2 * EDGE) // 14
    num_patches = Hp * Wp
    n_real = 1 + num_patches
    n_pad = _round_up(n_real, 8)

    patch_w = nrm((IN_CH * PATCH * PATCH, D))
    patch_b = nrm((D,))
    cls = nrm((1, 1, D))
    pos = nrm((1, n_real, D))      # pos-embed interpolation is identity at this size

    # Fold cls token + positional embedding + patch-embed bias into a single
    # additive base tensor: row 0 = cls + pos[0]; rows 1..P = pos[i] + patch_b;
    # padded rows = 0.  (The fused kernel just adds it to the patch matmul.)
    base = pos[0]
    base = base.at[0].add(cls[0, 0])
    base = base.at[1:].add(patch_b)
    base = jnp.pad(base, ((0, n_pad - n_real), (0, 0)))

    def stack(fn):
        return jnp.stack([fn() for _ in range(DEPTH)], axis=0)

    # Fold the attention scale (head_dim**-0.5) into the Q columns of qkv.
    qkv_w = stack(lambda: nrm((D, 3 * D)))
    qkv_b = stack(lambda: nrm((1, 3 * D)))
    scale = hd ** -0.5
    qkv_w = qkv_w.at[:, :, :D].multiply(scale)
    qkv_b = qkv_b.at[:, :, :D].multiply(scale)

    blocks = dict(
        ln1_g=jnp.ones((DEPTH, 1, D), jnp.float32),
        ln1_b=jnp.zeros((DEPTH, 1, D), jnp.float32),
        qkv_w=qkv_w.astype(jnp.bfloat16),
        qkv_b=qkv_b.astype(jnp.float32),
        proj_w=stack(lambda: nrm((D, D))).astype(jnp.bfloat16),
        proj_b=stack(lambda: nrm((1, D))),
        ls1=jnp.ones((DEPTH, 1, D), jnp.float32),    # LayerScale init_values=1.0
        ln2_g=jnp.ones((DEPTH, 1, D), jnp.float32),
        ln2_b=jnp.zeros((DEPTH, 1, D), jnp.float32),
        fc1_w=stack(lambda: nrm((D, Hm))).astype(jnp.bfloat16),
        fc1_b=stack(lambda: nrm((1, Hm))),
        fc2_w=stack(lambda: nrm((Hm, D))).astype(jnp.bfloat16),
        fc2_b=stack(lambda: nrm((1, D))),
        ls2=jnp.ones((DEPTH, 1, D), jnp.float32),
    )

    return {
        'patch_wmat': patch_w.astype(jnp.bfloat16),   # (K, N) pre-transposed, bf16
        'tok_base': base,
        'blocks': blocks,
        'norm_g': jnp.ones((1, D), jnp.float32),
        'norm_b': jnp.zeros((1, D), jnp.float32),
        'conv1_wmat': nrm((SEG_DIM, D * 9), dtype=jnp.bfloat16),
        'conv1_b': nrm((SEG_DIM,)),
        'conv2_wmat': nrm((NUM_CLS, SEG_DIM * 9), dtype=jnp.bfloat16),
        'conv2_b': nrm((NUM_CLS,)),
    }


# ======================= main =======================

if __name__ == "__main__":
    x = jax.random.normal(jax.random.PRNGKey(0), (2, IN_CH, IMG_H, IMG_W), jnp.float32)
    params = init_params(jax.random.PRNGKey(1))

    fwd = jax.jit(functools.partial(dino2seg_forward, mode='mapping'))
    out = jax.block_until_ready(fwd(params, x))

    expected = (2, SEG_DIM, IMG_H - 2 * EDGE, IMG_W - 2 * EDGE)
    assert out.shape == expected, (out.shape, expected)
    assert out.dtype == jnp.float32
    assert bool(jnp.all(jnp.isfinite(out)))
    print("KERNEL_OK")
</pallas_src>

<mosaic_0001>
module attributes {stable_mosaic.version = 11 : i64} {
  func.func @kernel(%arg0: i32, %arg1: memref<48x588xbf16, #tpu.memory_space<vmem>>, %arg2: memref<24x64xf32, #tpu.memory_space<vmem>>, %arg3: memref<588x64xbf16, #tpu.memory_space<vmem>>, %arg4: memref<2x1x64xf32, #tpu.memory_space<vmem>>, %arg5: memref<2x1x64xf32, #tpu.memory_space<vmem>>, %arg6: memref<2x64x192xbf16, #tpu.memory_space<vmem>>, %arg7: memref<2x1x192xf32, #tpu.memory_space<vmem>>, %arg8: memref<2x64x64xbf16, #tpu.memory_space<vmem>>, %arg9: memref<2x1x64xf32, #tpu.memory_space<vmem>>, %arg10: memref<2x1x64xf32, #tpu.memory_space<vmem>>, %arg11: memref<2x1x64xf32, #tpu.memory_space<vmem>>, %arg12: memref<2x1x64xf32, #tpu.memory_space<vmem>>, %arg13: memref<2x64x256xbf16, #tpu.memory_space<vmem>>, %arg14: memref<2x1x256xf32, #tpu.memory_space<vmem>>, %arg15: memref<2x256x64xbf16, #tpu.memory_space<vmem>>, %arg16: memref<2x1x64xf32, #tpu.memory_space<vmem>>, %arg17: memref<2x1x64xf32, #tpu.memory_space<vmem>>, %arg18: memref<1x64xf32, #tpu.memory_space<vmem>>, %arg19: memref<1x64xf32, #tpu.memory_space<vmem>>, %arg20: memref<48x64xf32, #tpu.memory_space<vmem>>) attributes {dimension_semantics = [#tpu.dimension_semantics<parallel>], iteration_bounds = array<i64: 1>, scalar_prefetch = 0 : i64, scratch_operands = 0 : i64, tpu.core_type = #tpu.core_type<tc>, window_params = [{transform_indices = @transform_0, window_bounds = array<i64: 48, 588>}, {pipeline_mode = #tpu.pipeline_mode<synchronous>, transform_indices = @transform_1, window_bounds = array<i64: 24, 64>}, {pipeline_mode = #tpu.pipeline_mode<synchronous>, transform_indices = @transform_2, window_bounds = array<i64: 588, 64>}, {pipeline_mode = #tpu.pipeline_mode<synchronous>, transform_indices = @transform_3, window_bounds = array<i64: 2, 1, 64>}, {pipeline_mode = #tpu.pipeline_mode<synchronous>, transform_indices = @transform_4, window_bounds = array<i64: 2, 1, 64>}, {pipeline_mode = #tpu.pipeline_mode<synchronous>, transform_indices = @transform_5, window_bounds = array<i64: 2, 64, 192>}, {pipeline_mode = #tpu.pipeline_mode<synchronous>, transform_indices = @transform_6, window_bounds = array<i64: 2, 1, 192>}, {pipeline_mode = #tpu.pipeline_mode<synchronous>, transform_indices = @transform_7, window_bounds = array<i64: 2, 64, 64>}, {pipeline_mode = #tpu.pipeline_mode<synchronous>, transform_indices = @transform_8, window_bounds = array<i64: 2, 1, 64>}, {pipeline_mode = #tpu.pipeline_mode<synchronous>, transform_indices = @transform_9, window_bounds = array<i64: 2, 1, 64>}, {pipeline_mode = #tpu.pipeline_mode<synchronous>, transform_indices = @transform_10, window_bounds = array<i64: 2, 1, 64>}, {pipeline_mode = #tpu.pipeline_mode<synchronous>, transform_indices = @transform_11, window_bounds = array<i64: 2, 1, 64>}, {pipeline_mode = #tpu.pipeline_mode<synchronous>, transform_indices = @transform_12, window_bounds = array<i64: 2, 64, 256>}, {pipeline_mode = #tpu.pipeline_mode<synchronous>, transform_indices = @transform_13, window_bounds = array<i64: 2, 1, 256>}, {pipeline_mode = #tpu.pipeline_mode<synchronous>, transform_indices = @transform_14, window_bounds = array<i64: 2, 256, 64>}, {pipeline_mode = #tpu.pipeline_mode<synchronous>, transform_indices = @transform_15, window_bounds = array<i64: 2, 1, 64>}, {pipeline_mode = #tpu.pipeline_mode<synchronous>, transform_indices = @transform_16, window_bounds = array<i64: 2, 1, 64>}, {pipeline_mode = #tpu.pipeline_mode<synchronous>, transform_indices = @transform_17, window_bounds = array<i64: 1, 64>}, {pipeline_mode = #tpu.pipeline_mode<synchronous>, transform_indices = @transform_18, window_bounds = array<i64: 1, 64>}, {transform_indices = @transform_19, window_bounds = array<i64: 48, 64>}]} {
    %0 = tpu.iota {dimensions = array<i32: 0>} : vector<48x1xi32>
    %false = arith.constant false
    %1 = vector.broadcast %false : i1 to vector<48x1xi1>
    %c0_i32 = arith.constant 0 : i32
    %2 = vector.broadcast %c0_i32 : i32 to vector<48x1xi32>
    %3 = arith.cmpi sge, %0, %2 : vector<48x1xi32>
    %c17_i32 = arith.constant 17 : i32
    %4 = vector.broadcast %c17_i32 : i32 to vector<48x1xi32>
    %5 = arith.cmpi slt, %0, %4 : vector<48x1xi32>
    %6 = arith.andi %3, %5 : vector<48x1xi1>
    %7 = arith.ori %1, %6 : vector<48x1xi1>
    %c24_i32 = arith.constant 24 : i32
    %8 = vector.broadcast %c24_i32 : i32 to vector<48x1xi32>
    %9 = arith.cmpi sge, %0, %8 : vector<48x1xi32>
    %c41_i32 = arith.constant 41 : i32
    %10 = vector.broadcast %c41_i32 : i32 to vector<48x1xi32>
    %11 = arith.cmpi slt, %0, %10 : vector<48x1xi32>
    %12 = arith.andi %9, %11 : vector<48x1xi1>
    %13 = arith.ori %7, %12 : vector<48x1xi1>
    %14 = arith.extui %13 : vector<48x1xi1> to vector<48x1xi32>
    %15 = arith.sitofp %14 : vector<48x1xi32> to vector<48x1xf32>
    %16 = tpu.iota {dimensions = array<i32: 0>} : vector<96x64xi32>
    %17 = tpu.iota {dimensions = array<i32: 1>} : vector<96x64xi32>
    %false_0 = arith.constant false
    %18 = vector.broadcast %false_0 : i1 to vector<96x64xi1>
    %c0_i32_1 = arith.constant 0 : i32
    %19 = vector.broadcast %c0_i32_1 : i32 to vector<96x64xi32>
    %20 = arith.cmpi sge, %16, %19 : vector<96x64xi32>
    %c24_i32_2 = arith.constant 24 : i32
    %21 = vector.broadcast %c24_i32_2 : i32 to vector<96x64xi32>
    %22 = arith.cmpi slt, %16, %21 : vector<96x64xi32>
    %23 = arith.andi %20, %22 : vector<96x64xi1>
    %c0_i32_3 = arith.constant 0 : i32
    %24 = vector.broadcast %c0_i32_3 : i32 to vector<96x64xi32>
    %25 = arith.cmpi sge, %17, %24 : vector<96x64xi32>
    %26 = arith.andi %23, %25 : vector<96x64xi1>
    %c16_i32 = arith.constant 16 : i32
    %27 = vector.broadcast %c16_i32 : i32 to vector<96x64xi32>
    %28 = arith.cmpi slt, %17, %27 : vector<96x64xi32>
    %29 = arith.andi %26, %28 : vector<96x64xi1>
    %30 = arith.ori %18, %29 : vector<96x64xi1>
    %c24_i32_4 = arith.constant 24 : i32
    %31 = vector.broadcast %c24_i32_4 : i32 to vector<96x64xi32>
    %32 = arith.cmpi sge, %16, %31 : vector<96x64xi32>
    %c48_i32 = arith.constant 48 : i32
    %33 = vector.broadcast %c48_i32 : i32 to vector<96x64xi32>
    %34 = arith.cmpi slt, %16, %33 : vector<96x64xi32>
    %35 = arith.andi %32, %34 : vector<96x64xi1>
    %c16_i32_5 = arith.constant 16 : i32
    %36 = vector.broadcast %c16_i32_5 : i32 to vector<96x64xi32>
    %37 = arith.cmpi sge, %17, %36 : vector<96x64xi32>
    %38 = arith.andi %35, %37 : vector<96x64xi1>
    %c32_i32 = arith.constant 32 : i32
    %39 = vector.broadcast %c32_i32 : i32 to vector<96x64xi32>
    %40 = arith.cmpi slt, %17, %39 : vector<96x64xi32>
    %41 = arith.andi %38, %40 : vector<96x64xi1>
    %42 = arith.ori %30, %41 : vector<96x64xi1>
    %c48_i32_6 = arith.constant 48 : i32
    %43 = vector.broadcast %c48_i32_6 : i32 to vector<96x64xi32>
    %44 = arith.cmpi sge, %16, %43 : vector<96x64xi32>
    %c72_i32 = arith.constant 72 : i32
    %45 = vector.broadcast %c72_i32 : i32 to vector<96x64xi32>
    %46 = arith.cmpi slt, %16, %45 : vector<96x64xi32>
    %47 = arith.andi %44, %46 : vector<96x64xi1>
    %c32_i32_7 = arith.constant 32 : i32
    %48 = vector.broadcast %c32_i32_7 : i32 to vector<96x64xi32>
    %49 = arith.cmpi sge, %17, %48 : vector<96x64xi32>
    %50 = arith.andi %47, %49 : vector<96x64xi1>
    %c48_i32_8 = arith.constant 48 : i32
    %51 = vector.broadcast %c48_i32_8 : i32 to vector<96x64xi32>
    %52 = arith.cmpi slt, %17, %51 : vector<96x64xi32>
    %53 = arith.andi %50, %52 : vector<96x64xi1>
    %54 = arith.ori %42, %53 : vector<96x64xi1>
    %c72_i32_9 = arith.constant 72 : i32
    %55 = vector.broadcast %c72_i32_9 : i32 to vector<96x64xi32>
    %56 = arith.cmpi sge, %16, %55 : vector<96x64xi32>
    %c96_i32 = arith.constant 96 : i32
    %57 = vector.broadcast %c96_i32 : i32 to vector<96x64xi32>
    %58 = arith.cmpi slt, %16, %57 : vector<96x64xi32>
    %59 = arith.andi %56, %58 : vector<96x64xi1>
    %c48_i32_10 = arith.constant 48 : i32
    %60 = vector.broadcast %c48_i32_10 : i32 to vector<96x64xi32>
    %61 = arith.cmpi sge, %17, %60 : vector<96x64xi32>
    %62 = arith.andi %59, %61 : vector<96x64xi1>
    %c64_i32 = arith.constant 64 : i32
    %63 = vector.broadcast %c64_i32 : i32 to vector<96x64xi32>
    %64 = arith.cmpi slt, %17, %63 : vector<96x64xi32>
    %65 = arith.andi %62, %64 : vector<96x64xi1>
    %66 = arith.ori %54, %65 : vector<96x64xi1>
    %67 = arith.extui %66 : vector<96x64xi1> to vector<96x64xi32>
    %68 = arith.sitofp %67 : vector<96x64xi32> to vector<96x64xf32>
    %69 = arith.truncf %68 : vector<96x64xf32> to vector<96x64xbf16>
    %70 = tpu.iota {dimensions = array<i32: 1>} : vector<24x96xi32>
    %false_11 = arith.constant false
    %71 = vector.broadcast %false_11 : i1 to vector<24x96xi1>
    %c0_i32_12 = arith.constant 0 : i32
    %72 = vector.broadcast %c0_i32_12 : i32 to vector<24x96xi32>
    %73 = arith.cmpi sge, %70, %72 : vector<24x96xi32>
    %c17_i32_13 = arith.constant 17 : i32
    %74 = vector.broadcast %c17_i32_13 : i32 to vector<24x96xi32>
    %75 = arith.cmpi slt, %70, %74 : vector<24x96xi32>
    %76 = arith.andi %73, %75 : vector<24x96xi1>
    %77 = arith.ori %71, %76 : vector<24x96xi1>
    %c24_i32_14 = arith.constant 24 : i32
    %78 = vector.broadcast %c24_i32_14 : i32 to vector<24x96xi32>
    %79 = arith.cmpi sge, %70, %78 : vector<24x96xi32>
    %c41_i32_15 = arith.constant 41 : i32
    %80 = vector.broadcast %c41_i32_15 : i32 to vector<24x96xi32>
    %81 = arith.cmpi slt, %70, %80 : vector<24x96xi32>
    %82 = arith.andi %79, %81 : vector<24x96xi1>
    %83 = arith.ori %77, %82 : vector<24x96xi1>
    %c48_i32_16 = arith.constant 48 : i32
    %84 = vector.broadcast %c48_i32_16 : i32 to vector<24x96xi32>
    %85 = arith.cmpi sge, %70, %84 : vector<24x96xi32>
    %c65_i32 = arith.constant 65 : i32
    %86 = vector.broadcast %c65_i32 : i32 to vector<24x96xi32>
    %87 = arith.cmpi slt, %70, %86 : vector<24x96xi32>
    %88 = arith.andi %85, %87 : vector<24x96xi1>
    %89 = arith.ori %83, %88 : vector<24x96xi1>
    %c72_i32_17 = arith.constant 72 : i32
    %90 = vector.broadcast %c72_i32_17 : i32 to vector<24x96xi32>
    %91 = arith.cmpi sge, %70, %90 : vector<24x96xi32>
    %c89_i32 = arith.constant 89 : i32
    %92 = vector.broadcast %c89_i32 : i32 to vector<24x96xi32>
    %93 = arith.cmpi slt, %70, %92 : vector<24x96xi32>
    %94 = arith.andi %91, %93 : vector<24x96xi1>
    %95 = arith.ori %89, %94 : vector<24x96xi1>
    %c0 = arith.constant 0 : index
    %c0_18 = arith.constant 0 : index
    %96 = vector.load %arg2[%c0, %c0_18] : memref<24x64xf32, #tpu.memory_space<vmem>>, vector<24x64xf32>
    %97 = tpu.concatenate %96, %96 in 0 : vector<24x64xf32>, vector<24x64xf32> -> vector<48x64xf32>
    %c0_19 = arith.constant 0 : index
    %c0_20 = arith.constant 0 : index
    %98 = vector.load %arg1[%c0_19, %c0_20] : memref<48x588xbf16, #tpu.memory_space<vmem>>, vector<48x588xbf16>
    %c0_21 = arith.constant 0 : index
    %c0_22 = arith.constant 0 : index
    %99 = vector.load %arg3[%c0_21, %c0_22] : memref<588x64xbf16, #tpu.memory_space<vmem>>, vector<588x64xbf16>
    %cst = arith.constant dense<0.000000e+00> : vector<48x64xf32>
    %100 = tpu.matmul %98, %99, %cst {dimension_numbers = #tpu.dot_dimension_numbers<[1], [0], [0], [1], [0, 0, 1, 1], [], []>} : vector<48x588xbf16>, vector<588x64xbf16>, vector<48x64xf32> -> vector<48x64xf32>
    %101 = arith.addf %100, %97 : vector<48x64xf32>
    %c0_23 = arith.constant 0 : index
    %c0_24 = arith.constant 0 : index
    %c0_25 = arith.constant 0 : index
    %102 = vector.load %arg4[%c0_23, %c0_24, %c0_25] : memref<2x1x64xf32, #tpu.memory_space<vmem>>, vector<1x1x64xf32>
    %103 = vector.shape_cast %102 : vector<1x1x64xf32> to vector<1x64xf32>
    %c0_26 = arith.constant 0 : index
    %c0_27 = arith.constant 0 : index
    %c0_28 = arith.constant 0 : index
    %104 = vector.load %arg5[%c0_26, %c0_27, %c0_28] : memref<2x1x64xf32, #tpu.memory_space<vmem>>, vector<1x1x64xf32>
    %105 = vector.shape_cast %104 : vector<1x1x64xf32> to vector<1x64xf32>
    %cst_29 = arith.constant dense<0.000000e+00> : vector<48xf32>
    %106 = vector.multi_reduction <add>, %101, %cst_29 [1] : vector<48x64xf32> to vector<48xf32>
    %107 = vector.shape_cast %106 : vector<48xf32> to vector<48x1xf32>
    %cst_30 = arith.constant 6.400000e+01 : f32
    %108 = vector.broadcast %cst_30 : f32 to vector<48x1xf32>
    %109 = arith.divf %107, %108 : vector<48x1xf32>
    %110 = vector.broadcast %109 : vector<48x1xf32> to vector<48x64xf32>
    %111 = arith.subf %101, %110 : vector<48x64xf32>
    %112 = arith.mulf %111, %111 : vector<48x64xf32>
    %cst_31 = arith.constant dense<0.000000e+00> : vector<48xf32>
    %113 = vector.multi_reduction <add>, %112, %cst_31 [1] : vector<48x64xf32> to vector<48xf32>
    %114 = vector.shape_cast %113 : vector<48xf32> to vector<48x1xf32>
    %cst_32 = arith.constant 6.400000e+01 : f32
    %115 = vector.broadcast %cst_32 : f32 to vector<48x1xf32>
    %116 = arith.divf %114, %115 : vector<48x1xf32>
    %117 = vector.broadcast %109 : vector<48x1xf32> to vector<48x64xf32>
    %118 = arith.subf %101, %117 : vector<48x64xf32>
    %cst_33 = arith.constant 9.99999997E-7 : f32
    %119 = vector.broadcast %cst_33 : f32 to vector<48x1xf32>
    %120 = arith.addf %116, %119 : vector<48x1xf32>
    %121 = math.rsqrt %120 : vector<48x1xf32>
    %122 = vector.broadcast %121 : vector<48x1xf32> to vector<48x64xf32>
    %123 = arith.mulf %118, %122 : vector<48x64xf32>
    %124 = vector.broadcast %103 : vector<1x64xf32> to vector<48x64xf32>
    %125 = arith.mulf %123, %124 : vector<48x64xf32>
    %126 = vector.broadcast %105 : vector<1x64xf32> to vector<48x64xf32>
    %127 = arith.addf %125, %126 : vector<48x64xf32>
    %128 = arith.truncf %127 : vector<48x64xf32> to vector<48x64xbf16>
    %c0_34 = arith.constant 0 : index
    %c0_35 = arith.constant 0 : index
    %c0_36 = arith.constant 0 : index
    %129 = vector.load %arg6[%c0_34, %c0_35, %c0_36] : memref<2x64x192xbf16, #tpu.memory_space<vmem>>, vector<1x64x192xbf16>
    %130 = vector.shape_cast %129 : vector<1x64x192xbf16> to vector<64x192xbf16>
    %cst_37 = arith.constant dense<0.000000e+00> : vector<48x192xf32>
    %131 = tpu.matmul %128, %130, %cst_37 {dimension_numbers = #tpu.dot_dimension_numbers<[1], [0], [0], [1], [0, 0, 1, 1], [], []>} : vector<48x64xbf16>, vector<64x192xbf16>, vector<48x192xf32> -> vector<48x192xf32>
    %c0_38 = arith.constant 0 : index
    %c0_39 = arith.constant 0 : index
    %c0_40 = arith.constant 0 : index
    %132 = vector.load %arg7[%c0_38, %c0_39, %c0_40] : memref<2x1x192xf32, #tpu.memory_space<vmem>>, vector<1x1x192xf32>
    %133 = vector.shape_cast %132 : vector<1x1x192xf32> to vector<1x192xf32>
    %134 = vector.broadcast %133 : vector<1x192xf32> to vector<48x192xf32>
    %135 = arith.addf %131, %134 : vector<48x192xf32>
    %136 = vector.extract_strided_slice %135 {offsets = [0, 0], sizes = [24, 64], strides = [1, 1]} : vector<48x192xf32> to vector<24x64xf32>
    %137 = arith.truncf %136 : vector<24x64xf32> to vector<24x64xbf16>
    %138 = vector.extract_strided_slice %135 {offsets = [0, 64], sizes = [24, 64], strides = [1, 1]} : vector<48x192xf32> to vector<24x64xf32>
    %139 = arith.truncf %138 : vector<24x64xf32> to vector<24x64xbf16>
    %140 = vector.extract_strided_slice %135 {offsets = [0, 128], sizes = [24, 64], strides = [1, 1]} : vector<48x192xf32> to vector<24x64xf32>
    %141 = arith.truncf %140 : vector<24x64xf32> to vector<24x64xbf16>
    %142 = tpu.concatenate %139, %139, %139, %139 in 0 : vector<24x64xbf16>, vector<24x64xbf16>, vector<24x64xbf16>, vector<24x64xbf16> -> vector<96x64xbf16>
    %143 = arith.mulf %142, %69 : vector<96x64xbf16>
    %144 = tpu.concatenate %141, %141, %141, %141 in 0 : vector<24x64xbf16>, vector<24x64xbf16>, vector<24x64xbf16>, vector<24x64xbf16> -> vector<96x64xbf16>
    %145 = arith.mulf %144, %69 : vector<96x64xbf16>
    %cst_41 = arith.constant dense<0.000000e+00> : vector<24x96xf32>
    %146 = tpu.matmul %137, %143, %cst_41 {dimension_numbers = #tpu.dot_dimension_numbers<[1], [1], [0], [0], [0, 0, 1, 0], [], []>} : vector<24x64xbf16>, vector<96x64xbf16>, vector<24x96xf32> -> vector<24x96xf32>
    %cst_42 = arith.constant -1.000000e+30 : f32
    %147 = vector.broadcast %cst_42 : f32 to vector<24x96xf32>
    %148 = arith.select %95, %146, %147 : vector<24x96xi1>, vector<24x96xf32>
    %cst_43 = arith.constant dense<0xFF800000> : vector<24xf32>
    %149 = vector.multi_reduction <maximumf>, %148, %cst_43 [1] : vector<24x96xf32> to vector<24xf32>
    %150 = vector.shape_cast %149 : vector<24xf32> to vector<24x1xf32>
    %151 = vector.broadcast %150 : vector<24x1xf32> to vector<24x96xf32>
    %152 = arith.subf %148, %151 : vector<24x96xf32>
    %153 = math.exp %152 : vector<24x96xf32>
    %154 = arith.truncf %153 : vector<24x96xf32> to vector<24x96xbf16>
    %cst_44 = arith.constant dense<0.000000e+00> : vector<24x64xf32>
    %155 = tpu.matmul %154, %145, %cst_44 {dimension_numbers = #tpu.dot_dimension_numbers<[1], [0], [0], [1], [0, 0, 1, 1], [], []>} : vector<24x96xbf16>, vector<96x64xbf16>, vector<24x64xf32> -> vector<24x64xf32>
    %cst_45 = arith.constant dense<0.000000e+00> : vector<24x64xf32>
    %156 = tpu.matmul %154, %69, %cst_45 {dimension_numbers = #tpu.dot_dimension_numbers<[1], [0], [0], [1], [0, 0, 1, 1], [], []>} : vector<24x96xbf16>, vector<96x64xbf16>, vector<24x64xf32> -> vector<24x64xf32>
    %157 = tpu.reciprocal %156 {approx = true} : vector<24x64xf32> -> vector<24x64xf32>
    %158 = arith.mulf %155, %157 : vector<24x64xf32>
    %159 = vector.extract_strided_slice %135 {offsets = [24, 0], sizes = [24, 64], strides = [1, 1]} : vector<48x192xf32> to vector<24x64xf32>
    %160 = arith.truncf %159 : vector<24x64xf32> to vector<24x64xbf16>
    %161 = vector.extract_strided_slice %135 {offsets = [24, 64], sizes = [24, 64], strides = [1, 1]} : vector<48x192xf32> to vector<24x64xf32>
    %162 = arith.truncf %161 : vector<24x64xf32> to vector<24x64xbf16>
    %163 = vector.extract_strided_slice %135 {offsets = [24, 128], sizes = [24, 64], strides = [1, 1]} : vector<48x192xf32> to vector<24x64xf32>
    %164 = arith.truncf %163 : vector<24x64xf32> to vector<24x64xbf16>
    %165 = tpu.concatenate %162, %162, %162, %162 in 0 : vector<24x64xbf16>, vector<24x64xbf16>, vector<24x64xbf16>, vector<24x64xbf16> -> vector<96x64xbf16>
    %166 = arith.mulf %165, %69 : vector<96x64xbf16>
    %167 = tpu.concatenate %164, %164, %164, %164 in 0 : vector<24x64xbf16>, vector<24x64xbf16>, vector<24x64xbf16>, vector<24x64xbf16> -> vector<96x64xbf16>
    %168 = arith.mulf %167, %69 : vector<96x64xbf16>
    %cst_46 = arith.constant dense<0.000000e+00> : vector<24x96xf32>
    %169 = tpu.matmul %160, %166, %cst_46 {dimension_numbers = #tpu.dot_dimension_numbers<[1], [1], [0], [0], [0, 0, 1, 0], [], []>} : vector<24x64xbf16>, vector<96x64xbf16>, vector<24x96xf32> -> vector<24x96xf32>
    %cst_47 = arith.constant -1.000000e+30 : f32
    %170 = vector.broadcast %cst_47 : f32 to vector<24x96xf32>
    %171 = arith.select %95, %169, %170 : vector<24x96xi1>, vector<24x96xf32>
    %cst_48 = arith.constant dense<0xFF800000> : vector<24xf32>
    %172 = vector.multi_reduction <maximumf>, %171, %cst_48 [1] : vector<24x96xf32> to vector<24xf32>
    %173 = vector.shape_cast %172 : vector<24xf32> to vector<24x1xf32>
    %174 = vector.broadcast %173 : vector<24x1xf32> to vector<24x96xf32>
    %175 = arith.subf %171, %174 : vector<24x96xf32>
    %176 = math.exp %175 : vector<24x96xf32>
    %177 = arith.truncf %176 : vector<24x96xf32> to vector<24x96xbf16>
    %cst_49 = arith.constant dense<0.000000e+00> : vector<24x64xf32>
    %178 = tpu.matmul %177, %168, %cst_49 {dimension_numbers = #tpu.dot_dimension_numbers<[1], [0], [0], [1], [0, 0, 1, 1], [], []>} : vector<24x96xbf16>, vector<96x64xbf16>, vector<24x64xf32> -> vector<24x64xf32>
    %cst_50 = arith.constant dense<0.000000e+00> : vector<24x64xf32>
    %179 = tpu.matmul %177, %69, %cst_50 {dimension_numbers = #tpu.dot_dimension_numbers<[1], [0], [0], [1], [0, 0, 1, 1], [], []>} : vector<24x96xbf16>, vector<96x64xbf16>, vector<24x64xf32> -> vector<24x64xf32>
    %180 = tpu.reciprocal %179 {approx = true} : vector<24x64xf32> -> vector<24x64xf32>
    %181 = arith.mulf %178, %180 : vector<24x64xf32>
    %182 = tpu.concatenate %158, %181 in 0 : vector<24x64xf32>, vector<24x64xf32> -> vector<48x64xf32>
    %183 = arith.truncf %182 : vector<48x64xf32> to vector<48x64xbf16>
    %c0_51 = arith.constant 0 : index
    %c0_52 = arith.constant 0 : index
    %c0_53 = arith.constant 0 : index
    %184 = vector.load %arg8[%c0_51, %c0_52, %c0_53] : memref<2x64x64xbf16, #tpu.memory_space<vmem>>, vector<1x64x64xbf16>
    %185 = vector.shape_cast %184 : vector<1x64x64xbf16> to vector<64x64xbf16>
    %cst_54 = arith.constant dense<0.000000e+00> : vector<48x64xf32>
    %186 = tpu.matmul %183, %185, %cst_54 {dimension_numbers = #tpu.dot_dimension_numbers<[1], [0], [0], [1], [0, 0, 1, 1], [], []>} : vector<48x64xbf16>, vector<64x64xbf16>, vector<48x64xf32> -> vector<48x64xf32>
    %c0_55 = arith.constant 0 : index
    %c0_56 = arith.constant 0 : index
    %c0_57 = arith.constant 0 : index
    %187 = vector.load %arg9[%c0_55, %c0_56, %c0_57] : memref<2x1x64xf32, #tpu.memory_space<vmem>>, vector<1x1x64xf32>
    %188 = vector.shape_cast %187 : vector<1x1x64xf32> to vector<1x64xf32>
    %189 = vector.broadcast %188 : vector<1x64xf32> to vector<48x64xf32>
    %190 = arith.addf %186, %189 : vector<48x64xf32>
    %c0_58 = arith.constant 0 : index
    %c0_59 = arith.constant 0 : index
    %c0_60 = arith.constant 0 : index
    %191 = vector.load %arg10[%c0_58, %c0_59, %c0_60] : memref<2x1x64xf32, #tpu.memory_space<vmem>>, vector<1x1x64xf32>
    %192 = vector.shape_cast %191 : vector<1x1x64xf32> to vector<1x64xf32>
    %193 = vector.broadcast %192 : vector<1x64xf32> to vector<48x64xf32>
    %194 = arith.mulf %193, %190 : vector<48x64xf32>
    %195 = arith.addf %101, %194 : vector<48x64xf32>
    %c0_61 = arith.constant 0 : index
    %c0_62 = arith.constant 0 : index
    %c0_63 = arith.constant 0 : index
    %196 = vector.load %arg11[%c0_61, %c0_62, %c0_63] : memref<2x1x64xf32, #tpu.memory_space<vmem>>, vector<1x1x64xf32>
    %197 = vector.shape_cast %196 : vector<1x1x64xf32> to vector<1x64xf32>
    %c0_64 = arith.constant 0 : index
    %c0_65 = arith.constant 0 : index
    %c0_66 = arith.constant 0 : index
    %198 = vector.load %arg12[%c0_64, %c0_65, %c0_66] : memref<2x1x64xf32, #tpu.memory_space<vmem>>, vector<1x1x64xf32>
    %199 = vector.shape_cast %198 : vector<1x1x64xf32> to vector<1x64xf32>
    %cst_67 = arith.constant dense<0.000000e+00> : vector<48xf32>
    %200 = vector.multi_reduction <add>, %195, %cst_67 [1] : vector<48x64xf32> to vector<48xf32>
    %201 = vector.shape_cast %200 : vector<48xf32> to vector<48x1xf32>
    %cst_68 = arith.constant 6.400000e+01 : f32
    %202 = vector.broadcast %cst_68 : f32 to vector<48x1xf32>
    %203 = arith.divf %201, %202 : vector<48x1xf32>
    %204 = vector.broadcast %203 : vector<48x1xf32> to vector<48x64xf32>
    %205 = arith.subf %195, %204 : vector<48x64xf32>
    %206 = arith.mulf %205, %205 : vector<48x64xf32>
    %cst_69 = arith.constant dense<0.000000e+00> : vector<48xf32>
    %207 = vector.multi_reduction <add>, %206, %cst_69 [1] : vector<48x64xf32> to vector<48xf32>
    %208 = vector.shape_cast %207 : vector<48xf32> to vector<48x1xf32>
    %cst_70 = arith.constant 6.400000e+01 : f32
    %209 = vector.broadcast %cst_70 : f32 to vector<48x1xf32>
    %210 = arith.divf %208, %209 : vector<48x1xf32>
    %211 = vector.broadcast %203 : vector<48x1xf32> to vector<48x64xf32>
    %212 = arith.subf %195, %211 : vector<48x64xf32>
    %cst_71 = arith.constant 9.99999997E-7 : f32
    %213 = vector.broadcast %cst_71 : f32 to vector<48x1xf32>
    %214 = arith.addf %210, %213 : vector<48x1xf32>
    %215 = math.rsqrt %214 : vector<48x1xf32>
    %216 = vector.broadcast %215 : vector<48x1xf32> to vector<48x64xf32>
    %217 = arith.mulf %212, %216 : vector<48x64xf32>
    %218 = vector.broadcast %197 : vector<1x64xf32> to vector<48x64xf32>
    %219 = arith.mulf %217, %218 : vector<48x64xf32>
    %220 = vector.broadcast %199 : vector<1x64xf32> to vector<48x64xf32>
    %221 = arith.addf %219, %220 : vector<48x64xf32>
    %222 = arith.truncf %221 : vector<48x64xf32> to vector<48x64xbf16>
    %c0_72 = arith.constant 0 : index
    %c0_73 = arith.constant 0 : index
    %c0_74 = arith.constant 0 : index
    %223 = vector.load %arg13[%c0_72, %c0_73, %c0_74] : memref<2x64x256xbf16, #tpu.memory_space<vmem>>, vector<1x64x256xbf16>
    %224 = vector.shape_cast %223 : vector<1x64x256xbf16> to vector<64x256xbf16>
    %cst_75 = arith.constant dense<0.000000e+00> : vector<48x256xf32>
    %225 = tpu.matmul %222, %224, %cst_75 {dimension_numbers = #tpu.dot_dimension_numbers<[1], [0], [0], [1], [0, 0, 1, 1], [], []>} : vector<48x64xbf16>, vector<64x256xbf16>, vector<48x256xf32> -> vector<48x256xf32>
    %c0_76 = arith.constant 0 : index
    %c0_77 = arith.constant 0 : index
    %c0_78 = arith.constant 0 : index
    %226 = vector.load %arg14[%c0_76, %c0_77, %c0_78] : memref<2x1x256xf32, #tpu.memory_space<vmem>>, vector<1x1x256xf32>
    %227 = vector.shape_cast %226 : vector<1x1x256xf32> to vector<1x256xf32>
    %228 = vector.broadcast %227 : vector<1x256xf32> to vector<48x256xf32>
    %229 = arith.addf %225, %228 : vector<48x256xf32>
    %cst_79 = arith.constant 5.000000e-01 : f32
    %230 = vector.broadcast %cst_79 : f32 to vector<48x256xf32>
    %231 = arith.mulf %230, %229 : vector<48x256xf32>
    %cst_80 = arith.constant 0.707106769 : f32
    %232 = vector.broadcast %cst_80 : f32 to vector<48x256xf32>
    %233 = arith.mulf %229, %232 : vector<48x256xf32>
    %234 = math.erf %233 : vector<48x256xf32>
    %cst_81 = arith.constant 1.000000e+00 : f32
    %235 = vector.broadcast %cst_81 : f32 to vector<48x256xf32>
    %236 = arith.addf %235, %234 : vector<48x256xf32>
    %237 = arith.mulf %231, %236 : vector<48x256xf32>
    %238 = arith.truncf %237 : vector<48x256xf32> to vector<48x256xbf16>
    %c0_82 = arith.constant 0 : index
    %c0_83 = arith.constant 0 : index
    %c0_84 = arith.constant 0 : index
    %239 = vector.load %arg15[%c0_82, %c0_83, %c0_84] : memref<2x256x64xbf16, #tpu.memory_space<vmem>>, vector<1x256x64xbf16>
    %240 = vector.shape_cast %239 : vector<1x256x64xbf16> to vector<256x64xbf16>
    %cst_85 = arith.constant dense<0.000000e+00> : vector<48x64xf32>
    %241 = tpu.matmul %238, %240, %cst_85 {dimension_numbers = #tpu.dot_dimension_numbers<[1], [0], [0], [1], [0, 0, 1, 1], [], []>} : vector<48x256xbf16>, vector<256x64xbf16>, vector<48x64xf32> -> vector<48x64xf32>
    %c0_86 = arith.constant 0 : index
    %c0_87 = arith.constant 0 : index
    %c0_88 = arith.constant 0 : index
    %242 = vector.load %arg16[%c0_86, %c0_87, %c0_88] : memref<2x1x64xf32, #tpu.memory_space<vmem>>, vector<1x1x64xf32>
    %243 = vector.shape_cast %242 : vector<1x1x64xf32> to vector<1x64xf32>
    %244 = vector.broadcast %243 : vector<1x64xf32> to vector<48x64xf32>
    %245 = arith.addf %241, %244 : vector<48x64xf32>
    %c0_89 = arith.constant 0 : index
    %c0_90 = arith.constant 0 : index
    %c0_91 = arith.constant 0 : index
    %246 = vector.load %arg17[%c0_89, %c0_90, %c0_91] : memref<2x1x64xf32, #tpu.memory_space<vmem>>, vector<1x1x64xf32>
    %247 = vector.shape_cast %246 : vector<1x1x64xf32> to vector<1x64xf32>
    %248 = vector.broadcast %247 : vector<1x64xf32> to vector<48x64xf32>
    %249 = arith.mulf %248, %245 : vector<48x64xf32>
    %250 = arith.addf %195, %249 : vector<48x64xf32>
    %251 = vector.broadcast %15 : vector<48x1xf32> to vector<48x64xf32>
    %252 = arith.mulf %250, %251 : vector<48x64xf32>
    %c1 = arith.constant 1 : index
    %c0_92 = arith.constant 0 : index
    %c0_93 = arith.constant 0 : index
    %253 = vector.load %arg4[%c1, %c0_92, %c0_93] : memref<2x1x64xf32, #tpu.memory_space<vmem>>, vector<1x1x64xf32>
    %254 = vector.shape_cast %253 : vector<1x1x64xf32> to vector<1x64xf32>
    %c1_94 = arith.constant 1 : index
    %c0_95 = arith.constant 0 : index
    %c0_96 = arith.constant 0 : index
    %255 = vector.load %arg5[%c1_94, %c0_95, %c0_96] : memref<2x1x64xf32, #tpu.memory_space<vmem>>, vector<1x1x64xf32>
    %256 = vector.shape_cast %255 : vector<1x1x64xf32> to vector<1x64xf32>
    %cst_97 = arith.constant dense<0.000000e+00> : vector<48xf32>
    %257 = vector.multi_reduction <add>, %252, %cst_97 [1] : vector<48x64xf32> to vector<48xf32>
    %258 = vector.shape_cast %257 : vector<48xf32> to vector<48x1xf32>
    %cst_98 = arith.constant 6.400000e+01 : f32
    %259 = vector.broadcast %cst_98 : f32 to vector<48x1xf32>
    %260 = arith.divf %258, %259 : vector<48x1xf32>
    %261 = vector.broadcast %260 : vector<48x1xf32> to vector<48x64xf32>
    %262 = arith.subf %252, %261 : vector<48x64xf32>
    %263 = arith.mulf %262, %262 : vector<48x64xf32>
    %cst_99 = arith.constant dense<0.000000e+00> : vector<48xf32>
    %264 = vector.multi_reduction <add>, %263, %cst_99 [1] : vector<48x64xf32> to vector<48xf32>
    %265 = vector.shape_cast %264 : vector<48xf32> to vector<48x1xf32>
    %cst_100 = arith.constant 6.400000e+01 : f32
    %266 = vector.broadcast %cst_100 : f32 to vector<48x1xf32>
    %267 = arith.divf %265, %266 : vector<48x1xf32>
    %268 = vector.broadcast %260 : vector<48x1xf32> to vector<48x64xf32>
    %269 = arith.subf %252, %268 : vector<48x64xf32>
    %cst_101 = arith.constant 9.99999997E-7 : f32
    %270 = vector.broadcast %cst_101 : f32 to vector<48x1xf32>
    %271 = arith.addf %267, %270 : vector<48x1xf32>
    %272 = math.rsqrt %271 : vector<48x1xf32>
    %273 = vector.broadcast %272 : vector<48x1xf32> to vector<48x64xf32>
    %274 = arith.mulf %269, %273 : vector<48x64xf32>
    %275 = vector.broadcast %254 : vector<1x64xf32> to vector<48x64xf32>
    %276 = arith.mulf %274, %275 : vector<48x64xf32>
    %277 = vector.broadcast %256 : vector<1x64xf32> to vector<48x64xf32>
    %278 = arith.addf %276, %277 : vector<48x64xf32>
    %279 = arith.truncf %278 : vector<48x64xf32> to vector<48x64xbf16>
    %c1_102 = arith.constant 1 : index
    %c0_103 = arith.constant 0 : index
    %c0_104 = arith.constant 0 : index
    %280 = vector.load %arg6[%c1_102, %c0_103, %c0_104] : memref<2x64x192xbf16, #tpu.memory_space<vmem>>, vector<1x64x192xbf16>
    %281 = vector.shape_cast %280 : vector<1x64x192xbf16> to vector<64x192xbf16>
    %cst_105 = arith.constant dense<0.000000e+00> : vector<48x192xf32>
    %282 = tpu.matmul %279, %281, %cst_105 {dimension_numbers = #tpu.dot_dimension_numbers<[1], [0], [0], [1], [0, 0, 1, 1], [], []>} : vector<48x64xbf16>, vector<64x192xbf16>, vector<48x192xf32> -> vector<48x192xf32>
    %c1_106 = arith.constant 1 : index
    %c0_107 = arith.constant 0 : index
    %c0_108 = arith.constant 0 : index
    %283 = vector.load %arg7[%c1_106, %c0_107, %c0_108] : memref<2x1x192xf32, #tpu.memory_space<vmem>>, vector<1x1x192xf32>
    %284 = vector.shape_cast %283 : vector<1x1x192xf32> to vector<1x192xf32>
    %285 = vector.broadcast %284 : vector<1x192xf32> to vector<48x192xf32>
    %286 = arith.addf %282, %285 : vector<48x192xf32>
    %287 = vector.extract_strided_slice %286 {offsets = [0, 0], sizes = [24, 64], strides = [1, 1]} : vector<48x192xf32> to vector<24x64xf32>
    %288 = arith.truncf %287 : vector<24x64xf32> to vector<24x64xbf16>
    %289 = vector.extract_strided_slice %286 {offsets = [0, 64], sizes = [24, 64], strides = [1, 1]} : vector<48x192xf32> to vector<24x64xf32>
    %290 = arith.truncf %289 : vector<24x64xf32> to vector<24x64xbf16>
    %291 = vector.extract_strided_slice %286 {offsets = [0, 128], sizes = [24, 64], strides = [1, 1]} : vector<48x192xf32> to vector<24x64xf32>
    %292 = arith.truncf %291 : vector<24x64xf32> to vector<24x64xbf16>
    %293 = tpu.concatenate %290, %290, %290, %290 in 0 : vector<24x64xbf16>, vector<24x64xbf16>, vector<24x64xbf16>, vector<24x64xbf16> -> vector<96x64xbf16>
    %294 = arith.mulf %293, %69 : vector<96x64xbf16>
    %295 = tpu.concatenate %292, %292, %292, %292 in 0 : vector<24x64xbf16>, vector<24x64xbf16>, vector<24x64xbf16>, vector<24x64xbf16> -> vector<96x64xbf16>
    %296 = arith.mulf %295, %69 : vector<96x64xbf16>
    %cst_109 = arith.constant dense<0.000000e+00> : vector<24x96xf32>
    %297 = tpu.matmul %288, %294, %cst_109 {dimension_numbers = #tpu.dot_dimension_numbers<[1], [1], [0], [0], [0, 0, 1, 0], [], []>} : vector<24x64xbf16>, vector<96x64xbf16>, vector<24x96xf32> -> vector<24x96xf32>
    %cst_110 = arith.constant -1.000000e+30 : f32
    %298 = vector.broadcast %cst_110 : f32 to vector<24x96xf32>
    %299 = arith.select %95, %297, %298 : vector<24x96xi1>, vector<24x96xf32>
    %cst_111 = arith.constant dense<0xFF800000> : vector<24xf32>
    %300 = vector.multi_reduction <maximumf>, %299, %cst_111 [1] : vector<24x96xf32> to vector<24xf32>
    %301 = vector.shape_cast %300 : vector<24xf32> to vector<24x1xf32>
    %302 = vector.broadcast %301 : vector<24x1xf32> to vector<24x96xf32>
    %303 = arith.subf %299, %302 : vector<24x96xf32>
    %304 = math.exp %303 : vector<24x96xf32>
    %305 = arith.truncf %304 : vector<24x96xf32> to vector<24x96xbf16>
    %cst_112 = arith.constant dense<0.000000e+00> : vector<24x64xf32>
    %306 = tpu.matmul %305, %296, %cst_112 {dimension_numbers = #tpu.dot_dimension_numbers<[1], [0], [0], [1], [0, 0, 1, 1], [], []>} : vector<24x96xbf16>, vector<96x64xbf16>, vector<24x64xf32> -> vector<24x64xf32>
    %cst_113 = arith.constant dense<0.000000e+00> : vector<24x64xf32>
    %307 = tpu.matmul %305, %69, %cst_113 {dimension_numbers = #tpu.dot_dimension_numbers<[1], [0], [0], [1], [0, 0, 1, 1], [], []>} : vector<24x96xbf16>, vector<96x64xbf16>, vector<24x64xf32> -> vector<24x64xf32>
    %308 = tpu.reciprocal %307 {approx = true} : vector<24x64xf32> -> vector<24x64xf32>
    %309 = arith.mulf %306, %308 : vector<24x64xf32>
    %310 = vector.extract_strided_slice %286 {offsets = [24, 0], sizes = [24, 64], strides = [1, 1]} : vector<48x192xf32> to vector<24x64xf32>
    %311 = arith.truncf %310 : vector<24x64xf32> to vector<24x64xbf16>
    %312 = vector.extract_strided_slice %286 {offsets = [24, 64], sizes = [24, 64], strides = [1, 1]} : vector<48x192xf32> to vector<24x64xf32>
    %313 = arith.truncf %312 : vector<24x64xf32> to vector<24x64xbf16>
    %314 = vector.extract_strided_slice %286 {offsets = [24, 128], sizes = [24, 64], strides = [1, 1]} : vector<48x192xf32> to vector<24x64xf32>
    %315 = arith.truncf %314 : vector<24x64xf32> to vector<24x64xbf16>
    %316 = tpu.concatenate %313, %313, %313, %313 in 0 : vector<24x64xbf16>, vector<24x64xbf16>, vector<24x64xbf16>, vector<24x64xbf16> -> vector<96x64xbf16>
    %317 = arith.mulf %316, %69 : vector<96x64xbf16>
    %318 = tpu.concatenate %315, %315, %315, %315 in 0 : vector<24x64xbf16>, vector<24x64xbf16>, vector<24x64xbf16>, vector<24x64xbf16> -> vector<96x64xbf16>
    %319 = arith.mulf %318, %69 : vector<96x64xbf16>
    %cst_114 = arith.constant dense<0.000000e+00> : vector<24x96xf32>
    %320 = tpu.matmul %311, %317, %cst_114 {dimension_numbers = #tpu.dot_dimension_numbers<[1], [1], [0], [0], [0, 0, 1, 0], [], []>} : vector<24x64xbf16>, vector<96x64xbf16>, vector<24x96xf32> -> vector<24x96xf32>
    %cst_115 = arith.constant -1.000000e+30 : f32
    %321 = vector.broadcast %cst_115 : f32 to vector<24x96xf32>
    %322 = arith.select %95, %320, %321 : vector<24x96xi1>, vector<24x96xf32>
    %cst_116 = arith.constant dense<0xFF800000> : vector<24xf32>
    %323 = vector.multi_reduction <maximumf>, %322, %cst_116 [1] : vector<24x96xf32> to vector<24xf32>
    %324 = vector.shape_cast %323 : vector<24xf32> to vector<24x1xf32>
    %325 = vector.broadcast %324 : vector<24x1xf32> to vector<24x96xf32>
    %326 = arith.subf %322, %325 : vector<24x96xf32>
    %327 = math.exp %326 : vector<24x96xf32>
    %328 = arith.truncf %327 : vector<24x96xf32> to vector<24x96xbf16>
    %cst_117 = arith.constant dense<0.000000e+00> : vector<24x64xf32>
    %329 = tpu.matmul %328, %319, %cst_117 {dimension_numbers = #tpu.dot_dimension_numbers<[1], [0], [0], [1], [0, 0, 1, 1], [], []>} : vector<24x96xbf16>, vector<96x64xbf16>, vector<24x64xf32> -> vector<24x64xf32>
    %cst_118 = arith.constant dense<0.000000e+00> : vector<24x64xf32>
    %330 = tpu.matmul %328, %69, %cst_118 {dimension_numbers = #tpu.dot_dimension_numbers<[1], [0], [0], [1], [0, 0, 1, 1], [], []>} : vector<24x96xbf16>, vector<96x64xbf16>, vector<24x64xf32> -> vector<24x64xf32>
    %331 = tpu.reciprocal %330 {approx = true} : vector<24x64xf32> -> vector<24x64xf32>
    %332 = arith.mulf %329, %331 : vector<24x64xf32>
    %333 = tpu.concatenate %309, %332 in 0 : vector<24x64xf32>, vector<24x64xf32> -> vector<48x64xf32>
    %334 = arith.truncf %333 : vector<48x64xf32> to vector<48x64xbf16>
    %c1_119 = arith.constant 1 : index
    %c0_120 = arith.constant 0 : index
    %c0_121 = arith.constant 0 : index
    %335 = vector.load %arg8[%c1_119, %c0_120, %c0_121] : memref<2x64x64xbf16, #tpu.memory_space<vmem>>, vector<1x64x64xbf16>
    %336 = vector.shape_cast %335 : vector<1x64x64xbf16> to vector<64x64xbf16>
    %cst_122 = arith.constant dense<0.000000e+00> : vector<48x64xf32>
    %337 = tpu.matmul %334, %336, %cst_122 {dimension_numbers = #tpu.dot_dimension_numbers<[1], [0], [0], [1], [0, 0, 1, 1], [], []>} : vector<48x64xbf16>, vector<64x64xbf16>, vector<48x64xf32> -> vector<48x64xf32>
    %c1_123 = arith.constant 1 : index
    %c0_124 = arith.constant 0 : index
    %c0_125 = arith.constant 0 : index
    %338 = vector.load %arg9[%c1_123, %c0_124, %c0_125] : memref<2x1x64xf32, #tpu.memory_space<vmem>>, vector<1x1x64xf32>
    %339 = vector.shape_cast %338 : vector<1x1x64xf32> to vector<1x64xf32>
    %340 = vector.broadcast %339 : vector<1x64xf32> to vector<48x64xf32>
    %341 = arith.addf %337, %340 : vector<48x64xf32>
    %c1_126 = arith.constant 1 : index
    %c0_127 = arith.constant 0 : index
    %c0_128 = arith.constant 0 : index
    %342 = vector.load %arg10[%c1_126, %c0_127, %c0_128] : memref<2x1x64xf32, #tpu.memory_space<vmem>>, vector<1x1x64xf32>
    %343 = vector.shape_cast %342 : vector<1x1x64xf32> to vector<1x64xf32>
    %344 = vector.broadcast %343 : vector<1x64xf32> to vector<48x64xf32>
    %345 = arith.mulf %344, %341 : vector<48x64xf32>
    %346 = arith.addf %252, %345 : vector<48x64xf32>
    %c1_129 = arith.constant 1 : index
    %c0_130 = arith.constant 0 : index
    %c0_131 = arith.constant 0 : index
    %347 = vector.load %arg11[%c1_129, %c0_130, %c0_131] : memref<2x1x64xf32, #tpu.memory_space<vmem>>, vector<1x1x64xf32>
    %348 = vector.shape_cast %347 : vector<1x1x64xf32> to vector<1x64xf32>
    %c1_132 = arith.constant 1 : index
    %c0_133 = arith.constant 0 : index
    %c0_134 = arith.constant 0 : index
    %349 = vector.load %arg12[%c1_132, %c0_133, %c0_134] : memref<2x1x64xf32, #tpu.memory_space<vmem>>, vector<1x1x64xf32>
    %350 = vector.shape_cast %349 : vector<1x1x64xf32> to vector<1x64xf32>
    %cst_135 = arith.constant dense<0.000000e+00> : vector<48xf32>
    %351 = vector.multi_reduction <add>, %346, %cst_135 [1] : vector<48x64xf32> to vector<48xf32>
    %352 = vector.shape_cast %351 : vector<48xf32> to vector<48x1xf32>
    %cst_136 = arith.constant 6.400000e+01 : f32
    %353 = vector.broadcast %cst_136 : f32 to vector<48x1xf32>
    %354 = arith.divf %352, %353 : vector<48x1xf32>
    %355 = vector.broadcast %354 : vector<48x1xf32> to vector<48x64xf32>
    %356 = arith.subf %346, %355 : vector<48x64xf32>
    %357 = arith.mulf %356, %356 : vector<48x64xf32>
    %cst_137 = arith.constant dense<0.000000e+00> : vector<48xf32>
    %358 = vector.multi_reduction <add>, %357, %cst_137 [1] : vector<48x64xf32> to vector<48xf32>
    %359 = vector.shape_cast %358 : vector<48xf32> to vector<48x1xf32>
    %cst_138 = arith.constant 6.400000e+01 : f32
    %360 = vector.broadcast %cst_138 : f32 to vector<48x1xf32>
    %361 = arith.divf %359, %360 : vector<48x1xf32>
    %362 = vector.broadcast %354 : vector<48x1xf32> to vector<48x64xf32>
    %363 = arith.subf %346, %362 : vector<48x64xf32>
    %cst_139 = arith.constant 9.99999997E-7 : f32
    %364 = vector.broadcast %cst_139 : f32 to vector<48x1xf32>
    %365 = arith.addf %361, %364 : vector<48x1xf32>
    %366 = math.rsqrt %365 : vector<48x1xf32>
    %367 = vector.broadcast %366 : vector<48x1xf32> to vector<48x64xf32>
    %368 = arith.mulf %363, %367 : vector<48x64xf32>
    %369 = vector.broadcast %348 : vector<1x64xf32> to vector<48x64xf32>
    %370 = arith.mulf %368, %369 : vector<48x64xf32>
    %371 = vector.broadcast %350 : vector<1x64xf32> to vector<48x64xf32>
    %372 = arith.addf %370, %371 : vector<48x64xf32>
    %373 = arith.truncf %372 : vector<48x64xf32> to vector<48x64xbf16>
    %c1_140 = arith.constant 1 : index
    %c0_141 = arith.constant 0 : index
    %c0_142 = arith.constant 0 : index
    %374 = vector.load %arg13[%c1_140, %c0_141, %c0_142] : memref<2x64x256xbf16, #tpu.memory_space<vmem>>, vector<1x64x256xbf16>
    %375 = vector.shape_cast %374 : vector<1x64x256xbf16> to vector<64x256xbf16>
    %cst_143 = arith.constant dense<0.000000e+00> : vector<48x256xf32>
    %376 = tpu.matmul %373, %375, %cst_143 {dimension_numbers = #tpu.dot_dimension_numbers<[1], [0], [0], [1], [0, 0, 1, 1], [], []>} : vector<48x64xbf16>, vector<64x256xbf16>, vector<48x256xf32> -> vector<48x256xf32>
    %c1_144 = arith.constant 1 : index
    %c0_145 = arith.constant 0 : index
    %c0_146 = arith.constant 0 : index
    %377 = vector.load %arg14[%c1_144, %c0_145, %c0_146] : memref<2x1x256xf32, #tpu.memory_space<vmem>>, vector<1x1x256xf32>
    %378 = vector.shape_cast %377 : vector<1x1x256xf32> to vector<1x256xf32>
    %379 = vector.broadcast %378 : vector<1x256xf32> to vector<48x256xf32>
    %380 = arith.addf %376, %379 : vector<48x256xf32>
    %cst_147 = arith.constant 5.000000e-01 : f32
    %381 = vector.broadcast %cst_147 : f32 to vector<48x256xf32>
    %382 = arith.mulf %381, %380 : vector<48x256xf32>
    %cst_148 = arith.constant 0.707106769 : f32
    %383 = vector.broadcast %cst_148 : f32 to vector<48x256xf32>
    %384 = arith.mulf %380, %383 : vector<48x256xf32>
    %385 = math.erf %384 : vector<48x256xf32>
    %cst_149 = arith.constant 1.000000e+00 : f32
    %386 = vector.broadcast %cst_149 : f32 to vector<48x256xf32>
    %387 = arith.addf %386, %385 : vector<48x256xf32>
    %388 = arith.mulf %382, %387 : vector<48x256xf32>
    %389 = arith.truncf %388 : vector<48x256xf32> to vector<48x256xbf16>
    %c1_150 = arith.constant 1 : index
    %c0_151 = arith.constant 0 : index
    %c0_152 = arith.constant 0 : index
    %390 = vector.load %arg15[%c1_150, %c0_151, %c0_152] : memref<2x256x64xbf16, #tpu.memory_space<vmem>>, vector<1x256x64xbf16>
    %391 = vector.shape_cast %390 : vector<1x256x64xbf16> to vector<256x64xbf16>
    %cst_153 = arith.constant dense<0.000000e+00> : vector<48x64xf32>
    %392 = tpu.matmul %389, %391, %cst_153 {dimension_numbers = #tpu.dot_dimension_numbers<[1], [0], [0], [1], [0, 0, 1, 1], [], []>} : vector<48x256xbf16>, vector<256x64xbf16>, vector<48x64xf32> -> vector<48x64xf32>
    %c1_154 = arith.constant 1 : index
    %c0_155 = arith.constant 0 : index
    %c0_156 = arith.constant 0 : index
    %393 = vector.load %arg16[%c1_154, %c0_155, %c0_156] : memref<2x1x64xf32, #tpu.memory_space<vmem>>, vector<1x1x64xf32>
    %394 = vector.shape_cast %393 : vector<1x1x64xf32> to vector<1x64xf32>
    %395 = vector.broadcast %394 : vector<1x64xf32> to vector<48x64xf32>
    %396 = arith.addf %392, %395 : vector<48x64xf32>
    %c1_157 = arith.constant 1 : index
    %c0_158 = arith.constant 0 : index
    %c0_159 = arith.constant 0 : index
    %397 = vector.load %arg17[%c1_157, %c0_158, %c0_159] : memref<2x1x64xf32, #tpu.memory_space<vmem>>, vector<1x1x64xf32>
    %398 = vector.shape_cast %397 : vector<1x1x64xf32> to vector<1x64xf32>
    %399 = vector.broadcast %398 : vector<1x64xf32> to vector<48x64xf32>
    %400 = arith.mulf %399, %396 : vector<48x64xf32>
    %401 = arith.addf %346, %400 : vector<48x64xf32>
    %402 = vector.broadcast %15 : vector<48x1xf32> to vector<48x64xf32>
    %403 = arith.mulf %401, %402 : vector<48x64xf32>
    %c0_160 = arith.constant 0 : index
    %c0_161 = arith.constant 0 : index
    %404 = vector.load %arg18[%c0_160, %c0_161] : memref<1x64xf32, #tpu.memory_space<vmem>>, vector<1x64xf32>
    %c0_162 = arith.constant 0 : index
    %c0_163 = arith.constant 0 : index
    %405 = vector.load %arg19[%c0_162, %c0_163] : memref<1x64xf32, #tpu.memory_space<vmem>>, vector<1x64xf32>
    %cst_164 = arith.constant dense<0.000000e+00> : vector<48xf32>
    %406 = vector.multi_reduction <add>, %403, %cst_164 [1] : vector<48x64xf32> to vector<48xf32>
    %407 = vector.shape_cast %406 : vector<48xf32> to vector<48x1xf32>
    %cst_165 = arith.constant 6.400000e+01 : f32
    %408 = vector.broadcast %cst_165 : f32 to vector<48x1xf32>
    %409 = arith.divf %407, %408 : vector<48x1xf32>
    %410 = vector.broadcast %409 : vector<48x1xf32> to vector<48x64xf32>
    %411 = arith.subf %403, %410 : vector<48x64xf32>
    %412 = arith.mulf %411, %411 : vector<48x64xf32>
    %cst_166 = arith.constant dense<0.000000e+00> : vector<48xf32>
    %413 = vector.multi_reduction <add>, %412, %cst_166 [1] : vector<48x64xf32> to vector<48xf32>
    %414 = vector.shape_cast %413 : vector<48xf32> to vector<48x1xf32>
    %cst_167 = arith.constant 6.400000e+01 : f32
    %415 = vector.broadcast %cst_167 : f32 to vector<48x1xf32>
    %416 = arith.divf %414, %415 : vector<48x1xf32>
    %417 = vector.broadcast %409 : vector<48x1xf32> to vector<48x64xf32>
    %418 = arith.subf %403, %417 : vector<48x64xf32>
    %cst_168 = arith.constant 9.99999997E-7 : f32
    %419 = vector.broadcast %cst_168 : f32 to vector<48x1xf32>
    %420 = arith.addf %416, %419 : vector<48x1xf32>
    %421 = math.rsqrt %420 : vector<48x1xf32>
    %422 = vector.broadcast %421 : vector<48x1xf32> to vector<48x64xf32>
    %423 = arith.mulf %418, %422 : vector<48x64xf32>
    %424 = vector.broadcast %404 : vector<1x64xf32> to vector<48x64xf32>
    %425 = arith.mulf %423, %424 : vector<48x64xf32>
    %426 = vector.broadcast %405 : vector<1x64xf32> to vector<48x64xf32>
    %427 = arith.addf %425, %426 : vector<48x64xf32>
    %428 = vector.broadcast %15 : vector<48x1xf32> to vector<48x64xf32>
    %429 = arith.mulf %427, %428 : vector<48x64xf32>
    %c0_169 = arith.constant 0 : index
    %c0_170 = arith.constant 0 : index
    %430 = vector.load %arg20[%c0_169, %c0_170] : memref<48x64xf32, #tpu.memory_space<vmem>>, vector<48x64xf32>
    tpu.vector_store %arg20[%c0_169, %c0_170], %429 {strides = array<i32>} : memref<48x64xf32, #tpu.memory_space<vmem>>, vector<48x64xf32>,
    return
  }
  func.func @transform_0(%arg0: i32) -> (i32, i32) {
    %c0_i32 = arith.constant 0 : i32
    %c0_i32_0 = arith.constant 0 : i32
    return %arg0, %c0_i32 : i32, i32
  }
  func.func @transform_1(%arg0: i32) -> (i32, i32) {
    %c0_i32 = arith.constant 0 : i32
    %c0_i32_0 = arith.constant 0 : i32
    %c0_i32_1 = arith.constant 0 : i32
    return %c0_i32, %c0_i32_0 : i32, i32
  }
  func.func @transform_2(%arg0: i32) -> (i32, i32) {
    %c0_i32 = arith.constant 0 : i32
    %c0_i32_0 = arith.constant 0 : i32
    %c0_i32_1 = arith.constant 0 : i32
    return %c0_i32, %c0_i32_0 : i32, i32
  }
  func.func @transform_3(%arg0: i32) -> (i32, i32, i32) {
    %c0_i32 = arith.constant 0 : i32
    %c0_i32_0 = arith.constant 0 : i32
    %c0_i32_1 = arith.constant 0 : i32
    %c0_i32_2 = arith.constant 0 : i32
    return %c0_i32, %c0_i32_0, %c0_i32_1 : i32, i32, i32
  }
  func.func @transform_4(%arg0: i32) -> (i32, i32, i32) {
    %c0_i32 = arith.constant 0 : i32
    %c0_i32_0 = arith.constant 0 : i32
    %c0_i32_1 = arith.constant 0 : i32
    %c0_i32_2 = arith.constant 0 : i32
    return %c0_i32, %c0_i32_0, %c0_i32_1 : i32, i32, i32
  }
  func.func @transform_5(%arg0: i32) -> (i32, i32, i32) {
    %c0_i32 = arith.constant 0 : i32
    %c0_i32_0 = arith.constant 0 : i32
    %c0_i32_1 = arith.constant 0 : i32
    %c0_i32_2 = arith.constant 0 : i32
    return %c0_i32, %c0_i32_0, %c0_i32_1 : i32, i32, i32
  }
  func.func @transform_6(%arg0: i32) -> (i32, i32, i32) {
    %c0_i32 = arith.constant 0 : i32
    %c0_i32_0 = arith.constant 0 : i32
    %c0_i32_1 = arith.constant 0 : i32
    %c0_i32_2 = arith.constant 0 : i32
    return %c0_i32, %c0_i32_0, %c0_i32_1 : i32, i32, i32
  }
  func.func @transform_7(%arg0: i32) -> (i32, i32, i32) {
    %c0_i32 = arith.constant 0 : i32
    %c0_i32_0 = arith.constant 0 : i32
    %c0_i32_1 = arith.constant 0 : i32
    %c0_i32_2 = arith.constant 0 : i32
    return %c0_i32, %c0_i32_0, %c0_i32_1 : i32, i32, i32
  }
  func.func @transform_8(%arg0: i32) -> (i32, i32, i32) {
    %c0_i32 = arith.constant 0 : i32
    %c0_i32_0 = arith.constant 0 : i32
    %c0_i32_1 = arith.constant 0 : i32
    %c0_i32_2 = arith.constant 0 : i32
    return %c0_i32, %c0_i32_0, %c0_i32_1 : i32, i32, i32
  }
  func.func @transform_9(%arg0: i32) -> (i32, i32, i32) {
    %c0_i32 = arith.constant 0 : i32
    %c0_i32_0 = arith.constant 0 : i32
    %c0_i32_1 = arith.constant 0 : i32
    %c0_i32_2 = arith.constant 0 : i32
    return %c0_i32, %c0_i32_0, %c0_i32_1 : i32, i32, i32
  }
  func.func @transform_10(%arg0: i32) -> (i32, i32, i32) {
    %c0_i32 = arith.constant 0 : i32
    %c0_i32_0 = arith.constant 0 : i32
    %c0_i32_1 = arith.constant 0 : i32
    %c0_i32_2 = arith.constant 0 : i32
    return %c0_i32, %c0_i32_0, %c0_i32_1 : i32, i32, i32
  }
  func.func @transform_11(%arg0: i32) -> (i32, i32, i32) {
    %c0_i32 = arith.constant 0 : i32
    %c0_i32_0 = arith.constant 0 : i32
    %c0_i32_1 = arith.constant 0 : i32
    %c0_i32_2 = arith.constant 0 : i32
    return %c0_i32, %c0_i32_0, %c0_i32_1 : i32, i32, i32
  }
  func.func @transform_12(%arg0: i32) -> (i32, i32, i32) {
    %c0_i32 = arith.constant 0 : i32
    %c0_i32_0 = arith.constant 0 : i32
    %c0_i32_1 = arith.constant 0 : i32
    %c0_i32_2 = arith.constant 0 : i32
    return %c0_i32, %c0_i32_0, %c0_i32_1 : i32, i32, i32
  }
  func.func @transform_13(%arg0: i32) -> (i32, i32, i32) {
    %c0_i32 = arith.constant 0 : i32
    %c0_i32_0 = arith.constant 0 : i32
    %c0_i32_1 = arith.constant 0 : i32
    %c0_i32_2 = arith.constant 0 : i32
    return %c0_i32, %c0_i32_0, %c0_i32_1 : i32, i32, i32
  }
  func.func @transform_14(%arg0: i32) -> (i32, i32, i32) {
    %c0_i32 = arith.constant 0 : i32
    %c0_i32_0 = arith.constant 0 : i32
    %c0_i32_1 = arith.constant 0 : i32
    %c0_i32_2 = arith.constant 0 : i32
    return %c0_i32, %c0_i32_0, %c0_i32_1 : i32, i32, i32
  }
  func.func @transform_15(%arg0: i32) -> (i32, i32, i32) {
    %c0_i32 = arith.constant 0 : i32
    %c0_i32_0 = arith.constant 0 : i32
    %c0_i32_1 = arith.constant 0 : i32
    %c0_i32_2 = arith.constant 0 : i32
    return %c0_i32, %c0_i32_0, %c0_i32_1 : i32, i32, i32
  }
  func.func @transform_16(%arg0: i32) -> (i32, i32, i32) {
    %c0_i32 = arith.constant 0 : i32
    %c0_i32_0 = arith.constant 0 : i32
    %c0_i32_1 = arith.constant 0 : i32
    %c0_i32_2 = arith.constant 0 : i32
    return %c0_i32, %c0_i32_0, %c0_i32_1 : i32, i32, i32
  }
  func.func @transform_17(%arg0: i32) -> (i32, i32) {
    %c0_i32 = arith.constant 0 : i32
    %c0_i32_0 = arith.constant 0 : i32
    %c0_i32_1 = arith.constant 0 : i32
    return %c0_i32, %c0_i32_0 : i32, i32
  }
  func.func @transform_18(%arg0: i32) -> (i32, i32) {
    %c0_i32 = arith.constant 0 : i32
    %c0_i32_0 = arith.constant 0 : i32
    %c0_i32_1 = arith.constant 0 : i32
    return %c0_i32, %c0_i32_0 : i32, i32
  }
  func.func @transform_19(%arg0: i32) -> (i32, i32) {
    %c0_i32 = arith.constant 0 : i32
    %c0_i32_0 = arith.constant 0 : i32
    return %arg0, %c0_i32 : i32, i32
  }
}

module attributes {stable_mosaic.version = 11 : i64} {
  func.func @kernel(%arg0: i32, %arg1: memref<16x576xbf16, #tpu.memory_space<vmem>>, %arg2: memref<576x256xbf16, #tpu.memory_space<vmem>>, %arg3: memref<16x1xf32, #tpu.memory_space<vmem>>, %arg4: memref<16x256xf32, #tpu.memory_space<vmem>>) attributes {dimension_semantics = [#tpu.dimension_semantics<parallel>], iteration_bounds = array<i64: 2>, scalar_prefetch = 0 : i64, scratch_operands = 0 : i64, tpu.core_type = #tpu.core_type<tc>, window_params = [{pipeline_mode = #tpu.pipeline_mode<synchronous>, transform_indices = @transform_0, window_bounds = array<i64: 16, 576>}, {transform_indices = @transform_1, window_bounds = array<i64: 576, 256>}, {pipeline_mode = #tpu.pipeline_mode<synchronous>, transform_indices = @transform_2, window_bounds = array<i64: 16, 1>}, {transform_indices = @transform_3, window_bounds = array<i64: 16, 256>}]} {
    %c0 = arith.constant 0 : index
    %c0_0 = arith.constant 0 : index
    %0 = vector.load %arg1[%c0, %c0_0] : memref<16x576xbf16, #tpu.memory_space<vmem>>, vector<16x576xbf16>
    %c0_1 = arith.constant 0 : index
    %c0_2 = arith.constant 0 : index
    %1 = vector.load %arg2[%c0_1, %c0_2] : memref<576x256xbf16, #tpu.memory_space<vmem>>, vector<576x256xbf16>
    %cst = arith.constant dense<0.000000e+00> : vector<16x256xf32>
    %2 = tpu.matmul %0, %1, %cst {dimension_numbers = #tpu.dot_dimension_numbers<[1], [0], [0], [1], [0, 0, 1, 1], [], []>} : vector<16x576xbf16>, vector<576x256xbf16>, vector<16x256xf32> -> vector<16x256xf32>
    %c0_3 = arith.constant 0 : index
    %c0_4 = arith.constant 0 : index
    %3 = vector.load %arg3[%c0_3, %c0_4] : memref<16x1xf32, #tpu.memory_space<vmem>>, vector<16x1xf32>
    %4 = vector.broadcast %3 : vector<16x1xf32> to vector<16x256xf32>
    %5 = arith.addf %2, %4 : vector<16x256xf32>
    %c0_5 = arith.constant 0 : index
    %c0_6 = arith.constant 0 : index
    %6 = vector.load %arg4[%c0_5, %c0_6] : memref<16x256xf32, #tpu.memory_space<vmem>>, vector<16x256xf32>
    tpu.vector_store %arg4[%c0_5, %c0_6], %5 {strides = array<i32>} : memref<16x256xf32, #tpu.memory_space<vmem>>, vector<16x256xf32>,
    return
  }
  func.func @transform_0(%arg0: i32) -> (i32, i32) {
    %c0_i32 = arith.constant 0 : i32
    %c0_i32_0 = arith.constant 0 : i32
    %c0_i32_1 = arith.constant 0 : i32
    return %c0_i32, %c0_i32_0 : i32, i32
  }
  func.func @transform_1(%arg0: i32) -> (i32, i32) {
    %c0_i32 = arith.constant 0 : i32
    %c0_i32_0 = arith.constant 0 : i32
    return %c0_i32, %arg0 : i32, i32
  }
  func.func @transform_2(%arg0: i32) -> (i32, i32) {
    %c0_i32 = arith.constant 0 : i32
    %c0_i32_0 = arith.constant 0 : i32
    %c0_i32_1 = arith.constant 0 : i32
    return %c0_i32, %c0_i32_0 : i32, i32
  }
  func.func @transform_3(%arg0: i32) -> (i32, i32) {
    %c0_i32 = arith.constant 0 : i32
    %c0_i32_0 = arith.constant 0 : i32
    return %c0_i32, %arg0 : i32, i32
  }
}

</mosaic_0001>

<bundles_post_ra>
// kernel: dino2seg_forward.2
= control target key start
LH: loop header
LB: loop body
LE: loop exit
PB: predicated region body
PF: predicated region fallthrough
CT: control target
= control target key end

     0   :  { %v5156_v33 = vmov 0.0   ;;  %vm848_vm0 = vcmask 1045504   ;;  %vm5157_vm1 = vmmov 0   ;;  %vm838_vm2 = vcmask 621568   ;;  %s5159_s22 = smov 64   ;;  %s6592_s2 = inlined_call_operand.vmem [shape: bf16[588,64], index: 2, kind: input, shape index: {}]   ;;  %s6593_s0 = inlined_call_operand.vmem [shape: bf16[48,588], index: 0, kind: input, shape index: {}]   ;;  %s6594_s1 = inlined_call_operand.vmem [shape: f32[24,64], index: 1, kind: input, shape index: {}]   ;;  %s6595_s5 = inlined_call_operand.vmem [shape: bf16[2,64,192], index: 5, kind: input, shape index: {}]   ;;  %s6596_s3 = inlined_call_operand.vmem [shape: f32[2,1,64], index: 3, kind: input, shape index: {}]   ;;  %s6597_s4 = inlined_call_operand.vmem [shape: f32[2,1,64], index: 4, kind: input, shape index: {}]   ;;  %s6598_s6 = inlined_call_operand.vmem [shape: f32[2,1,192], index: 6, kind: input, shape index: {}]   ;;  %s6599_s7 = inlined_call_operand.vmem [shape: bf16[2,64,64], index: 7, kind: input, shape index: {}]   ;;  %s6600_s8 = inlined_call_operand.vmem [shape: f32[2,1,64], index: 8, kind: input, shape index: {}]   ;;  %s6601_s9 = inlined_call_operand.vmem [shape: f32[2,1,64], index: 9, kind: input, shape index: {}]   ;;  %s6602_s12 = inlined_call_operand.vmem [shape: bf16[2,64,256], index: 12, kind: input, shape index: {}]   ;;  %s6603_s10 = inlined_call_operand.vmem [shape: f32[2,1,64], index: 10, kind: input, shape index: {}]   ;;  %s6604_s11 = inlined_call_operand.vmem [shape: f32[2,1,64], index: 11, kind: input, shape index: {}]   ;;  %s6605_s14 = inlined_call_operand.vmem [shape: bf16[2,256,64], index: 14, kind: input, shape index: {}]   ;;  %s6606_s13 = inlined_call_operand.vmem [shape: f32[2,1,256], index: 13, kind: input, shape index: {}]   ;;  %s6607_s15 = inlined_call_operand.vmem [shape: f32[2,1,64], index: 15, kind: input, shape index: {}]   ;;  %s6608_s16 = inlined_call_operand.vmem [shape: f32[2,1,64], index: 16, kind: input, shape index: {}]   ;;  %s6609_s17 = inlined_call_operand.vmem [shape: f32[1,64], index: 17, kind: input, shape index: {}]   ;;  %s6610_s18 = inlined_call_operand.vmem [shape: f32[1,64], index: 18, kind: input, shape index: {}]   ;;  %s6611_s19 = inlined_call_operand.vmem [shape: f32[48,64], index: 19, kind: output, shape index: {}]  }
   0x1   :  { %6616 = sst [smem:[#allocation2_spill]] %s6592_s2  ;;  %vm1025_vm3 = vcmask 523264  }
   0x2   :  { %6617 = sst [smem:[#allocation3_spill]] %s6593_s0 }
   0x3   :  { %6618 = sst [smem:[#allocation4_spill]] %s6594_s1 }
   0x4   :  { %6619 = sst [smem:[#allocation5_spill]] %s6595_s5 }
   0x5   :  { %s6620_s20 = sld [smem:[#allocation2_spill]] }
   0x6   :  { %s6621_s25 = sld [smem:[#allocation3_spill]] }
   0x7   :  { %s6622_s27 = sld [smem:[#allocation4_spill]] }
   0x8   :  { %s6623_s0 = sld [smem:[#allocation5_spill]] }
   0xb   :  { %v4854_v0 = vld [vmem:[%s6620_s20 + $0x78] sm:$0xff]   ;;  %v4858_v4 = vld [vmem:[%s6620_s20 + $0x70] sm:$0xff]   ;;  %v4862_v8 = vld [vmem:[%s6620_s20 + $0x68] sm:$0xff]  }
   0xc   :  { %v4855_v1 = vld [vmem:[%s6620_s20 + $0x38] sm:$0xff]   ;;  %4301 = vmatprep.subr.bf16.mxu0 %v4854_v0  ;;  %v4859_v5 = vld [vmem:[%s6620_s20 + $0x30] sm:$0xff]   ;;  %v4863_v9 = vld [vmem:[%s6620_s20 + $0x28] sm:$0xff]  }
   0xd   :  { %v4856_v2 = vld [vmem:[%s6620_s20 + $0xf8] sm:$0xff]   ;;  %4302 = vmatpush3.bf16.msra.mxu0 %v4855_v1  ;;  %v4860_v6 = vld [vmem:[%s6620_s20 + $0xf0] sm:$0xff]   ;;  %v4864_v10 = vld [vmem:[%s6620_s20 + $0xe8] sm:$0xff]  }
   0xe   :  { %v4857_v3 = vld [vmem:[%s6620_s20 + $0xb8] sm:$0xff]   ;;  %4335 = vmatprep.subr.bf16.mxu1 %v4856_v2  ;;  %4303 = vmatprep.subr.bf16.mxu0 %v4858_v4  ;;  %v4861_v7 = vld [vmem:[%s6620_s20 + $0xb0] sm:$0xff]   ;;  %v4865_v11 = vld [vmem:[%s6620_s20 + $0xa8] sm:$0xff]  }
   0xf   :  { %4336 = vmatpush3.bf16.msra.mxu1 %v4857_v3  ;;  %v4866_v12 = vld [vmem:[%s6620_s20 + $0x60] sm:$0xff]   ;;  %v4870_v16 = vld [vmem:[%s6620_s20 + $0x58] sm:$0xff]   ;;  %v4874_v20 = vld [vmem:[%s6620_s20 + $0x50] sm:$0xff]  }
  0x10   :  { %4337 = vmatprep.subr.bf16.mxu1 %v4860_v6  ;;  %v4867_v13 = vld [vmem:[%s6620_s20 + $0x20] sm:$0xff]   ;;  %v4871_v17 = vld [vmem:[%s6620_s20 + $0x18] sm:$0xff]   ;;  %v4875_v21 = vld [vmem:[%s6620_s20 + $0x10] sm:$0xff]  }
  0x11   :  { %4304 = vmatpush3.bf16.msra.mxu0 %v4859_v5  ;;  %v4868_v14 = vld [vmem:[%s6620_s20 + $0xe0] sm:$0xff]   ;;  %v4872_v18 = vld [vmem:[%s6620_s20 + $0xd8] sm:$0xff]   ;;  %v4876_v22 = vld [vmem:[%s6620_s20 + $0xd0] sm:$0xff]  }
  0x12   :  { %4305 = vmatprep.subr.bf16.mxu0 %v4862_v8  ;;  %v4869_v15 = vld [vmem:[%s6620_s20 + $0xa0] sm:$0xff]   ;;  %v4873_v19 = vld [vmem:[%s6620_s20 + $0x98] sm:$0xff]   ;;  %v4877_v23 = vld [vmem:[%s6620_s20 + $0x90] sm:$0xff]  }
  0x13   :  { %4338 = vmatpush3.bf16.msra.mxu1 %v4861_v7  ;;  %v4878_v24 = vld [vmem:[%s6620_s20 + $0x48] sm:$0xff]   ;;  %v4882_v28 = vld [vmem:[%s6620_s20 + $0x40] sm:$0xff]   ;;  %v4893_v39 = vld [vmem:[%s6620_s20 + $0x118] sm:$0xff]  }
  0x14   :  { %4339 = vmatprep.subr.bf16.mxu1 %v4864_v10  ;;  %v4879_v25 = vld [vmem:[%s6620_s20 + $0x8] sm:$0xff]   ;;  %v4883_v29 = vld [vmem:[%s6620_s20] sm:$0xff]   ;;  %v4900_v45 = vld [vmem:[%s6620_s20 + $0x110] sm:$0xff]  }
  0x15   :  { %4306 = vmatpush3.bf16.msra.mxu0 %v4863_v9  ;;  %v4880_v26 = vld [vmem:[%s6620_s20 + $0xc8] sm:$0xff]   ;;  %v4884_v30 = vld [vmem:[%s6620_s20 + $0xc0] sm:$0xff]   ;;  %v4905_v46 = vld [vmem:[%s6621_s25 + $0x5c] ss:$20 sps:$4 sm:$0xff]  }
  0x16   :  { %4307 = vmatprep.subr.bf16.mxu0 %v4866_v12  ;;  %v4881_v27 = vld [vmem:[%s6620_s20 + $0x88] sm:$0xff]   ;;  %v4885_v31 = vld [vmem:[%s6621_s25] ss:$20 sps:$4 sm:$0xff]   ;;  %v4887_v32 = vld [vmem:[%s6621_s25 + $0x4] ss:$20 sps:$4 sm:$0xff]  }
  0x17   :  { %4340 = vmatpush3.bf16.msra.mxu1 %v4865_v11  ;;  %v4888_v34 = vld [vmem:[%s6620_s20 + $0x80] sm:$0xff]   ;;  %884 = vmatprep.mubr.bf16.mxu0 %v4887_v32  ;;  %v4889_v35 = vld [vmem:[%s6621_s25 + $0x8] ss:$20 sps:$4 sm:$0xff]   ;;  %v4907_v49 = vld [vmem:[%s6621_s25 + $0x58] ss:$20 sps:$4 sm:$0xff]  }
  0x18   :  { %4341 = vmatprep.subr.bf16.mxu1 %v4868_v14  ;;  %v4891_v36 = vld [vmem:[%s6621_s25 + $0xc] ss:$20 sps:$4 sm:$0xff]   ;;  %v4897_v41 = vld [vmem:[%s6621_s25 + $0x34] ss:$20 sps:$4 sm:$0xff]   ;;  %v4899_v43 = vld [vmem:[%s6621_s25 + $0x30] ss:$20 sps:$4 sm:$0xff]  }
  0x19   :  { %4308 = vmatpush3.bf16.msra.mxu0 %v4867_v13  ;;  %v4892_v37 = vld [vmem:[%s6620_s20 + $0x120] sm:$0x3f]   ;;  %941 = vmatprep.mubr.bf16.mxu1 %v4891_v36  ;;  %v4896_v42 = vld [vmem:[%s6621_s25 + $0x28] ss:$20 sps:$4 sm:$0xff]   ;;  %v4910_v52 = vld [vmem:[%s6621_s25 + $0x38] ss:$20 sps:$4 sm:$0xff]  }
  0x1a   :  { %4309 = vmatprep.subr.bf16.mxu0 %v4870_v16  ;;  %v850_v38 = vsel %vm848_vm0, %v4892_v37, 0  ;;  %v4894_v40 = vld [vmem:[%s6621_s25 + $0x2c] ss:$20 sps:$4 sm:$0xff]   ;;  %v4901_v44 = vld [vmem:[%s6621_s25 + $0x54] ss:$20 sps:$4 sm:$0xff]  }
  0x1b   :  { %4342 = vmatpush3.bf16.msra.mxu1 %v4869_v15  ;;  %v4904_v47 = vld [vmem:[%s6620_s20 + $0x108] sm:$0xff]   ;;  %v4903_v48 = vld [vmem:[%s6621_s25 + $0x50] ss:$20 sps:$4 sm:$0xff]   ;;  %v4911_v53 = vld [vmem:[%s6621_s25 + $0x60] ss:$20 sps:$4 sm:$0xff]  }
  0x1c   :  { %4343 = vmatprep.subr.bf16.mxu1 %v4872_v18  ;;  %v4908_v50 = vld [vmem:[%s6620_s20 + $0x100] sm:$0xff]   ;;  %v448_v12 = vld [vmem:[%s6622_s27 + $0x8] sm:$0xff] }
  0x1d   :  { %4310 = vmatpush3.bf16.msra.mxu0 %v4871_v17  ;;  %v4909_v51 = vld [vmem:[%s6621_s25 + $0x10] ss:$20 sps:$4 sm:$0xff]  }
  0x1e   :  { %4311 = vmatprep.subr.bf16.mxu0 %v4874_v20  ;;  %v447_v5 = vld [vmem:[%s6622_s27] sm:$0xff]  ;;  %v449_v20 = vld [vmem:[%s6622_s27 + $0x10] sm:$0xff] }
  0x1f   :  { %4344 = vmatpush3.bf16.msra.mxu1 %v4873_v19 }
  0x20   :  { %4345 = vmatprep.subr.bf16.mxu1 %v4876_v22 }
  0x21   :  { %4312 = vmatpush3.bf16.msra.mxu0 %v4875_v21 }
  0x22   :  { %4313 = vmatprep.subr.bf16.mxu0 %v4878_v24 }
  0x23   :  { %4346 = vmatpush3.bf16.msra.mxu1 %v4877_v23 }
  0x24   :  { %4347 = vmatprep.subr.bf16.mxu1 %v4880_v26 }
  0x25   :  { %4314 = vmatpush3.bf16.msra.mxu0 %v4879_v25 }
  0x26   :  { %4315 = vmatprep.subr.bf16.mxu0 %v4882_v28 }
  0x27   :  { %4348 = vmatpush3.bf16.msra.mxu1 %v4881_v27 }
  0x28   :  { %4349 = vmatprep.subr.bf16.mxu1 %v4884_v30 }
  0x29   :  { %4316 = vmatpush3.bf16.msra.mxu0 %v4883_v29 }
  0x2a   :  { %4555 = vmatprep.subr.bf16.mxu0 %v5156_v33 }
  0x2b   :  { %4350 = vmatpush3.bf16.msra.mxu1 %v4888_v34 }
  0x2c   :  { %885 = vmatmul.mubr.bf16.vlgmr.msra.gmra.mxu0 %v4885_v31 }
  0x2d   :  { %4556 = vmatpush3.bf16.msra.mxu0 %v850_v38  ;;  %892 = vmatprep.mubr.bf16.mxu0 %v4894_v40 }
  0x2e   :  { %942 = vmatmul.mubr.bf16.vlgmr.msra.gmra.mxu1 %v4889_v35  ;;  %4557 = vmatprep.subr.bf16.mxu0 %v5156_v33 }
  0x2f   :  { %949 = vmatprep.mubr.bf16.mxu1 %v4897_v41 }
  0x31   :  { %4558 = vmatpush3.bf16.msra.mxu0 %v4893_v39 }
  0x32   :  { %4559 = vmatprep.subr.bf16.mxu0 %v5156_v33 }
  0x34   :  { %893 = vmatmul.mubr.bf16.gmra.mxu0 %v4896_v42 }
  0x35   :  { %900 = vmatprep.mubr.bf16.mxu0 %v4901_v44  ;;  %4560 = vmatpush3.bf16.msra.mxu0 %v4900_v45 }
  0x36   :  { %950 = vmatmul.mubr.bf16.gmra.mxu1 %v4899_v43  ;;  %4561 = vmatprep.subr.bf16.mxu0 %v5156_v33 }
  0x37   :  { %957 = vmatprep.mubr.bf16.mxu1 %v4905_v46 }
  0x39   :  { %4562 = vmatpush3.bf16.msra.mxu0 %v4904_v47 }
  0x3a   :  { %4563 = vmatprep.subr.bf16.mxu0 %v5156_v33 }
  0x3c   :  { %901 = vmatmul.mubr.bf16.gmra.mxu0 %v4903_v48 }
  0x3d   :  { %4565 = vmatprep.mubr.msk.bf16.mxu0 %vm5157_vm1, %v5156_v33  ;;  %4564 = vmatpush3.bf16.msra.mxu0 %v4908_v50 }
  0x3e   :  { %958 = vmatmul.mubr.bf16.gmra.mxu1 %v4907_v49 }
  0x44   :  { %4566 = vmatmul.mubr.msk.bf16.vlgmr.msra.gmra.mxu0 %vm838_vm2, %v4909_v51 }
  0x45   :  { %4569 = vmatprep.mubr.msk.bf16.mxu0 %vm5157_vm1, %v5156_v33 }
  0x4c   :  { %4570 = vmatmul.mubr.msk.bf16.gmra.mxu0 %vm838_vm2, %v4910_v52 }
  0x4d   :  { %4573 = vmatprep.mubr.msk.bf16.mxu0 %vm5157_vm1, %v5156_v33 }
  0x54   :  { %4574 = vmatmul.mubr.msk.bf16.gmra.mxu0 %vm838_vm2, %v4911_v53 }
  0xec   :  { %v4317_v54 = vpop.f32.mrf.mxu0 }
  0xee   :  { %v4318_v55 = vpop.f32.mrf.mxu0  ;;  %v4351_v56 = vpop.f32.mrf.mxu1 }
  0xef   :  { %v4319_v4 = vadd.f32 %v4318_v55, %v4317_v54 }
  0xf0   :  { %v4320_v57 = vpop.f32.mrf.mxu0  ;;  %v4352_v58 = vpop.f32.mrf.mxu1 }
  0xf1   :  { %v887_v9 = vadd.f32 %v4319_v4, %v447_v5  ;;  %v4353_v10 = vadd.f32 %v4352_v58, %v4351_v56 }
  0xf2   :  { %v4321_v59 = vpop.f32.mrf.mxu0  ;;  %v4354_v60 = vpop.f32.mrf.mxu1 }
  0xf3   :  { %v4322_v11 = vadd.f32 %v4321_v59, %v4320_v57  ;;  %v944_v19 = vadd.f32 %v4353_v10, %v887_v9 }
  0xf4   :  { %v4323_v61 = vpop.f32.mrf.mxu0  ;;  %v4355_v62 = vpop.f32.mrf.mxu1 }
  0xf5   :  { %v890_v16 = vadd.f32 %v4322_v11, %v448_v12  ;;  %v4356_v17 = vadd.f32 %v4355_v62, %v4354_v60 }
  0xf6   :  { %v4324_v63 = vpop.f32.mrf.mxu0  ;;  %v4357_v0 = vpop.f32.mrf.mxu1 }
  0xf7   :  { %v4325_v18 = vadd.f32 %v4324_v63, %v4323_v61  ;;  %v947_v28 = vadd.f32 %v4356_v17, %v890_v16 }
  0xf8   :  { %v4326_v1 = vpop.f32.mrf.mxu0  ;;  %v4358_v2 = vpop.f32.mrf.mxu1 }
  0xf9   :  { %v895_v26 = vadd.f32 %v4325_v18, %v449_v20  ;;  %v4359_v27 = vadd.f32 %v4358_v2, %v4357_v0 }
  0xfa   :  { %v4327_v3 = vpop.f32.mrf.mxu0  ;;  %v4360_v6 = vpop.f32.mrf.mxu1 }
  0xfb   :  { %v4328_v24 = vadd.f32 %v4327_v3, %v4326_v1  ;;  %v952_v38 = vadd.f32 %v4359_v27, %v895_v26 }
  0xfc   :  { %v4329_v7 = vpop.f32.mrf.mxu0  ;;  %v4361_v13 = vpop.f32.mrf.mxu1 }
  0xfd   :  { %v898_v34 = vadd.f32 %v4328_v24, %v447_v5  ;;  %v4362_v35 = vadd.f32 %v4361_v13, %v4360_v6 }
  0xfe   :  { %v4330_v8 = vpop.f32.mrf.mxu0  ;;  %v4363_v21 = vpop.f32.mrf.mxu1 }
  0xff   :  { %v4331_v37 = vadd.f32 %v4330_v8, %v4329_v7  ;;  %v955_v44 = vadd.f32 %v4362_v35, %v898_v34  ;;  %v4914_v35 = vld [vmem:[%s6623_s0 + $0x34] ss:$8 sps:$4 sm:$0xff]  }
 0x100   :  { %v4332_v14 = vpop.f32.mrf.mxu0  ;;  %v4364_v30 = vpop.f32.mrf.mxu1  ;;  %1209 = vmatprep.subr.bf16.mxu1 %v4914_v35 }
 0x101   :  { %v903_v45 = vadd.f32 %v4331_v37, %v448_v12  ;;  %v4365_v46 = vadd.f32 %v4364_v30, %v4363_v21  ;;  %v4917_v37 = vld [vmem:[%s6623_s0 + $0x24] ss:$8 sps:$4 sm:$0xff]  }
 0x102   :  { %v4333_v15 = vpop.f32.mrf.mxu0  ;;  %v4366_v40 = vpop.f32.mrf.mxu1 }
 0x103   :  { %v4334_v47 = vadd.f32 %v4333_v15, %v4332_v14  ;;  %v960_v55 = vadd.f32 %v4365_v46, %v903_v45  ;;  %v63_v45 = vlaneseq }
 0x104   :  { %v1000_v22 = vpop.f32.mrf.mxu0  ;;  %v4367_v49 = vpop.f32.mrf.mxu1 }
 0x105   :  { %v5437_v23 = vadd.f32 %v1000_v22, %v944_v19  ;;  %v906_v53 = vadd.f32 %v4334_v47, %v449_v20  ;;  %v4368_v54 = vadd.f32 %v4367_v49, %v4366_v40  ;;  %v4918_v40 = vld [vmem:[%s6623_s0 + $0x10] ss:$8 sps:$4 sm:$0xff]   ;;  %v5523_v46 = vand.u32 127, %v63_v45 }
 0x106   :  { %v4567_v25 = vpop.f32.mrf.mxu0 }
 0x107   :  { %v1026_v29 = vsel %vm1025_vm3, %v5437_v23, 0.0  ;;  %v963_v60 = vadd.f32 %v4368_v54, %v906_v53  ;;  %vm292_vm4 = vcmp.ge.s32.totalorder %v5523_v46, 32  ;;  %vm305_vm5 = vcmp.lt.s32.totalorder %v5523_v46, 48 }
 0x108   :  { %v1003_v31 = vpop.f32.mrf.mxu0  ;;  %1027 = vadd.xlane.f32.xlu0 %v1026_v29  ;;  %vm366_vm6 = vcmp.ge.s32.totalorder %v5523_v46, 48  ;;  %vm379_vm7 = vcmp.lt.s32.totalorder %v5523_v46, 64  ;;  %vm5529_vm8 = vmand %vm292_vm4, %vm305_vm5  ;;  %vm434_vm9 = vcmp.lt.s32.totalorder %v5523_v46, 17  ;;  %vm436_vm10 = vcmp.ge.s32.totalorder %v5523_v46, 24 }
 0x109   :  { %v5441_v32 = vadd.f32 %v1003_v31, %v947_v28  ;;  %vm437_vm11 = vcmp.lt.s32.totalorder %v5523_v46, 41  ;;  %vm5538_vm12 = vmand %vm366_vm6, %vm379_vm7  ;;  %v3994_v49 = vsel %vm5529_vm8, 1.0, %v5156_v33  ;;  %vm440_vm13 = vcmp.lt.s32.totalorder %v5523_v46, 65 }
 0x10a   :  { %v4568_v36 = vpop.f32.mrf.mxu0  ;;  %vm438_vm14 = vmand %vm436_vm10, %vm437_vm11  ;;  %vm443_vm0 = vcmp.ge.s32.totalorder %v5523_v46, 72  ;;  %vm444_vm2 = vcmp.lt.s32.totalorder %v5523_v46, 89  ;;  %vm218_vm7 = vcmp.ge.s32.totalorder %v5523_v46, 16  ;;  %vm175_vm11 = vcmp.lt.s32.totalorder %v5523_v46, 16 }
 0x10b   :  { %v1029_v39 = vsel %vm1025_vm3, %v5441_v32, 0.0  ;;  %v4912_v36 = vld [vmem:[%s6623_s0 + $0x30] ss:$8 sps:$4 sm:$0xff]   ;;  %vm5551_vm15 = vmor %vm434_vm9, %vm438_vm14  ;;  %vm231_vm9 = vcmp.lt.s32.totalorder %v5523_v46, 32  ;;  %vm1270_vm14 = vcmask 1043456  }
 0x10c   :  { %v1008_v41 = vpop.f32.mrf.mxu0  ;;  %1030 = vadd.xlane.f32.xlu0 %v1029_v39  ;;  %1210 = vmatpush1.bf16.msra.mxu1 %v4912_v36  ;;  %v4920_v39 = vld [vmem:[%s6623_s0 + $0x14] ss:$8 sps:$4 sm:$0xff]   ;;  %vm441_vm4 = vmand %vm366_vm6, %vm440_vm13 }
 0x10d   :  { %v5445_v42 = vadd.f32 %v1008_v41, %v952_v38  ;;  %v4915_v38 = vld [vmem:[%s6623_s0 + $0x20] ss:$8 sps:$4 sm:$0xff]   ;;  %1211 = vmatprep.subr.bf16.mxu1 %v4917_v37  ;;  %vm442_vm5 = vmor %vm5551_vm15, %vm441_vm4  ;;  %vm1418_vm15 = vcmask 785408  }
 0x10e   :  { %v4571_v43 = vpop.f32.mrf.mxu0  ;;  %v4921_v41 = vld [vmem:[%s6623_s0] ss:$8 sps:$4 sm:$0xff]   ;;  %vm445_vm10 = vmand %vm443_vm0, %vm444_vm2 }
 0x10f   :  { %v1032_v48 = vsel %vm1025_vm3, %v5445_v42, 0.0  ;;  %v4923_v43 = vld [vmem:[%s6623_s0 + $0x4] ss:$8 sps:$4 sm:$0xff]   ;;  %vm5572_vm6 = vmor %vm442_vm5, %vm445_vm10 }
 0x110   :  { %v1011_v50 = vpop.f32.mrf.mxu0  ;;  %1033 = vadd.xlane.f32.xlu1 %v1032_v48  ;;  %1212 = vmatpush1.bf16.msra.mxu1 %v4915_v38  ;;  %vm5576_vm13 = vmand %vm218_vm7, %vm231_vm9 }
 0x111   :  { %v5449_v51 = vadd.f32 %v1011_v50, %v955_v44  ;;  %1213 = vmatprep.subr.bf16.mxu1 %v4920_v39  ;;  %v5158_v44 = vmov 0   ;;  %v3997_v50 = vsel %vm5538_vm12, 1.0, %v5156_v33  ;;  %vm5752_vm0 = vmpackc.low %vm5538_vm12, %vm5538_vm12 }
 0x112   :  { %v4572_v52 = vpop.f32.mrf.mxu0  ;;  %1233 = vmatprep.mubr.bf16.mxu1 %v5158_v44  ;;  %v5557_v54 = vpack.c.bf16 %v3997_v50, %v3997_v50  ;;  %vm5773_vm2 = vmpackc.low %vm5538_vm12, %vm5529_vm8 }
 0x113   :  { %v1035_v56 = vsel %vm1025_vm3, %v5449_v51, 0.0  ;;  %v5549_v52 = vpack.c.bf16 %v3997_v50, %v3994_v49  ;;  %vm5788_vm4 = vmpackc.low %vm5529_vm8, %vm5529_vm8 }
 0x114   :  { %v1016_v57 = vpop.f32.mrf.mxu0  ;;  %1036 = vadd.xlane.f32.xlu1 %v1035_v56  ;;  %1214 = vmatpush1.bf16.msra.mxu1 %v4918_v40  ;;  %vm5801_vm12 = vmpackc.low %vm5576_vm13, %vm5576_vm13 }
 0x115   :  { %v5453_v58 = vadd.f32 %v1016_v57, %v960_v55  ;;  %1215 = vmatprep.subr.bf16.mxu1 %v4923_v43  ;;  %v5565_v55 = vpack.c.bf16 %v3994_v49, %v3994_v49  ;;  %vm5815_vm8 = vmpackc.low %vm5576_vm13, %vm175_vm11 }
 0x116   :  { %v4575_v59 = vpop.f32.mrf.mxu0  ;;  %vm5828_vm5 = vmpackc.low %vm175_vm11, %vm175_vm11 }
 0x117   :  { %v1038_v61 = vsel %vm1025_vm3, %v5453_v58, 0.0  ;;  %v3991_v59 = vsel %vm5576_vm13, 1.0, %v5156_v33 }
 0x118   :  { %v1019_v62 = vpop.f32.mrf.mxu0  ;;  %1039 = vadd.xlane.f32.xlu0 %v1038_v61  ;;  %1216 = vmatpush1.bf16.msra.mxu1 %v4921_v41  ;;  %v5588_v61 = vpack.c.bf16 %v3991_v59, %v3991_v59 }
 0x119   :  { %v5457_v63 = vadd.f32 %v1019_v62, %v963_v60  ;;  %v3988_v60 = vsel %vm175_vm11, 1.0, %v5156_v33 }
 0x11a   :  { %v4576_v0 = vpop.f32.mrf.mxu0  ;;  %v5590_v62 = vpack.c.bf16 %v3991_v59, %v3988_v60 }
 0x11b   :  { %v1041_v1 = vsel %vm1025_vm3, %v5457_v63, 0.0  ;;  %v5596_v0 = vpack.c.bf16 %v3988_v60, %v3988_v60 }
 0x11c   :  { %1042 = vadd.xlane.f32.xlu1 %v1041_v1 }
 0x191   :  { %v1028_v2 = vpop.xlane.xlu0 %1027 }
 0x192   :  { %v1045_v3 = vmul.f32 0.015625, %v1028_v2 }
 0x194   :  { %v5462_v4 = vsub.f32 %v5437_v23, %v1045_v3 }
 0x195   :  { %v1031_v5 = vpop.xlane.xlu0 %1030 }
 0x196   :  { %v1046_v6 = vmul.f32 0.015625, %v1031_v5  ;;  %v1057_v7 = vmul.f32 %v5462_v4, %v5462_v4 }
 0x198   :  { %v5467_v8 = vsub.f32 %v5441_v32, %v1046_v6  ;;  %v1063_v9 = vsel %vm1025_vm3, %v1057_v7, 0.0 }
 0x199   :  { %v1034_v10 = vpop.xlane.xlu1 %1033  ;;  %1064 = vadd.xlane.f32.xlu0 %v1063_v9 }
 0x19a   :  { %v1047_v11 = vmul.f32 0.015625, %v1034_v10  ;;  %v1058_v12 = vmul.f32 %v5467_v8, %v5467_v8 }
 0x19c   :  { %v5473_v13 = vsub.f32 %v5445_v42, %v1047_v11  ;;  %v1066_v14 = vsel %vm1025_vm3, %v1058_v12, 0.0 }
 0x19d   :  { %v1037_v15 = vpop.xlane.xlu1 %1036  ;;  %1067 = vadd.xlane.f32.xlu1 %v1066_v14 }
 0x19e   :  { %v1048_v16 = vmul.f32 0.015625, %v1037_v15  ;;  %v1059_v17 = vmul.f32 %v5473_v13, %v5473_v13 }
 0x1a0   :  { %v5479_v18 = vsub.f32 %v5449_v51, %v1048_v16  ;;  %v1069_v19 = vsel %vm1025_vm3, %v1059_v17, 0.0 }
 0x1a1   :  { %1070 = vadd.xlane.f32.xlu0 %v1069_v19  ;;  %v1040_v20 = vpop.xlane.xlu0 %1039 }
 0x1a2   :  { %v1049_v21 = vmul.f32 0.015625, %v1040_v20  ;;  %v1060_v22 = vmul.f32 %v5479_v18, %v5479_v18 }
 0x1a4   :  { %v5485_v24 = vsub.f32 %v5453_v58, %v1049_v21  ;;  %v1072_v25 = vsel %vm1025_vm3, %v1060_v22, 0.0  ;;  %v4055_v22 = vld [vmem:[%s6596_s3] ss:$0 sm:$0xff] }
 0x1a5   :  { %v1043_v26 = vpop.xlane.xlu1 %1042  ;;  %1073 = vadd.xlane.f32.xlu1 %v1072_v25 }
 0x1a6   :  { %v1050_v27 = vmul.f32 0.015625, %v1043_v26  ;;  %v1061_v28 = vmul.f32 %v5485_v24, %v5485_v24 }
 0x1a8   :  { %v5491_v29 = vsub.f32 %v5457_v63, %v1050_v27  ;;  %v1075_v30 = vsel %vm1025_vm3, %v1061_v28, 0.0 }
 0x1a9   :  { %1076 = vadd.xlane.f32.xlu0 %v1075_v30 }
 0x1aa   :  { %v1062_v31 = vmul.f32 %v5491_v29, %v5491_v29 }
 0x1ac   :  { %v1078_v34 = vsel %vm1025_vm3, %v1062_v31, 0.0 }
 0x1ad   :  { %1079 = vadd.xlane.f32.xlu1 %v1078_v34  ;;  %v4056_v34 = vld [vmem:[%s6597_s4] ss:$0 sm:$0xff] }
 0x1be   :  { %1294 = vrot.lane.b32.xlu1 %v5549_v52, %s5159_s22 }
 0x1bf   :  { %1296 = vrot.lane.b32.xlu0 %v5557_v54, %s5159_s22 }
 0x1c2   :  { %1292 = vrot.lane.b32.xlu1 %v5565_v55, %s5159_s22 }
 0x1c3   :  { %1288 = vrot.lane.b32.xlu0 %v5590_v62, %s5159_s22 }
 0x1c6   :  { %1290 = vrot.lane.b32.xlu1 %v5588_v61, %s5159_s22 }
 0x1ca   :  { %1286 = vrot.lane.b32.xlu1 %v5596_v0, %s5159_s22 }
 0x222   :  { %v1065_v1 = vpop.xlane.xlu0 %1064 }
 0x223   :  { %v1081_v2 = vmul.f32 0.015625, %v1065_v1 }
 0x225   :  { %v1087_v3 = vadd.f32 1e-06, %v1081_v2 }
 0x226   :  { %v1068_v5 = vpop.xlane.xlu1 %1067 }
 0x227   :  { %5000 = vrsqrt.f32 %v1087_v3  ;;  %v1082_v6 = vmul.f32 0.015625, %v1068_v5 }
 0x229   :  { %v1088_v7 = vadd.f32 1e-06, %v1082_v6 }
 0x22a   :  { %v1071_v9 = vpop.xlane.xlu0 %1070 }
 0x22b   :  { %5002 = vrsqrt.f32 %v1088_v7  ;;  %v1083_v10 = vmul.f32 0.015625, %v1071_v9  ;;  %v5618_v7 = vshrl.u32 %v63_v45, 7  ;;  %v1140_v9 = vld [vmem:[%s6598_s6] sm:$0x3] }
 0x22d   :  { %v1089_v11 = vadd.f32 1e-06, %v1083_v10 }
 0x22e   :  { %v1074_v12 = vpop.xlane.xlu1 %1073 }
 0x22f   :  { %5004 = vrsqrt.f32 %v1089_v11  ;;  %v1084_v14 = vmul.f32 0.015625, %v1074_v12  ;;  %v5630_v12 = vsub.s32 1, %v5618_v7 }
 0x231   :  { %v1090_v15 = vadd.f32 1e-06, %v1084_v14  ;;  %v1149_v45 = vrot.slane %v1140_v9, %v5630_v12 }
 0x232   :  { %v1077_v16 = vpop.xlane.xlu0 %1076 }
 0x233   :  { %5006 = vrsqrt.f32 %v1090_v15  ;;  %v1085_v17 = vmul.f32 0.015625, %v1077_v16 }
 0x234   :  { %v5001_v19 = vpop.eup %5000 }
 0x235   :  { %v1099_v20 = vmul.f32 %v5001_v19, %v5462_v4  ;;  %v1091_v21 = vadd.f32 1e-06, %v1085_v17 }
 0x236   :  { %v1080_v25 = vpop.xlane.xlu1 %1079 }
 0x237   :  { %5008 = vrsqrt.f32 %v1091_v21  ;;  %v1086_v26 = vmul.f32 0.015625, %v1080_v25  ;;  %v1111_v28 = vmul.f32 %v4055_v22, %v1099_v20 }
 0x238   :  { %v5003_v27 = vpop.eup %5002 }
 0x239   :  { %v1100_v30 = vmul.f32 %v5003_v27, %v5467_v8  ;;  %v1092_v31 = vadd.f32 1e-06, %v1086_v26  ;;  %v1123_v36 = vadd.f32 %v4056_v34, %v1111_v28 }
 0x23a   :  { %v5626_v10 = vpop.permute.xlu1 %1294 }
 0x23b   :  { %v1112_v35 = vmul.f32 %v4055_v22, %v1100_v30  ;;  %5010 = vrsqrt.f32 %v1092_v31 }
 0x23c   :  { %v5005_v4 = vpop.eup %5004 }
 0x23d   :  { %v1124_v37 = vadd.f32 %v4056_v34, %v1112_v35  ;;  %v1101_v38 = vmul.f32 %v5005_v4, %v5473_v13 }
 0x23e   :  { %v5633_v20 = vpop.permute.xlu1 %1292 }
 0x23f   :  { %v1129_v39 = vpack.c.bf16 %v1124_v37, %v1123_v36  ;;  %v1113_v43 = vmul.f32 %v4055_v22, %v1101_v38 }
 0x240   :  { %v5007_v40 = vpop.eup %5006 }
 0x241   :  { %4065 = vmatmul.mubr.msk.bf16.vlgmr.msra.gmra.mxu1 %vm1025_vm3, %v1129_v39  ;;  %v1102_v41 = vmul.f32 %v5007_v40, %v5479_v18  ;;  %v1125_v50 = vadd.f32 %v4056_v34, %v1113_v43 }
 0x242   :  { %1243 = vmatprep.mubr.bf16.mxu1 %v5158_v44  ;;  %v5640_v36 = vpop.permute.xlu1 %1290 }
 0x243   :  { %v1114_v8 = vmul.f32 %v4055_v22, %v1102_v41 }
 0x244   :  { %v5009_v49 = vpop.eup %5008 }
 0x245   :  { %v1126_v53 = vadd.f32 %v4056_v34, %v1114_v8  ;;  %v1103_v59 = vmul.f32 %v5009_v49, %v5485_v24  ;;  %v5621_v24 = vsub.s32 0, %v5618_v7  ;;  %v5647_v8 = vpop.permute.xlu0 %1296 }
 0x247   :  { %v1130_v60 = vpack.c.bf16 %v1126_v53, %v1125_v50  ;;  %v1115_v2 = vmul.f32 %v4055_v22, %v1103_v59  ;;  %v1145_v11 = vrot.slane %v1140_v9, %v5621_v24  ;;  %v5657_v9 = vpop.permute.xlu1 %1286 }
 0x248   :  { %v5011_v1 = vpop.eup %5010 }
 0x249   :  { %4066 = vmatmul.mubr.msk.bf16.gmra.mxu1 %vm1025_vm3, %v1130_v60  ;;  %v1104_v13 = vmul.f32 %v5011_v1, %v5491_v29  ;;  %v1127_v18 = vadd.f32 %v4056_v34, %v1115_v2 }
 0x24a   :  { %1253 = vmatprep.mubr.bf16.mxu1 %v5158_v44 }
 0x24b   :  { %v1116_v3 = vmul.f32 %v4055_v22, %v1104_v13 }
 0x24d   :  { %v1128_v5 = vadd.f32 %v4056_v34, %v1116_v3 }
 0x24f   :  { %v1131_v6 = vpack.c.bf16 %v1128_v5, %v1127_v18 }
 0x251   :  { %4067 = vmatmul.mubr.msk.bf16.gmra.mxu1 %vm1025_vm3, %v1131_v6 }
 0x301   :  { %v1235_v29 = vpop.f32.mrf.mxu1 }
 0x302   :  { %v1236_v16 = vadd.f32 %v1235_v29, %v1145_v11 }
 0x303   :  { %v1237_v14 = vpop.f32.mrf.mxu1 }
 0x304   :  { %v1238_v26 = vadd.f32 %v1237_v14, %v1149_v45 }
 0x305   :  { %v1239_v15 = vpop.f32.mrf.mxu1 }
 0x306   :  { %v1240_v17 = vadd.f32 %v1239_v15, %v1145_v11 }
 0x307   :  { %v1241_v19 = vpop.f32.mrf.mxu1 }
 0x308   :  { %v1264_v21 = vpack.c.bf16 %v1240_v17, %v1236_v16  ;;  %v1242_v22 = vadd.f32 %v1241_v19, %v1149_v45  ;;  %v5664_v19 = vpop.permute.xlu0 %1288 }
 0x309   :  { %v1245_v25 = vpop.f32.mrf.mxu1 }
 0x30a   :  { %v1246_v27 = vadd.f32 %v1245_v25, %v1145_v11  ;;  %4589 = vmatprep.mubr.msk.bf16.mxu0 %vm1025_vm3, %v1264_v21  ;;  %v5636_v30 = vpack.c.bf16 %v1242_v22, %v1238_v26  ;;  %v1271_v35 = vrot.slane %v1264_v21, 4  ;;  %v1307_v17 = vmul.bf16 %v5633_v20, %v1264_v21 }
 0x30b   :  { %v1247_v28 = vpop.f32.mrf.mxu1 }
 0x30c   :  { %v5638_v31 = vpack.c.bf16 %v1246_v27, %v1246_v27  ;;  %v1248_v34 = vadd.f32 %v1247_v28, %v1149_v45  ;;  %v1312_v43 = vrot.slane %v5636_v30, 4  ;;  %v1304_v27 = vmul.bf16 %v5657_v9, %v1264_v21 }
 0x30d   :  { %v1249_v4 = vpop.f32.mrf.mxu1 }
 0x30e   :  { %v1272_v37 = vrot.slane %v5638_v31, 4  ;;  %v1267_v38 = vpack.c.bf16 %v1248_v34, %v1248_v34  ;;  %v1278_v39 = vsel %vm1270_vm14, %v5638_v31, %v1271_v35  ;;  %v1250_v1 = vadd.f32 %v1249_v4, %v1145_v11 }
 0x30f   :  { %v1251_v40 = vpop.f32.mrf.mxu1  ;;  %v1308_v41 = vmul.bf16 %v5626_v10, %v1278_v39  ;;  %v1323_v4 = vmul.bf16 %v5636_v30, %v5565_v55 }
 0x310   :  { %v1313_v49 = vrot.slane %v1267_v38, 4  ;;  %v1252_v50 = vadd.f32 %v1251_v40, %v1149_v45  ;;  %v1273_v53 = vsel %vm1270_vm14, %v1271_v35, %v1272_v37  ;;  %v1318_v3 = vsel %vm1270_vm14, %v1267_v38, %v1312_v43 }
 0x311   :  { %1340 = vrot.lane.b32.xlu1 %v1308_v41, %s5159_s22  ;;  %v1255_v59 = vpop.f32.mrf.mxu1  ;;  %v1309_v60 = vmul.bf16 %v5647_v8, %v1273_v53  ;;  %v1306_v6 = vmul.bf16 %v5640_v36, %v1273_v53  ;;  %v1324_v16 = vmul.bf16 %v1318_v3, %v5549_v52  ;;  %v1305_v37 = vmul.bf16 %v5664_v19, %v1278_v39 }
 0x312   :  { %v1256_v13 = vadd.f32 %v1255_v59, %v1145_v11  ;;  %v1314_v2 = vsel %vm1270_vm14, %v1312_v43, %v1313_v49 }
 0x313   :  { %v1257_v18 = vpop.f32.mrf.mxu1  ;;  %1342 = vrot.lane.b32.xlu0 %v1309_v60, %s5159_s22  ;;  %v1325_v5 = vmul.bf16 %v1314_v2, %v5557_v54  ;;  %v1322_v39 = vmul.bf16 %v1314_v2, %v5588_v61  ;;  %v1321_v60 = vmul.bf16 %v1318_v3, %v5590_v62  ;;  %v1320_v2 = vmul.bf16 %v5636_v30, %v5596_v0 }
 0x314   :  { %v5659_v29 = vpack.c.bf16 %v1256_v13, %v1250_v1  ;;  %v1258_v14 = vadd.f32 %v1257_v18, %v1149_v45 }
 0x315   :  { %4593 = vmatprep.subr.bf16.mxu1 %v1325_v5  ;;  %1336 = vrot.lane.b32.xlu1 %v1306_v6, %s5159_s22  ;;  %v1259_v15 = vpop.f32.mrf.mxu1 }
 0x316   :  { %v5666_v22 = vpack.c.bf16 %v1258_v14, %v1252_v50  ;;  %v1260_v25 = vadd.f32 %v1259_v15, %v1145_v11  ;;  %4594 = vmatpush3.bf16.msra.mxu1 %v1325_v5  ;;  %v1553_v35 = vrot.slane %v5659_v29, 4  ;;  %v1564_v1 = vmul.bf16 %v5659_v29, %v5633_v20 }
 0x317   :  { %v1261_v26 = vpop.f32.mrf.mxu1  ;;  %4595 = vmatprep.subr.bf16.mxu1 %v1324_v16  ;;  %1338 = vrot.lane.b32.xlu0 %v1307_v17, %s5159_s22  ;;  %v1561_v13 = vmul.bf16 %v5659_v29, %v5657_v9 }
 0x318   :  { %v5670_v28 = vpack.c.bf16 %v1260_v25, %v1260_v25  ;;  %v1262_v34 = vadd.f32 %v1261_v26, %v1149_v45  ;;  %v1569_v11 = vrot.slane %v5666_v22, 4 }
 0x319   :  { %1332 = vrot.lane.b32.xlu1 %v1304_v27, %s5159_s22 }
 0x31a   :  { %v1554_v38 = vrot.slane %v5670_v28, 4  ;;  %v1550_v40 = vpack.c.bf16 %v1262_v34, %v1262_v34  ;;  %4596 = vmatpush3.bf16.msra.mxu1 %v1324_v16  ;;  %v1559_v21 = vsel %vm1270_vm14, %v5670_v28, %v1553_v35 }
 0x31b   :  { %4597 = vmatprep.subr.bf16.mxu1 %v1323_v4  ;;  %1334 = vrot.lane.b32.xlu0 %v1305_v37, %s5159_s22  ;;  %v1565_v45 = vmul.bf16 %v1559_v21, %v5626_v10  ;;  %v1562_v18 = vmul.bf16 %v1559_v21, %v5664_v19 }
 0x31c   :  { %v1570_v41 = vrot.slane %v1550_v40, 4  ;;  %v1555_v43 = vsel %vm1270_vm14, %v1553_v35, %v1554_v38  ;;  %v5685_v49 = vsel %vm1270_vm14, %v1550_v40, %v1569_v11 }
 0x31d   :  { %1597 = vrot.lane.b32.xlu1 %v1565_v45, %s5159_s22  ;;  %v1566_v50 = vmul.bf16 %v1555_v43, %v5647_v8  ;;  %v1563_v59 = vmul.bf16 %v1555_v43, %v5640_v36 }
 0x31e   :  { %4598 = vmatpush3.bf16.msra.mxu1 %v1323_v4  ;;  %v5691_v53 = vsel %vm1270_vm14, %v1569_v11, %v1570_v41 }
 0x31f   :  { %4599 = vmatprep.subr.bf16.mxu1 %v1322_v39  ;;  %1599 = vrot.lane.b32.xlu0 %v1566_v50, %s5159_s22 }
 0x321   :  { %1593 = vrot.lane.b32.xlu1 %v1563_v59, %s5159_s22 }
 0x322   :  { %4600 = vmatpush3.bf16.msra.mxu1 %v1322_v39 }
 0x323   :  { %4601 = vmatprep.subr.bf16.mxu1 %v1321_v60  ;;  %1595 = vrot.lane.b32.xlu0 %v1564_v1, %s5159_s22 }
 0x325   :  { %1589 = vrot.lane.b32.xlu1 %v1561_v13, %s5159_s22 }
 0x326   :  { %4602 = vmatpush3.bf16.msra.mxu1 %v1321_v60 }
 0x327   :  { %4603 = vmatprep.subr.bf16.mxu1 %v1320_v2  ;;  %1591 = vrot.lane.b32.xlu0 %v1562_v18, %s5159_s22 }
 0x32a   :  { %4604 = vmatpush3.bf16.msra.mxu1 %v1320_v2 }
 0x383   :  { %v1341_v6 = vpop.permute.xlu1 %1340 }
 0x384   :  { %v1362_v14 = vsel %vm1025_vm3, %v1341_v6, 0 }
 0x385   :  { %v1343_v3 = vpop.permute.xlu0 %1342 }
 0x386   :  { %v1365_v5 = vsel %vm1025_vm3, %v1343_v3, 0  ;;  %4825 = vmatprep.subr.msk.bf16.mxu0 %vm1025_vm3, %v1343_v3 }
 0x387   :  { %4578 = vmatpush3.bf16.xpose.msra.mxu0 %v1365_v5  ;;  %v1337_v16 = vpop.permute.xlu1 %1336  ;;  %v4971_v5 = vld [vmem:[%s6599_s7 + $0x20] sm:$0xff]  }
 0x388   :  { %4826 = vmatprep.subr.msk.bf16.mxu0 %vm1025_vm3, %v1341_v6  ;;  %v1356_v17 = vsel %vm1025_vm3, %v1337_v16, 0  ;;  %v5160_v6 = vmov 1.0|1.0  }
 0x389   :  { %v1339_v15 = vpop.permute.xlu0 %1338  ;;  %4609 = vmatprep.subr.msk.bf16.mxu1 %vm5752_vm0, %v5160_v6 }
 0x38a   :  { %v1359_v30 = vsel %vm1025_vm3, %v1339_v15, 0 }
 0x38b   :  { %v1333_v27 = vpop.permute.xlu1 %1332 }
 0x38c   :  { %v1350_v34 = vsel %vm1025_vm3, %v1333_v27, 0 }
 0x38d   :  { %v1335_v25 = vpop.permute.xlu0 %1334 }
 0x38e   :  { %v1353_v26 = vsel %vm1025_vm3, %v1335_v25, 0 }
 0x38f   :  { %4580 = vmatpush3.bf16.xpose.msra.mxu0 %v1362_v14  ;;  %v1598_v37 = vpop.permute.xlu1 %1597 }
 0x390   :  { %4827 = vmatprep.subr.msk.bf16.mxu0 %vm1025_vm3, %v1339_v15  ;;  %v1619_v11 = vsel %vm1025_vm3, %v1598_v37, 0 }
 0x391   :  { %v1600_v35 = vpop.permute.xlu0 %1599 }
 0x392   :  { %v1622_v4 = vsel %vm1025_vm3, %v1600_v35, 0 }
 0x393   :  { %v1594_v21 = vpop.permute.xlu1 %1593 }
 0x395   :  { %v1596_v38 = vpop.permute.xlu0 %1595 }
 0x396   :  { %v1616_v40 = vsel %vm1025_vm3, %v1596_v38, 0 }
 0x397   :  { %4582 = vmatpush3.bf16.xpose.msra.mxu0 %v1359_v30  ;;  %v1590_v41 = vpop.permute.xlu1 %1589 }
 0x398   :  { %4828 = vmatprep.subr.msk.bf16.mxu0 %vm1025_vm3, %v1337_v16  ;;  %v1607_v43 = vsel %vm1025_vm3, %v1590_v41, 0 }
 0x399   :  { %v1592_v45 = vpop.permute.xlu0 %1591 }
 0x39f   :  { %4584 = vmatpush3.bf16.xpose.msra.mxu0 %v1356_v17 }
 0x3a0   :  { %4829 = vmatprep.subr.msk.bf16.mxu0 %vm1025_vm3, %v1335_v25 }
 0x3a7   :  { %4586 = vmatpush3.bf16.xpose.msra.mxu0 %v1353_v26 }
 0x3a8   :  { %4830 = vmatprep.subr.msk.bf16.mxu0 %vm1025_vm3, %v1333_v27 }
 0x3af   :  { %4588 = vmatpush3.bf16.xpose.msra.mxu0 %v1350_v34 }
 0x3b0   :  { %4831 = vmatprep.subr.msk.bf16.mxu0 %vm1025_vm3, %v1600_v35 }
 0x3b6   :  { %4590 = vmatmul.mubr.msk.bf16.vlgmr.msra.gmra.mxu0 %vm1025_vm3, %v5638_v31  ;;  %v1613_v31 = vsel %vm1025_vm3, %v1594_v21, 0 }
 0x3b7   :  { %4626 = vmatpush3.bf16.xpose.msra.mxu0 %v1622_v4  ;;  %4637 = vmatprep.mubr.msk.bf16.mxu0 %vm1025_vm3, %v5659_v29  ;;  %v1610_v29 = vsel %vm1025_vm3, %v1592_v45, 0 }
 0x3b8   :  { %4832 = vmatprep.subr.msk.bf16.mxu0 %vm1025_vm3, %v1598_v37 }
 0x3bf   :  { %4628 = vmatpush3.bf16.xpose.msra.mxu0 %v1619_v11 }
 0x3c0   :  { %4833 = vmatprep.subr.msk.bf16.mxu0 %vm1025_vm3, %v1596_v38 }
 0x3c7   :  { %4630 = vmatpush3.bf16.xpose.msra.mxu0 %v1616_v40 }
 0x3c8   :  { %4834 = vmatprep.subr.msk.bf16.mxu0 %vm1025_vm3, %v1594_v21 }
 0x3cf   :  { %4632 = vmatpush3.bf16.xpose.msra.mxu0 %v1613_v31 }
 0x3d0   :  { %4835 = vmatprep.subr.msk.bf16.mxu0 %vm1025_vm3, %v1592_v45 }
 0x3d7   :  { %4634 = vmatpush3.bf16.xpose.msra.mxu0 %v1610_v29 }
 0x3d8   :  { %4836 = vmatprep.subr.msk.bf16.mxu0 %vm1025_vm3, %v1590_v41 }
 0x3df   :  { %4636 = vmatpush3.bf16.xpose.msra.mxu0 %v1607_v43 }
 0x3e0   :  { %4673 = vmatprep.subr.bf16.mxu0 %v5156_v33 }
 0x3e6   :  { %4638 = vmatmul.mubr.msk.bf16.vlgmr.msra.gmra.mxu0 %vm1025_vm3, %v5670_v28 }
 0x3e7   :  { %4681 = vmatprep.mubr.msk.bf16.mxu0 %vm5157_vm1, %v5156_v33 }
 0x476   :  { %v4591_v39 = vpop.f32.mrf.mxu0 }
 0x477   :  { %v1417_v13 = vsel %vm5572_vm6, %v4591_v39, -1e+30 }
 0x478   :  { %v1401_v50 = vpop.f32.mrf.mxu0  ;;  %v1425_v18 = vsel %vm1418_vm15, %v1417_v13, -inf }
 0x479   :  { %v1415_v59 = vsel %vm5572_vm6, %v1401_v50, -1e+30 }
 0x47a   :  { %v4592_v60 = vpop.f32.mrf.mxu0  ;;  %v1419_v1 = vsel %vm1418_vm15, %v1415_v59, -inf }
 0x47b   :  { %1420 = vmax.xlane.f32.xlu0 %v1419_v1 }
 0x47c   :  { %v1404_v2 = vpop.f32.mrf.mxu0 }
 0x47d   :  { %v1416_v28 = vsel %vm5572_vm6, %v1404_v2, -1e+30  ;;  %v1582_v2 = vmul.bf16 %v5691_v53, %v5557_v54 }
 0x47e   :  { %v1422_v3 = vsel %vm1418_vm15, %v1416_v28, -inf }
 0x47f   :  { %1426 = vmax.xlane.f32.xlu0 %v1425_v18  ;;  %1423 = vmax.xlane.f32.xlu1 %v1422_v3  ;;  %v1581_v3 = vmul.bf16 %v5685_v49, %v5549_v52 }
 0x4a6   :  { %v4639_v14 = vpop.f32.mrf.mxu0 }
 0x4a7   :  { %v1674_v15 = vsel %vm5572_vm6, %v4639_v14, -1e+30 }
 0x4a8   :  { %v1658_v30 = vpop.f32.mrf.mxu0  ;;  %v1681_v16 = vsel %vm1418_vm15, %v1674_v15, -inf }
 0x4a9   :  { %v1672_v17 = vsel %vm5572_vm6, %v1658_v30, -1e+30  ;;  %1682 = vmax.xlane.f32.xlu1 %v1681_v16 }
 0x4aa   :  { %v4640_v25 = vpop.f32.mrf.mxu0  ;;  %v1675_v26 = vsel %vm1418_vm15, %v1672_v17, -inf }
 0x4ab   :  { %1676 = vmax.xlane.f32.xlu0 %v1675_v26 }
 0x4ac   :  { %v1661_v27 = vpop.f32.mrf.mxu0 }
 0x4ad   :  { %v1673_v34 = vsel %vm5572_vm6, %v1661_v27, -1e+30  ;;  %v1578_v27 = vmul.bf16 %v5685_v49, %v5590_v62  ;;  %v4925_v49 = vld [vmem:[%s6599_s7 + $0x10] sm:$0xff]  }
 0x4ae   :  { %v1678_v35 = vsel %vm1418_vm15, %v1673_v34, -inf }
 0x4af   :  { %1679 = vmax.xlane.f32.xlu0 %v1678_v35 }
 0x504   :  { %v1421_v4 = vpop.xlane.xlu0 %1420 }
 0x505   :  { %v1428_v37 = vsub.f32 %v1415_v59, %v1421_v4 }
 0x507   :  { %v1431_v11 = vmul.f32 1.442695, %v1428_v37 }
 0x508   :  { %v1424_v38 = vpop.xlane.xlu1 %1423  ;;  %v1427_v40 = vpop.xlane.xlu0 %1426 }
 0x509   :  { %v1429_v21 = vsub.f32 %v1416_v28, %v1424_v38  ;;  %v1430_v31 = vsub.f32 %v1417_v13, %v1427_v40  ;;  %5012 = vpow2.f32 %v1431_v11  ;;  %v4927_v40 = vld [vmem:[%s6599_s7] sm:$0xff]  }
 0x50b   :  { %v1433_v45 = vmul.f32 1.442695, %v1429_v21  ;;  %v1435_v29 = vmul.f32 1.442695, %v1430_v31 }
 0x50d   :  { %5014 = vpow2.f32 %v1433_v45 }
 0x50e   :  { %5016 = vpow2.f32 %v1435_v29 }
 0x516   :  { %v5013_v41 = vpop.eup %5012 }
 0x51a   :  { %v5015_v43 = vpop.eup %5014 }
 0x51b   :  { %v5017_v39 = vpop.eup %5016  ;;  %v1437_v50 = vpack.c.bf16 %v5015_v43, %v5013_v41 }
 0x51c   :  { %v1438_v60 = vpack.c.bf16 %v5017_v39, %v5017_v39 }
 0x51d   :  { %4605 = vmatprep.mubr.msk.bf16.mxu1 %vm1418_vm15, %v1437_v50 }
 0x51e   :  { %4606 = vmatmul.mubr.msk.bf16.vlgmr.msra.gmra.mxu1 %vm1418_vm15, %v1438_v60 }
 0x51f   :  { %4610 = vmatpush3.bf16.msk.msra.mxu1 %vm5752_vm0, %v5160_v6  ;;  %4621 = vmatprep.mubr.msk.bf16.mxu1 %vm1418_vm15, %v1437_v50 }
 0x520   :  { %4611 = vmatprep.subr.msk.bf16.mxu1 %vm5773_vm2, %v5160_v6 }
 0x523   :  { %4612 = vmatpush3.bf16.msk.msra.mxu1 %vm5773_vm2, %v5160_v6 }
 0x524   :  { %4613 = vmatprep.subr.msk.bf16.mxu1 %vm5788_vm4, %v5160_v6 }
 0x527   :  { %4614 = vmatpush3.bf16.msk.msra.mxu1 %vm5788_vm4, %v5160_v6 }
 0x528   :  { %4615 = vmatprep.subr.msk.bf16.mxu1 %vm5801_vm12, %v5160_v6 }
 0x52b   :  { %4616 = vmatpush3.bf16.msk.msra.mxu1 %vm5801_vm12, %v5160_v6 }
 0x52c   :  { %4617 = vmatprep.subr.msk.bf16.mxu1 %vm5815_vm8, %v5160_v6 }
 0x52f   :  { %4618 = vmatpush3.bf16.msk.msra.mxu1 %vm5815_vm8, %v5160_v6 }
 0x530   :  { %4619 = vmatprep.subr.msk.bf16.mxu1 %vm5828_vm5, %v5160_v6 }
 0x532   :  { %v1683_v57 = vpop.xlane.xlu1 %1682 }
 0x533   :  { %v1686_v28 = vsub.f32 %v1674_v15, %v1683_v57  ;;  %4620 = vmatpush3.bf16.msk.msra.mxu1 %vm5828_vm5, %v5160_v6  ;;  %v1580_v15 = vmul.bf16 %v5666_v22, %v5565_v55 }
 0x534   :  { %4641 = vmatprep.subr.bf16.mxu1 %v1582_v2  ;;  %v1677_v46 = vpop.xlane.xlu0 %1676 }
 0x535   :  { %v1684_v18 = vsub.f32 %v1672_v17, %v1677_v46  ;;  %v1691_v14 = vmul.f32 1.442695, %v1686_v28  ;;  %v1579_v17 = vmul.bf16 %v5691_v53, %v5588_v61  ;;  %v4926_v53 = vld [vmem:[%s6599_s7 + $0x8] sm:$0xff]  }
 0x536   :  { %4622 = vmatmul.mubr.msk.bf16.vlgmr.msra.gmra.mxu1 %vm1418_vm15, %v1438_v60 }
 0x537   :  { %4642 = vmatpush3.bf16.msra.mxu1 %v1582_v2  ;;  %v1687_v30 = vmul.f32 1.442695, %v1684_v18  ;;  %5018 = vpow2.f32 %v1691_v14 }
 0x538   :  { %4643 = vmatprep.subr.bf16.mxu1 %v1581_v3  ;;  %v1680_v16 = vpop.xlane.xlu0 %1679 }
 0x539   :  { %v1685_v25 = vsub.f32 %v1673_v34, %v1680_v16  ;;  %5020 = vpow2.f32 %v1687_v30  ;;  %v1577_v34 = vmul.bf16 %v5666_v22, %v5596_v0  ;;  %v4924_v22 = vld [vmem:[%s6599_s7 + $0x18] sm:$0xff]  }
 0x53a   :  { %4674 = vmatpush3.bf16.msra.mxu0 %v4924_v22 }
 0x53b   :  { %v1689_v26 = vmul.f32 1.442695, %v1685_v25  ;;  %4644 = vmatpush3.bf16.msra.mxu1 %v1581_v3  ;;  %4675 = vmatprep.subr.bf16.mxu0 %v5156_v33 }
 0x53c   :  { %4645 = vmatprep.subr.bf16.mxu1 %v1580_v15 }
 0x53d   :  { %5022 = vpow2.f32 %v1689_v26 }
 0x53e   :  { %4676 = vmatpush3.bf16.msra.mxu0 %v4925_v49 }
 0x53f   :  { %4646 = vmatpush3.bf16.msra.mxu1 %v1580_v15  ;;  %4677 = vmatprep.subr.bf16.mxu0 %v5156_v33 }
 0x540   :  { %4647 = vmatprep.subr.bf16.mxu1 %v1579_v17 }
 0x542   :  { %4678 = vmatpush3.bf16.msra.mxu0 %v4926_v53  ;;  %v4104_v53 = vld [vmem:[%s6600_s8] ss:$0 sm:$0xff] }
 0x543   :  { %4648 = vmatpush3.bf16.msra.mxu1 %v1579_v17  ;;  %4679 = vmatprep.subr.bf16.mxu0 %v5156_v33 }
 0x544   :  { %4649 = vmatprep.subr.bf16.mxu1 %v1578_v27  ;;  %v5019_v35 = vpop.eup %5018 }
 0x545   :  { %v1694_v38 = vpack.c.bf16 %v5019_v35, %v5019_v35 }
 0x546   :  { %v5021_v4 = vpop.eup %5020  ;;  %4680 = vmatpush3.bf16.msra.mxu0 %v4927_v40 }
 0x547   :  { %4650 = vmatpush3.bf16.msra.mxu1 %v1578_v27 }
 0x548   :  { %4651 = vmatprep.subr.bf16.mxu1 %v1577_v34 }
 0x54a   :  { %v5023_v37 = vpop.eup %5022 }
 0x54b   :  { %4652 = vmatpush3.bf16.msra.mxu1 %v1577_v34  ;;  %v1693_v11 = vpack.c.bf16 %v5023_v37, %v5021_v4 }
 0x54c   :  { %4657 = vmatprep.subr.msk.bf16.mxu1 %vm5752_vm0, %v5160_v6 }
 0x54d   :  { %4653 = vmatprep.mubr.msk.bf16.mxu1 %vm1418_vm15, %v1693_v11 }
 0x54e   :  { %4654 = vmatmul.mubr.msk.bf16.vlgmr.msra.gmra.mxu1 %vm1418_vm15, %v1694_v38 }
 0x54f   :  { %4658 = vmatpush3.bf16.msk.msra.mxu1 %vm5752_vm0, %v5160_v6  ;;  %4669 = vmatprep.mubr.msk.bf16.mxu1 %vm1418_vm15, %v1693_v11 }
 0x550   :  { %4659 = vmatprep.subr.msk.bf16.mxu1 %vm5773_vm2, %v5160_v6 }
 0x553   :  { %4660 = vmatpush3.bf16.msk.msra.mxu1 %vm5773_vm2, %v5160_v6 }
 0x554   :  { %4661 = vmatprep.subr.msk.bf16.mxu1 %vm5788_vm4, %v5160_v6 }
 0x557   :  { %4662 = vmatpush3.bf16.msk.msra.mxu1 %vm5788_vm4, %v5160_v6 }
 0x558   :  { %4663 = vmatprep.subr.msk.bf16.mxu1 %vm5801_vm12, %v5160_v6 }
 0x55b   :  { %4664 = vmatpush3.bf16.msk.msra.mxu1 %vm5801_vm12, %v5160_v6 }
 0x55c   :  { %4665 = vmatprep.subr.msk.bf16.mxu1 %vm5815_vm8, %v5160_v6 }
 0x55f   :  { %4666 = vmatpush3.bf16.msk.msra.mxu1 %vm5815_vm8, %v5160_v6 }
 0x560   :  { %4667 = vmatprep.subr.msk.bf16.mxu1 %vm5828_vm5, %v5160_v6 }
 0x563   :  { %4668 = vmatpush3.bf16.msk.msra.mxu1 %vm5828_vm5, %v5160_v6 }
 0x566   :  { %4670 = vmatmul.mubr.msk.bf16.vlgmr.msra.gmra.mxu1 %vm1418_vm15, %v1694_v38 }
 0x567   :  { %2138 = vmatprep.mubr.bf16.mxu1 %v5158_v44 }
 0x5de   :  { %v4607_v21 = vpop.f32.mrf.mxu1 }
 0x5e0   :  { %v1479_v31 = vpop.f32.mrf.mxu1 }
 0x5e2   :  { %v4608_v45 = vpop.f32.mrf.mxu1 }
 0x5e4   :  { %v1482_v29 = vpop.f32.mrf.mxu1 }
 0x5f6   :  { %v4623_v41 = vpop.f32.mrf.mxu1 }
 0x5f8   :  { %v1527_v43 = vpop.f32.mrf.mxu1 }
 0x5f9   :  { %5024 = vrcp.f32 %v1527_v43 }
 0x5fa   :  { %v4624_v39 = vpop.f32.mrf.mxu1 }
 0x5fc   :  { %v1530_v50 = vpop.f32.mrf.mxu1 }
 0x5fd   :  { %5026 = vrcp.f32 %v1530_v50 }
 0x5fe   :  { %5028 = vrcp.f32 %v4623_v41 }
 0x606   :  { %v5025_v60 = vpop.eup %5024 }
 0x607   :  { %v1544_v2 = vmul.f32 %v5025_v60, %v1479_v31 }
 0x60a   :  { %v5027_v57 = vpop.eup %5026 }
 0x60b   :  { %v1545_v28 = vmul.f32 %v5027_v57, %v1482_v29  ;;  %v5029_v17 = vpop.eup %5028 }
 0x60c   :  { %v1546_v34 = vmul.f32 %v5029_v17, %v4607_v21  ;;  %v4112_v21 = vld [vmem:[%s6601_s9] ss:$0 sm:$0xff] }
 0x60d   :  { %v1803_v46 = vpack.c.bf16 %v1545_v28, %v1544_v2 }
 0x60e   :  { %v4655_v18 = vpop.f32.mrf.mxu1 }
 0x60f   :  { %4682 = vmatmul.mubr.msk.bf16.vlgmr.msra.gmra.mxu0 %vm1025_vm3, %v1803_v46 }
 0x610   :  { %v1735_v3 = vpop.f32.mrf.mxu1  ;;  %4685 = vmatprep.mubr.msk.bf16.mxu0 %vm5157_vm1, %v5156_v33 }
 0x612   :  { %v4656_v14 = vpop.f32.mrf.mxu1 }
 0x614   :  { %v1738_v30 = vpop.f32.mrf.mxu1 }
 0x626   :  { %v4671_v16 = vpop.f32.mrf.mxu1 }
 0x628   :  { %v1783_v25 = vpop.f32.mrf.mxu1 }
 0x629   :  { %5030 = vrcp.f32 %v1783_v25 }
 0x62a   :  { %v4672_v15 = vpop.f32.mrf.mxu1 }
 0x62c   :  { %v1786_v26 = vpop.f32.mrf.mxu1 }
 0x62d   :  { %5032 = vrcp.f32 %v1786_v26 }
 0x62e   :  { %5034 = vrcp.f32 %v4671_v16 }
 0x636   :  { %v5031_v27 = vpop.eup %5030 }
 0x637   :  { %v1800_v35 = vmul.f32 %v5031_v27, %v1735_v3 }
 0x639   :  { %v1804_v4 = vpack.c.bf16 %v1800_v35, %v1546_v34 }
 0x63a   :  { %v5033_v37 = vpop.eup %5032 }
 0x63b   :  { %4686 = vmatmul.mubr.msk.bf16.gmra.mxu0 %vm1025_vm3, %v1804_v4  ;;  %v5035_v11 = vpop.eup %5034  ;;  %v1801_v38 = vmul.f32 %v5033_v37, %v1738_v30 }
 0x63c   :  { %4689 = vmatprep.mubr.msk.bf16.mxu0 %vm5157_vm1, %v5156_v33  ;;  %v1802_v22 = vmul.f32 %v5035_v11, %v4655_v18 }
 0x63e   :  { %v1805_v49 = vpack.c.bf16 %v1802_v22, %v1801_v38 }
 0x643   :  { %4690 = vmatmul.mubr.msk.bf16.gmra.mxu0 %vm1025_vm3, %v1805_v49 }
 0x6cf   :  { %v1888_v40 = vpop.f32.mrf.mxu0 }
 0x6d0   :  { %v1889_v31 = vadd.f32 %v4104_v53, %v1888_v40 }
 0x6d1   :  { %v4683_v45 = vpop.f32.mrf.mxu0 }
 0x6d2   :  { %v1918_v29 = vmul.f32 %v4112_v21, %v1889_v31 }
 0x6d3   :  { %v1891_v41 = vpop.f32.mrf.mxu0 }
 0x6d4   :  { %v5924_v43 = vadd.f32 %v1918_v29, %v5437_v23  ;;  %v1892_v39 = vadd.f32 %v4104_v53, %v1891_v41 }
 0x6d5   :  { %v4684_v50 = vpop.f32.mrf.mxu0 }
 0x6d6   :  { %v1919_v60 = vmul.f32 %v4112_v21, %v1892_v39  ;;  %v1932_v57 = vsel %vm1025_vm3, %v5924_v43, 0.0 }
 0x6d7   :  { %1933 = vadd.xlane.f32.xlu0 %v1932_v57  ;;  %v4928_v57 = vld [vmem:[%s6602_s12 + $0x30] ss:$8 sps:$4 sm:$0xff]  }
 0x6d8   :  { %v5929_v2 = vadd.f32 %v1919_v60, %v5441_v32  ;;  %v4930_v60 = vld [vmem:[%s6602_s12 + $0x34] ss:$8 sps:$4 sm:$0xff]  }
 0x6d9   :  { %2114 = vmatprep.subr.bf16.mxu1 %v4930_v60 }
 0x6da   :  { %v1935_v28 = vsel %vm1025_vm3, %v5929_v2, 0.0  ;;  %2115 = vmatpush1.bf16.msra.mxu1 %v4928_v57 }
 0x6db   :  { %1936 = vadd.xlane.f32.xlu1 %v1935_v28  ;;  %v4933_v28 = vld [vmem:[%s6602_s12 + $0x24] ss:$8 sps:$4 sm:$0xff]  }
 0x6dc   :  { %2116 = vmatprep.subr.bf16.mxu1 %v4933_v28 }
 0x6fb   :  { %v1896_v46 = vpop.f32.mrf.mxu0 }
 0x6fc   :  { %v1897_v18 = vadd.f32 %v4104_v53, %v1896_v46  ;;  %v4931_v46 = vld [vmem:[%s6602_s12 + $0x20] ss:$8 sps:$4 sm:$0xff]  }
 0x6fd   :  { %v4687_v3 = vpop.f32.mrf.mxu0  ;;  %2117 = vmatpush1.bf16.msra.mxu1 %v4931_v46 }
 0x6fe   :  { %v1920_v14 = vmul.f32 %v4112_v21, %v1897_v18  ;;  %v4936_v18 = vld [vmem:[%s6602_s12 + $0x14] ss:$8 sps:$4 sm:$0xff]   ;;  %v4934_v3 = vld [vmem:[%s6602_s12 + $0x10] ss:$8 sps:$4 sm:$0xff]  }
 0x6ff   :  { %v1899_v23 = vpop.f32.mrf.mxu0  ;;  %2118 = vmatprep.subr.bf16.mxu1 %v4936_v18 }
 0x700   :  { %v5934_v30 = vadd.f32 %v1920_v14, %v5445_v42  ;;  %v1900_v16 = vadd.f32 %v4104_v53, %v1899_v23  ;;  %v4939_v14 = vld [vmem:[%s6602_s12 + $0x4] ss:$8 sps:$4 sm:$0xff]   ;;  %v4937_v23 = vld [vmem:[%s6602_s12] ss:$8 sps:$4 sm:$0xff]  }
 0x701   :  { %v4688_v25 = vpop.f32.mrf.mxu0  ;;  %2119 = vmatpush1.bf16.msra.mxu1 %v4934_v3  ;;  %v4113_v3 = vld [vmem:[%s6603_s10] ss:$0 sm:$0xff] }
 0x702   :  { %v1921_v15 = vmul.f32 %v4112_v21, %v1900_v16  ;;  %v1938_v26 = vsel %vm1025_vm3, %v5934_v30, 0.0  ;;  %2120 = vmatprep.subr.bf16.mxu1 %v4939_v14 }
 0x703   :  { %1939 = vadd.xlane.f32.xlu0 %v1938_v26  ;;  %v1904_v32 = vpop.f32.mrf.mxu0 }
 0x704   :  { %v5939_v17 = vadd.f32 %v1921_v15, %v5449_v51  ;;  %v1905_v27 = vadd.f32 %v4104_v53, %v1904_v32 }
 0x705   :  { %v4691_v34 = vpop.f32.mrf.mxu0  ;;  %2121 = vmatpush1.bf16.msra.mxu1 %v4937_v23 }
 0x706   :  { %v1922_v35 = vmul.f32 %v4112_v21, %v1905_v27  ;;  %v1941_v4 = vsel %vm1025_vm3, %v5939_v17, 0.0 }
 0x707   :  { %1942 = vadd.xlane.f32.xlu1 %v1941_v4  ;;  %v1907_v42 = vpop.f32.mrf.mxu0 }
 0x708   :  { %v5944_v37 = vadd.f32 %v1922_v35, %v5453_v58  ;;  %v1908_v11 = vadd.f32 %v4104_v53, %v1907_v42 }
 0x709   :  { %v4692_v38 = vpop.f32.mrf.mxu0 }
 0x70a   :  { %v1923_v22 = vmul.f32 %v4112_v21, %v1908_v11  ;;  %v1944_v49 = vsel %vm1025_vm3, %v5944_v37, 0.0 }
 0x70b   :  { %1945 = vadd.xlane.f32.xlu0 %v1944_v49 }
 0x70c   :  { %v5949_v51 = vadd.f32 %v1923_v22, %v5457_v63 }
 0x70e   :  { %v1947_v40 = vsel %vm1025_vm3, %v5949_v51, 0.0 }
 0x70f   :  { %1948 = vadd.xlane.f32.xlu1 %v1947_v40 }
 0x760   :  { %v1934_v31 = vpop.xlane.xlu0 %1933 }
 0x761   :  { %v1950_v45 = vmul.f32 0.015625, %v1934_v31 }
 0x763   :  { %v1956_v29 = vsub.f32 %v5924_v43, %v1950_v45 }
 0x764   :  { %v1937_v58 = vpop.xlane.xlu1 %1936 }
 0x765   :  { %v1951_v41 = vmul.f32 0.015625, %v1937_v58  ;;  %v1962_v53 = vmul.f32 %v1956_v29, %v1956_v29 }
 0x767   :  { %v1957_v21 = vsub.f32 %v5929_v2, %v1951_v41  ;;  %v1968_v39 = vsel %vm1025_vm3, %v1962_v53, 0.0 }
 0x768   :  { %1969 = vadd.xlane.f32.xlu0 %v1968_v39 }
 0x769   :  { %v1963_v50 = vmul.f32 %v1957_v21, %v1957_v21 }
 0x76b   :  { %v1971_v63 = vsel %vm1025_vm3, %v1963_v50, 0.0 }
 0x76c   :  { %1972 = vadd.xlane.f32.xlu1 %v1971_v63 }
 0x78c   :  { %v1940_v16 = vpop.xlane.xlu0 %1939 }
 0x78d   :  { %v1952_v25 = vmul.f32 0.015625, %v1940_v16 }
 0x78f   :  { %v1958_v15 = vsub.f32 %v5934_v30, %v1952_v25  ;;  %v4114_v25 = vld [vmem:[%s6604_s11] ss:$0 sm:$0xff] }
 0x790   :  { %v1943_v26 = vpop.xlane.xlu1 %1942 }
 0x791   :  { %v1953_v32 = vmul.f32 0.015625, %v1943_v26  ;;  %v1964_v27 = vmul.f32 %v1958_v15, %v1958_v15 }
 0x793   :  { %v1959_v34 = vsub.f32 %v5939_v17, %v1953_v32  ;;  %v1974_v35 = vsel %vm1025_vm3, %v1964_v27, 0.0 }
 0x794   :  { %1975 = vadd.xlane.f32.xlu0 %v1974_v35  ;;  %v1946_v4 = vpop.xlane.xlu0 %1945 }
 0x795   :  { %v1954_v42 = vmul.f32 0.015625, %v1946_v4  ;;  %v1965_v11 = vmul.f32 %v1959_v34, %v1959_v34 }
 0x797   :  { %v1960_v38 = vsub.f32 %v5944_v37, %v1954_v42  ;;  %v1977_v22 = vsel %vm1025_vm3, %v1965_v11, 0.0 }
 0x798   :  { %1978 = vadd.xlane.f32.xlu1 %v1977_v22  ;;  %v1949_v49 = vpop.xlane.xlu1 %1948 }
 0x799   :  { %v1955_v40 = vmul.f32 0.015625, %v1949_v49  ;;  %v1966_v31 = vmul.f32 %v1960_v38, %v1960_v38 }
 0x79b   :  { %v1961_v45 = vsub.f32 %v5949_v51, %v1955_v40  ;;  %v1980_v58 = vsel %vm1025_vm3, %v1966_v31, 0.0 }
 0x79c   :  { %1981 = vadd.xlane.f32.xlu0 %v1980_v58 }
 0x79d   :  { %v1967_v41 = vmul.f32 %v1961_v45, %v1961_v45 }
 0x79f   :  { %v1983_v53 = vsel %vm1025_vm3, %v1967_v41, 0.0 }
 0x7a0   :  { %1984 = vadd.xlane.f32.xlu1 %v1983_v53 }
 0x7f1   :  { %v1970_v39 = vpop.xlane.xlu0 %1969 }
 0x7f2   :  { %v1986_v50 = vmul.f32 0.015625, %v1970_v39 }
 0x7f4   :  { %v1992_v63 = vadd.f32 1e-06, %v1986_v50 }
 0x7f5   :  { %v1973_v60 = vpop.xlane.xlu1 %1972 }
 0x7f6   :  { %5036 = vrsqrt.f32 %v1992_v63  ;;  %v1987_v57 = vmul.f32 0.015625, %v1973_v60 }
 0x7f8   :  { %v1993_v28 = vadd.f32 1e-06, %v1987_v57 }
 0x7fa   :  { %5038 = vrsqrt.f32 %v1993_v28 }
 0x803   :  { %v5037_v46 = vpop.eup %5036 }
 0x804   :  { %v2004_v18 = vmul.f32 %v5037_v46, %v1956_v29 }
 0x806   :  { %v2016_v16 = vmul.f32 %v4113_v3, %v2004_v18 }
 0x807   :  { %v5039_v14 = vpop.eup %5038 }
 0x808   :  { %v2005_v23 = vmul.f32 %v5039_v14, %v1957_v21  ;;  %v2028_v32 = vadd.f32 %v4114_v25, %v2016_v16 }
 0x80a   :  { %v2017_v26 = vmul.f32 %v4113_v3, %v2005_v23 }
 0x80c   :  { %v2029_v27 = vadd.f32 %v4114_v25, %v2017_v26 }
 0x80e   :  { %v2034_v35 = vpack.c.bf16 %v2029_v27, %v2028_v32 }
 0x810   :  { %4123 = vmatmul.mubr.msk.bf16.vlgmr.msra.gmra.mxu1 %vm1025_vm3, %v2034_v35 }
 0x811   :  { %2148 = vmatprep.mubr.bf16.mxu1 %v5158_v44 }
 0x81d   :  { %v1976_v29 = vpop.xlane.xlu0 %1975 }
 0x81e   :  { %v1988_v4 = vmul.f32 0.015625, %v1976_v29 }
 0x820   :  { %v1994_v42 = vadd.f32 1e-06, %v1988_v4 }
 0x821   :  { %v1979_v11 = vpop.xlane.xlu1 %1978 }
 0x822   :  { %5040 = vrsqrt.f32 %v1994_v42  ;;  %v1989_v22 = vmul.f32 0.015625, %v1979_v11  ;;  %v4945_v42 = vld [vmem:[%s6605_s14 + $0x28] sm:$0xff]   ;;  %v4946_v11 = vld [vmem:[%s6605_s14 + $0x60] sm:$0xff]  }
 0x824   :  { %v1995_v21 = vadd.f32 1e-06, %v1989_v22  ;;  %v4947_v22 = vld [vmem:[%s6605_s14 + $0x20] sm:$0xff]  }
 0x825   :  { %v1982_v49 = vpop.xlane.xlu0 %1981 }
 0x826   :  { %5042 = vrsqrt.f32 %v1995_v21  ;;  %v1990_v40 = vmul.f32 0.015625, %v1982_v49  ;;  %v4948_v21 = vld [vmem:[%s6605_s14 + $0x58] sm:$0xff]  }
 0x827   :  { %v4949_v49 = vld [vmem:[%s6605_s14 + $0x18] sm:$0xff]  }
 0x828   :  { %v1996_v31 = vadd.f32 1e-06, %v1990_v40  ;;  %v4950_v40 = vld [vmem:[%s6605_s14 + $0x50] sm:$0xff]  }
 0x829   :  { %v1985_v58 = vpop.xlane.xlu1 %1984 }
 0x82a   :  { %5044 = vrsqrt.f32 %v1996_v31  ;;  %v1991_v41 = vmul.f32 0.015625, %v1985_v58  ;;  %v4951_v31 = vld [vmem:[%s6605_s14 + $0x10] sm:$0xff]   ;;  %v4952_v58 = vld [vmem:[%s6605_s14 + $0x48] sm:$0xff]  }
 0x82c   :  { %v1997_v53 = vadd.f32 1e-06, %v1991_v41  ;;  %v4953_v41 = vld [vmem:[%s6605_s14 + $0x8] sm:$0xff]  }
 0x82e   :  { %5046 = vrsqrt.f32 %v1997_v53  ;;  %v4954_v53 = vld [vmem:[%s6605_s14 + $0x40] sm:$0xff]  }
 0x82f   :  { %v5041_v39 = vpop.eup %5040 }
 0x830   :  { %v2006_v50 = vmul.f32 %v5041_v39, %v1958_v15  ;;  %v4955_v39 = vld [vmem:[%s6605_s14] sm:$0xff]  }
 0x832   :  { %v2018_v57 = vmul.f32 %v4113_v3, %v2006_v50  ;;  %v2045_v50 = vld [vmem:[%s6606_s13] sm:$0x3] }
 0x833   :  { %v5043_v63 = vpop.eup %5042 }
 0x834   :  { %v2007_v60 = vmul.f32 %v5043_v63, %v1959_v34  ;;  %v2030_v18 = vadd.f32 %v4114_v25, %v2018_v57  ;;  %v4940_v34 = vld [vmem:[%s6605_s14 + $0x78] sm:$0xff]   ;;  %v2050_v63 = vrot.slane %v2045_v50, %v5621_v24 }
 0x835   :  { %4432 = vmatprep.subr.bf16.mxu0 %v4940_v34 }
 0x836   :  { %v2019_v28 = vmul.f32 %v4113_v3, %v2007_v60  ;;  %v6054_v60 = vrot.slane %v2045_v50, %v5630_v12 }
 0x837   :  { %v5045_v46 = vpop.eup %5044 }
 0x838   :  { %v2031_v14 = vadd.f32 %v4114_v25, %v2019_v28  ;;  %v2008_v23 = vmul.f32 %v5045_v46, %v1960_v38  ;;  %v4941_v38 = vld [vmem:[%s6605_s14 + $0x38] sm:$0xff]  }
 0x839   :  { %4433 = vmatpush3.bf16.msra.mxu0 %v4941_v38 }
 0x83a   :  { %v2035_v16 = vpack.c.bf16 %v2031_v14, %v2030_v18  ;;  %v2020_v27 = vmul.f32 %v4113_v3, %v2008_v23 }
 0x83b   :  { %v5047_v26 = vpop.eup %5046 }
 0x83c   :  { %4124 = vmatmul.mubr.msk.bf16.gmra.mxu1 %vm1025_vm3, %v2035_v16  ;;  %v2009_v32 = vmul.f32 %v5047_v26, %v1961_v45  ;;  %v2032_v29 = vadd.f32 %v4114_v25, %v2020_v27  ;;  %v4942_v45 = vld [vmem:[%s6605_s14 + $0x70] sm:$0xff]  }
 0x83d   :  { %2158 = vmatprep.mubr.bf16.mxu1 %v5158_v44  ;;  %4434 = vmatprep.subr.bf16.mxu0 %v4942_v45 }
 0x83e   :  { %v2021_v35 = vmul.f32 %v4113_v3, %v2009_v32  ;;  %v4943_v3 = vld [vmem:[%s6605_s14 + $0x30] sm:$0xff]  }
 0x83f   :  { %4435 = vmatpush3.bf16.msra.mxu0 %v4943_v3 }
 0x840   :  { %v2033_v4 = vadd.f32 %v4114_v25, %v2021_v35  ;;  %v4944_v25 = vld [vmem:[%s6605_s14 + $0x68] sm:$0xff]  }
 0x841   :  { %4436 = vmatprep.subr.bf16.mxu0 %v4944_v25 }
 0x842   :  { %v2036_v15 = vpack.c.bf16 %v2033_v4, %v2032_v29 }
 0x843   :  { %4437 = vmatpush3.bf16.msra.mxu0 %v4945_v42 }
 0x844   :  { %4125 = vmatmul.mubr.msk.bf16.gmra.mxu1 %vm1025_vm3, %v2036_v15  ;;  %4438 = vmatprep.subr.bf16.mxu0 %v4946_v11 }
 0x845   :  { %2664 = vmatprep.mubr.bf16.mxu1 %v5158_v44 }
 0x847   :  { %4439 = vmatpush3.bf16.msra.mxu0 %v4947_v22 }
 0x848   :  { %4440 = vmatprep.subr.bf16.mxu0 %v4948_v21 }
 0x84b   :  { %4441 = vmatpush3.bf16.msra.mxu0 %v4949_v49 }
 0x84c   :  { %4442 = vmatprep.subr.bf16.mxu0 %v4950_v40 }
 0x84f   :  { %4443 = vmatpush3.bf16.msra.mxu0 %v4951_v31 }
 0x850   :  { %4444 = vmatprep.subr.bf16.mxu0 %v4952_v58 }
 0x853   :  { %4445 = vmatpush3.bf16.msra.mxu0 %v4953_v41 }
 0x854   :  { %4446 = vmatprep.subr.bf16.mxu0 %v4954_v53 }
 0x857   :  { %4447 = vmatpush3.bf16.msra.mxu0 %v4955_v39 }
 0x8d0   :  { %v2140_v57 = vpop.f32.mrf.mxu1 }
 0x8d1   :  { %v2141_v28 = vadd.f32 %v2140_v57, %v2050_v63 }
 0x8d2   :  { %v2142_v46 = vpop.f32.mrf.mxu1 }
 0x8d3   :  { %v2143_v18 = vadd.f32 %v2142_v46, %v6054_v60  ;;  %v2181_v14 = vmul.f32 0.70710677, %v2141_v28  ;;  %v2169_v49 = vmul.f32 0.5, %v2141_v28 }
 0x8d4   :  { %v2144_v23 = vpop.f32.mrf.mxu1 }
 0x8d5   :  { %v2182_v16 = vmul.f32 0.70710677, %v2143_v18  ;;  %v2145_v26 = vadd.f32 %v2144_v23, %v2050_v63  ;;  %v2170_v11 = vmul.f32 0.5, %v2143_v18 }
 0x8d6   :  { %v2146_v32 = vpop.f32.mrf.mxu1 }
 0x8d7   :  { %5048 = verf.f32 %v2182_v16  ;;  %v2183_v27 = vmul.f32 0.70710677, %v2145_v26  ;;  %v2147_v35 = vadd.f32 %v2146_v32, %v6054_v60  ;;  %v2171_v42 = vmul.f32 0.5, %v2145_v26 }
 0x8d8   :  { %5050 = verf.f32 %v2181_v14 }
 0x8d9   :  { %5052 = verf.f32 %v2183_v27  ;;  %v2184_v29 = vmul.f32 0.70710677, %v2147_v35  ;;  %v2172_v22 = vmul.f32 0.5, %v2147_v35 }
 0x8db   :  { %5054 = verf.f32 %v2184_v29 }
 0x8e4   :  { %v5049_v4 = vpop.eup %5048 }
 0x8e5   :  { %v5051_v15 = vpop.eup %5050  ;;  %v2206_v38 = vadd.f32 1.0, %v5049_v4 }
 0x8e6   :  { %v5053_v34 = vpop.eup %5052  ;;  %v2205_v25 = vadd.f32 1.0, %v5051_v15 }
 0x8e7   :  { %v2207_v45 = vadd.f32 1.0, %v5053_v34  ;;  %v2218_v31 = vmul.f32 %v2206_v38, %v2170_v11 }
 0x8e8   :  { %v5055_v3 = vpop.eup %5054  ;;  %v2217_v41 = vmul.f32 %v2205_v25, %v2169_v49 }
 0x8e9   :  { %v2208_v21 = vadd.f32 1.0, %v5055_v3  ;;  %v2219_v40 = vmul.f32 %v2207_v45, %v2171_v42 }
 0x8eb   :  { %v2220_v58 = vmul.f32 %v2208_v21, %v2172_v22  ;;  %v2229_v39 = vpack.c.bf16 %v2219_v40, %v2217_v41 }
 0x8ed   :  { %v2230_v53 = vpack.c.bf16 %v2220_v58, %v2218_v31 }
 0x8ef   :  { %2402 = vmatprep.mubr.bf16.mxu0 %v2230_v53 }
 0x8f0   :  { %2403 = vmatmul.mubr.bf16.vlgmr.msra.gmra.mxu0 %v2229_v39 }
 0x8fc   :  { %v2150_v50 = vpop.f32.mrf.mxu1 }
 0x8fd   :  { %v2151_v57 = vadd.f32 %v2150_v50, %v2050_v63 }
 0x8fe   :  { %v2152_v46 = vpop.f32.mrf.mxu1 }
 0x8ff   :  { %v2153_v14 = vadd.f32 %v2152_v46, %v6054_v60  ;;  %v2185_v23 = vmul.f32 0.70710677, %v2151_v57 }
 0x900   :  { %v2154_v16 = vpop.f32.mrf.mxu1 }
 0x901   :  { %v2186_v26 = vmul.f32 0.70710677, %v2153_v14  ;;  %v2155_v18 = vadd.f32 %v2154_v16, %v2050_v63  ;;  %v2174_v46 = vmul.f32 0.5, %v2153_v14  ;;  %v2173_v16 = vmul.f32 0.5, %v2151_v57 }
 0x902   :  { %v2156_v32 = vpop.f32.mrf.mxu1 }
 0x903   :  { %5056 = verf.f32 %v2186_v26  ;;  %v2187_v28 = vmul.f32 0.70710677, %v2155_v18  ;;  %v2157_v27 = vadd.f32 %v2156_v32, %v6054_v60  ;;  %v2175_v50 = vmul.f32 0.5, %v2155_v18 }
 0x904   :  { %5058 = verf.f32 %v2185_v23  ;;  %v2160_v35 = vpop.f32.mrf.mxu1 }
 0x905   :  { %5060 = verf.f32 %v2187_v28  ;;  %v2188_v29 = vmul.f32 0.70710677, %v2157_v27  ;;  %v2161_v4 = vadd.f32 %v2160_v35, %v2050_v63  ;;  %v2176_v23 = vmul.f32 0.5, %v2157_v27 }
 0x906   :  { %v2162_v15 = vpop.f32.mrf.mxu1 }
 0x907   :  { %5062 = verf.f32 %v2188_v29  ;;  %v2163_v34 = vadd.f32 %v2162_v15, %v6054_v60  ;;  %v2189_v38 = vmul.f32 0.70710677, %v2161_v4  ;;  %v2177_v57 = vmul.f32 0.5, %v2161_v4 }
 0x908   :  { %v2164_v45 = vpop.f32.mrf.mxu1 }
 0x909   :  { %v2190_v3 = vmul.f32 0.70710677, %v2163_v34  ;;  %v2165_v25 = vadd.f32 %v2164_v45, %v2050_v63  ;;  %v2178_v14 = vmul.f32 0.5, %v2163_v34  ;;  %v4143_v34 = vld [vmem:[%s6608_s16] ss:$0 sm:$0xff] }
 0x90a   :  { %v2166_v42 = vpop.f32.mrf.mxu1 }
 0x90b   :  { %5064 = verf.f32 %v2190_v3  ;;  %v2191_v11 = vmul.f32 0.70710677, %v2165_v25  ;;  %v2167_v22 = vadd.f32 %v2166_v42, %v6054_v60 }
 0x90c   :  { %5066 = verf.f32 %v2189_v38 }
 0x90d   :  { %5068 = verf.f32 %v2191_v11  ;;  %v2192_v21 = vmul.f32 0.70710677, %v2167_v22  ;;  %v2180_v18 = vmul.f32 0.5, %v2167_v22 }
 0x90f   :  { %5070 = verf.f32 %v2192_v21 }
 0x910   :  { %v5057_v49 = vpop.eup %5056 }
 0x911   :  { %v5059_v40 = vpop.eup %5058  ;;  %v2210_v58 = vadd.f32 1.0, %v5057_v49  ;;  %v2179_v49 = vmul.f32 0.5, %v2165_v25 }
 0x912   :  { %v5061_v31 = vpop.eup %5060  ;;  %v2209_v39 = vadd.f32 1.0, %v5059_v40 }
 0x913   :  { %v2211_v41 = vadd.f32 1.0, %v5061_v31  ;;  %v2222_v32 = vmul.f32 %v2210_v58, %v2174_v46  ;;  %v4126_v46 = vld [vmem:[%s6607_s15] ss:$0 sm:$0xff] }
 0x914   :  { %v5063_v53 = vpop.eup %5062  ;;  %v2221_v35 = vmul.f32 %v2209_v39, %v2173_v16 }
 0x915   :  { %v2212_v63 = vadd.f32 1.0, %v5063_v53  ;;  %v2223_v26 = vmul.f32 %v2211_v41, %v2175_v50 }
 0x917   :  { %v2224_v28 = vmul.f32 %v2212_v63, %v2176_v23  ;;  %v2231_v45 = vpack.c.bf16 %v2223_v26, %v2221_v35 }
 0x918   :  { %v5065_v60 = vpop.eup %5064 }
 0x919   :  { %v5067_v29 = vpop.eup %5066  ;;  %v2232_v15 = vpack.c.bf16 %v2224_v28, %v2222_v32  ;;  %v2214_v3 = vadd.f32 1.0, %v5065_v60 }
 0x91a   :  { %v5069_v38 = vpop.eup %5068  ;;  %v2213_v21 = vadd.f32 1.0, %v5067_v29 }
 0x91b   :  { %v2215_v42 = vadd.f32 1.0, %v5069_v38  ;;  %2410 = vmatprep.mubr.bf16.mxu0 %v2232_v15  ;;  %v2226_v31 = vmul.f32 %v2214_v3, %v2178_v14 }
 0x91c   :  { %v5071_v11 = vpop.eup %5070  ;;  %2411 = vmatmul.mubr.bf16.gmra.mxu0 %v2231_v45  ;;  %v2225_v41 = vmul.f32 %v2213_v21, %v2177_v57  ;;  %v66_v45 = vadd.s32 16, %v5618_v7 }
 0x91d   :  { %v2216_v27 = vadd.f32 1.0, %v5071_v11  ;;  %v2227_v40 = vmul.f32 %v2215_v42, %v2179_v49 }
 0x91e   :  { %vm78_vm7 = vcmp.lt.s32.totalorder %v66_v45, 17 }
 0x91f   :  { %v2228_v58 = vmul.f32 %v2216_v27, %v2180_v18  ;;  %v2233_v39 = vpack.c.bf16 %v2227_v40, %v2225_v41  ;;  %v6080_v27 = vsel %vm78_vm7, 1.0, %v5156_v33 }
 0x921   :  { %v2234_v53 = vpack.c.bf16 %v2228_v58, %v2226_v31 }
 0x923   :  { %2418 = vmatprep.mubr.bf16.mxu0 %v2234_v53 }
 0x924   :  { %2419 = vmatmul.mubr.bf16.gmra.mxu0 %v2233_v39 }
 0x9b0   :  { %v4448_v50 = vpop.f32.mrf.mxu0 }
 0x9b2   :  { %v4449_v23 = vpop.f32.mrf.mxu0 }
 0x9b3   :  { %v4450_v25 = vadd.f32 %v4449_v23, %v4448_v50 }
 0x9b4   :  { %v4451_v4 = vpop.f32.mrf.mxu0 }
 0x9b5   :  { %v2405_v22 = vadd.f32 %v4450_v25, %v4126_v46  ;;  %v69_v25 = vadd.s32 40, %v5618_v7 }
 0x9b6   :  { %v4452_v63 = vpop.f32.mrf.mxu0 }
 0x9b7   :  { %v2434_v16 = vmul.f32 %v4143_v34, %v2405_v22  ;;  %v4453_v26 = vadd.f32 %v4452_v63, %v4451_v4  ;;  %vm99_vm9 = vcmp.lt.s32.totalorder %v69_v25, 41 }
 0x9b8   :  { %v6100_v7 = vsel %vm99_vm9, 1.0, %v5156_v33 }
 0x9b9   :  { %v2408_v32 = vadd.f32 %v4453_v26, %v4126_v46  ;;  %v6069_v28 = vadd.f32 %v2434_v16, %v5924_v43 }
 0x9bb   :  { %v2435_v60 = vmul.f32 %v4143_v34, %v2408_v32  ;;  %v2456_v35 = vsel %vm1025_vm3, %v6069_v28, 0.0 }
 0x9bc   :  { %2457 = vadd.xlane.f32.xlu0 %v2456_v35 }
 0x9bd   :  { %v6074_v29 = vadd.f32 %v2435_v60, %v5929_v2 }
 0x9bf   :  { %v2459_v15 = vsel %vm1025_vm3, %v6074_v29, 0.0 }
 0x9c0   :  { %2460 = vadd.xlane.f32.xlu1 %v2459_v15 }
 0x9dc   :  { %v4454_v38 = vpop.f32.mrf.mxu0 }
 0x9de   :  { %v4455_v3 = vpop.f32.mrf.mxu0 }
 0x9df   :  { %v4456_v42 = vadd.f32 %v4455_v3, %v4454_v38 }
 0x9e0   :  { %v4457_v11 = vpop.f32.mrf.mxu0 }
 0x9e1   :  { %v2413_v43 = vadd.f32 %v4456_v42, %v4126_v46 }
 0x9e2   :  { %v4458_v21 = vpop.f32.mrf.mxu0 }
 0x9e3   :  { %v2436_v49 = vmul.f32 %v4143_v34, %v2413_v43  ;;  %v4459_v14 = vadd.f32 %v4458_v21, %v4457_v11  ;;  %v4958_v21 = vld [vmem:[%s6623_s0 + $0x74] ss:$8 sps:$4 sm:$0xff]  }
 0x9e4   :  { %v4460_v18 = vpop.f32.mrf.mxu0  ;;  %2640 = vmatprep.subr.bf16.mxu1 %v4958_v21 }
 0x9e5   :  { %v2442_v2 = vadd.f32 %v2436_v49, %v5934_v30  ;;  %v2416_v57 = vadd.f32 %v4459_v14, %v4126_v46  ;;  %v4956_v49 = vld [vmem:[%s6623_s0 + $0x70] ss:$8 sps:$4 sm:$0xff]   ;;  %v4961_v14 = vld [vmem:[%s6623_s0 + $0x64] ss:$8 sps:$4 sm:$0xff]  }
 0x9e6   :  { %v4461_v40 = vpop.f32.mrf.mxu0  ;;  %2641 = vmatpush1.bf16.msra.mxu1 %v4956_v49 }
 0x9e7   :  { %v2437_v31 = vmul.f32 %v4143_v34, %v2416_v57  ;;  %v4462_v58 = vadd.f32 %v4461_v40, %v4460_v18  ;;  %v6084_v41 = vmul.f32 %v6080_v27, %v2442_v2  ;;  %v4959_v18 = vld [vmem:[%s6623_s0 + $0x60] ss:$8 sps:$4 sm:$0xff]   ;;  %2642 = vmatprep.subr.bf16.mxu1 %v4961_v14  ;;  %v4964_v2 = vld [vmem:[%s6623_s0 + $0x54] ss:$8 sps:$4 sm:$0xff]   ;;  %v4962_v57 = vld [vmem:[%s6623_s0 + $0x50] ss:$8 sps:$4 sm:$0xff]  }
 0x9e8   :  { %v4463_v53 = vpop.f32.mrf.mxu0  ;;  %v4965_v40 = vld [vmem:[%s6623_s0 + $0x40] ss:$8 sps:$4 sm:$0xff]  }
 0x9e9   :  { %v2421_v39 = vadd.f32 %v4462_v58, %v4126_v46  ;;  %v2462_v50 = vsel %vm1025_vm3, %v6084_v41, 0.0  ;;  %v6089_v23 = vadd.f32 %v2437_v31, %v5939_v17  ;;  %v4967_v31 = vld [vmem:[%s6623_s0 + $0x44] ss:$8 sps:$4 sm:$0xff]  }
 0x9ea   :  { %2463 = vadd.xlane.f32.xlu0 %v2462_v50  ;;  %v4464_v4 = vpop.f32.mrf.mxu0  ;;  %2643 = vmatpush1.bf16.msra.mxu1 %v4959_v18 }
 0x9eb   :  { %v2438_v30 = vmul.f32 %v4143_v34, %v2421_v39  ;;  %v4465_v22 = vadd.f32 %v4464_v4, %v4463_v53  ;;  %v2465_v63 = vsel %vm1025_vm3, %v6089_v23, 0.0  ;;  %2644 = vmatprep.subr.bf16.mxu1 %v4964_v2 }
 0x9ec   :  { %2466 = vadd.xlane.f32.xlu1 %v2465_v63 }
 0x9ed   :  { %v2424_v16 = vadd.f32 %v4465_v22, %v4126_v46  ;;  %v6095_v26 = vadd.f32 %v2438_v30, %v5944_v37 }
 0x9ee   :  { %2645 = vmatpush1.bf16.msra.mxu1 %v4962_v57 }
 0x9ef   :  { %v2439_v32 = vmul.f32 %v4143_v34, %v2424_v16  ;;  %v2468_v17 = vsel %vm1025_vm3, %v6095_v26, 0.0  ;;  %2646 = vmatprep.subr.bf16.mxu1 %v4967_v31 }
 0x9f0   :  { %2469 = vadd.xlane.f32.xlu0 %v2468_v17 }
 0x9f1   :  { %v2445_v60 = vadd.f32 %v2439_v32, %v5949_v51 }
 0x9f2   :  { %2647 = vmatpush1.bf16.msra.mxu1 %v4965_v40  ;;  %v4146_v40 = vld [vmem:[%s6596_s3 + $0x1] ss:$0 sm:$0xff] }
 0x9f3   :  { %v6104_v35 = vmul.f32 %v6100_v7, %v2445_v60 }
 0x9f5   :  { %v2471_v46 = vsel %vm1025_vm3, %v6104_v35, 0.0 }
 0x9f6   :  { %2472 = vadd.xlane.f32.xlu1 %v2471_v46 }
 0xa45   :  { %v2458_v37 = vpop.xlane.xlu0 %2457 }
 0xa46   :  { %v2474_v15 = vmul.f32 0.015625, %v2458_v37 }
 0xa48   :  { %v2480_v34 = vsub.f32 %v6069_v28, %v2474_v15 }
 0xa49   :  { %v2461_v38 = vpop.xlane.xlu1 %2460 }
 0xa4a   :  { %v2475_v45 = vmul.f32 0.015625, %v2461_v38  ;;  %v2486_v3 = vmul.f32 %v2480_v34, %v2480_v34 }
 0xa4c   :  { %v2481_v42 = vsub.f32 %v6074_v29, %v2475_v45  ;;  %v2492_v11 = vsel %vm1025_vm3, %v2486_v3, 0.0 }
 0xa4d   :  { %2493 = vadd.xlane.f32.xlu0 %v2492_v11 }
 0xa4e   :  { %v2487_v51 = vmul.f32 %v2481_v42, %v2481_v42 }
 0xa50   :  { %v2495_v43 = vsel %vm1025_vm3, %v2487_v51, 0.0 }
 0xa51   :  { %2496 = vadd.xlane.f32.xlu1 %v2495_v43 }
 0xa73   :  { %v2464_v58 = vpop.xlane.xlu0 %2463 }
 0xa74   :  { %v2476_v53 = vmul.f32 0.015625, %v2464_v58 }
 0xa75   :  { %v2467_v39 = vpop.xlane.xlu1 %2466 }
 0xa76   :  { %v2482_v50 = vsub.f32 %v6084_v41, %v2476_v53  ;;  %v2477_v25 = vmul.f32 0.015625, %v2467_v39  ;;  %v4147_v39 = vld [vmem:[%s6597_s4 + $0x1] ss:$0 sm:$0xff] }
 0xa78   :  { %v2483_v4 = vsub.f32 %v6089_v23, %v2477_v25  ;;  %v2488_v30 = vmul.f32 %v2482_v50, %v2482_v50 }
 0xa79   :  { %v2470_v22 = vpop.xlane.xlu0 %2469 }
 0xa7a   :  { %v2478_v63 = vmul.f32 0.015625, %v2470_v22  ;;  %v2498_v16 = vsel %vm1025_vm3, %v2488_v30, 0.0  ;;  %v2489_v32 = vmul.f32 %v2483_v4, %v2483_v4 }
 0xa7b   :  { %2499 = vadd.xlane.f32.xlu0 %v2498_v16 }
 0xa7c   :  { %v2484_v17 = vsub.f32 %v6095_v26, %v2478_v63  ;;  %v2501_v60 = vsel %vm1025_vm3, %v2489_v32, 0.0 }
 0xa7d   :  { %2502 = vadd.xlane.f32.xlu1 %v2501_v60 }
 0xa7e   :  { %v2490_v46 = vmul.f32 %v2484_v17, %v2484_v17 }
 0xa7f   :  { %v2473_v37 = vpop.xlane.xlu1 %2472 }
 0xa80   :  { %v2479_v15 = vmul.f32 0.015625, %v2473_v37  ;;  %v2504_v38 = vsel %vm1025_vm3, %v2490_v46, 0.0 }
 0xa81   :  { %2505 = vadd.xlane.f32.xlu0 %v2504_v38 }
 0xa82   :  { %v2485_v45 = vsub.f32 %v6104_v35, %v2479_v15 }
 0xa84   :  { %v2491_v3 = vmul.f32 %v2485_v45, %v2485_v45 }
 0xa86   :  { %v2507_v11 = vsel %vm1025_vm3, %v2491_v3, 0.0 }
 0xa87   :  { %2508 = vadd.xlane.f32.xlu1 %v2507_v11 }
 0xad6   :  { %v2494_v51 = vpop.xlane.xlu0 %2493 }
 0xad7   :  { %v2510_v43 = vmul.f32 0.015625, %v2494_v51 }
 0xad9   :  { %v2516_v21 = vadd.f32 1e-06, %v2510_v43 }
 0xada   :  { %v2497_v49 = vpop.xlane.xlu1 %2496 }
 0xadb   :  { %5072 = vrsqrt.f32 %v2516_v21  ;;  %v2511_v14 = vmul.f32 0.015625, %v2497_v49 }
 0xadd   :  { %v2517_v18 = vadd.f32 1e-06, %v2511_v14 }
 0xadf   :  { %5074 = vrsqrt.f32 %v2517_v18 }
 0xae8   :  { %v5073_v2 = vpop.eup %5072 }
 0xae9   :  { %v2528_v57 = vmul.f32 %v5073_v2, %v2480_v34 }
 0xaeb   :  { %v2540_v58 = vmul.f32 %v4146_v40, %v2528_v57 }
 0xaec   :  { %v5075_v31 = vpop.eup %5074 }
 0xaed   :  { %v2529_v53 = vmul.f32 %v5075_v31, %v2481_v42  ;;  %v2552_v30 = vadd.f32 %v4147_v39, %v2540_v58 }
 0xaef   :  { %v2541_v25 = vmul.f32 %v4146_v40, %v2529_v53 }
 0xaf1   :  { %v2553_v22 = vadd.f32 %v4147_v39, %v2541_v25 }
 0xaf3   :  { %v2558_v63 = vpack.c.bf16 %v2553_v22, %v2552_v30 }
 0xaf5   :  { %4165 = vmatmul.mubr.msk.bf16.vlgmr.msra.gmra.mxu1 %vm1025_vm3, %v2558_v63 }
 0xaf6   :  { %2674 = vmatprep.mubr.bf16.mxu1 %v5158_v44 }
 0xb04   :  { %v2500_v34 = vpop.xlane.xlu0 %2499 }
 0xb05   :  { %v2512_v16 = vmul.f32 0.015625, %v2500_v34 }
 0xb06   :  { %v2503_v32 = vpop.xlane.xlu1 %2502 }
 0xb07   :  { %v2518_v60 = vadd.f32 1e-06, %v2512_v16  ;;  %v2513_v46 = vmul.f32 0.015625, %v2503_v32 }
 0xb09   :  { %5076 = vrsqrt.f32 %v2518_v60  ;;  %v2519_v37 = vadd.f32 1e-06, %v2513_v46 }
 0xb0a   :  { %v2506_v42 = vpop.xlane.xlu0 %2505 }
 0xb0b   :  { %5078 = vrsqrt.f32 %v2519_v37  ;;  %v2514_v15 = vmul.f32 0.015625, %v2506_v42 }
 0xb0d   :  { %v2520_v38 = vadd.f32 1e-06, %v2514_v15 }
 0xb0f   :  { %5080 = vrsqrt.f32 %v2520_v38 }
 0xb10   :  { %v2509_v3 = vpop.xlane.xlu1 %2508 }
 0xb11   :  { %v2515_v11 = vmul.f32 0.015625, %v2509_v3 }
 0xb13   :  { %v2521_v51 = vadd.f32 1e-06, %v2515_v11 }
 0xb15   :  { %5082 = vrsqrt.f32 %v2521_v51 }
 0xb16   :  { %v5077_v43 = vpop.eup %5076 }
 0xb17   :  { %v2530_v21 = vmul.f32 %v5077_v43, %v2482_v50 }
 0xb18   :  { %v5079_v49 = vpop.eup %5078 }
 0xb19   :  { %v2531_v14 = vmul.f32 %v5079_v49, %v2483_v4  ;;  %v2542_v18 = vmul.f32 %v4146_v40, %v2530_v21  ;;  %v4156_v4 = vld [vmem:[%s6598_s6 + $0x2] sm:$0x3] }
 0xb1b   :  { %v2543_v2 = vmul.f32 %v4146_v40, %v2531_v14  ;;  %v2554_v31 = vadd.f32 %v4147_v39, %v2542_v18 }
 0xb1c   :  { %v5081_v57 = vpop.eup %5080 }
 0xb1d   :  { %v2555_v58 = vadd.f32 %v4147_v39, %v2543_v2  ;;  %v2532_v25 = vmul.f32 %v5081_v57, %v2484_v17  ;;  %v2576_v17 = vrot.slane %v4156_v4, %v5621_v24 }
 0xb1f   :  { %v2559_v53 = vpack.c.bf16 %v2555_v58, %v2554_v31  ;;  %v2544_v63 = vmul.f32 %v4146_v40, %v2532_v25 }
 0xb21   :  { %4166 = vmatmul.mubr.msk.bf16.gmra.mxu1 %vm1025_vm3, %v2559_v53  ;;  %v2556_v16 = vadd.f32 %v4147_v39, %v2544_v63 }
 0xb22   :  { %v5083_v30 = vpop.eup %5082  ;;  %2684 = vmatprep.mubr.bf16.mxu1 %v5158_v44 }
 0xb23   :  { %v2533_v22 = vmul.f32 %v5083_v30, %v2485_v45 }
 0xb25   :  { %v2545_v34 = vmul.f32 %v4146_v40, %v2533_v22  ;;  %v2580_v40 = vrot.slane %v4156_v4, %v5630_v12 }
 0xb27   :  { %v2557_v32 = vadd.f32 %v4147_v39, %v2545_v34 }
 0xb29   :  { %v2560_v50 = vpack.c.bf16 %v2557_v32, %v2556_v16 }
 0xb2b   :  { %4167 = vmatmul.mubr.msk.bf16.gmra.mxu1 %vm1025_vm3, %v2560_v50 }
 0xbb5   :  { %v2666_v60 = vpop.f32.mrf.mxu1 }
 0xbb6   :  { %v2667_v42 = vadd.f32 %v2666_v60, %v2576_v17 }
 0xbb7   :  { %v2668_v46 = vpop.f32.mrf.mxu1 }
 0xbb8   :  { %v2669_v11 = vadd.f32 %v2668_v46, %v2580_v40 }
 0xbb9   :  { %v2670_v37 = vpop.f32.mrf.mxu1 }
 0xbba   :  { %v2671_v15 = vadd.f32 %v2670_v37, %v2576_v17 }
 0xbbb   :  { %v2672_v45 = vpop.f32.mrf.mxu1 }
 0xbbc   :  { %v2695_v38 = vpack.c.bf16 %v2671_v15, %v2667_v42  ;;  %v2673_v39 = vadd.f32 %v2672_v45, %v2580_v40 }
 0xbbe   :  { %4705 = vmatprep.mubr.msk.bf16.mxu1 %vm1025_vm3, %v2695_v38  ;;  %v6161_v21 = vpack.c.bf16 %v2673_v39, %v2669_v11  ;;  %v2701_v18 = vrot.slane %v2695_v38, 4  ;;  %v2712_v46 = vmul.bf16 %v2695_v38, %v5633_v20 }
 0xbc0   :  { %v2717_v30 = vrot.slane %v6161_v21, 4 }
 0xbe1   :  { %v2676_v3 = vpop.f32.mrf.mxu1 }
 0xbe2   :  { %v2677_v51 = vadd.f32 %v2676_v3, %v2576_v17 }
 0xbe3   :  { %v2678_v43 = vpop.f32.mrf.mxu1 }
 0xbe4   :  { %v6163_v49 = vpack.c.bf16 %v2677_v51, %v2677_v51  ;;  %v2679_v14 = vadd.f32 %v2678_v43, %v2580_v40 }
 0xbe5   :  { %v2680_v2 = vpop.f32.mrf.mxu1 }
 0xbe6   :  { %v2702_v57 = vrot.slane %v6163_v49, 4  ;;  %v2698_v31 = vpack.c.bf16 %v2679_v14, %v2679_v14  ;;  %v2707_v58 = vsel %vm1270_vm14, %v6163_v49, %v2701_v18  ;;  %v2681_v37 = vadd.f32 %v2680_v2, %v2576_v17 }
 0xbe7   :  { %v2682_v53 = vpop.f32.mrf.mxu1  ;;  %v2713_v25 = vmul.bf16 %v2707_v58, %v5626_v10  ;;  %v2710_v39 = vmul.bf16 %v2707_v58, %v5664_v19 }
 0xbe8   :  { %v2718_v22 = vrot.slane %v2698_v31, 4  ;;  %v2683_v63 = vadd.f32 %v2682_v53, %v2580_v40  ;;  %v2703_v34 = vsel %vm1270_vm14, %v2701_v18, %v2702_v57  ;;  %v2723_v50 = vsel %vm1270_vm14, %v2698_v31, %v2717_v30 }
 0xbe9   :  { %2745 = vrot.lane.b32.xlu1 %v2713_v25, %s5159_s22  ;;  %v2714_v16 = vmul.bf16 %v2703_v34, %v5647_v8  ;;  %v2729_v45 = vmul.bf16 %v2723_v50, %v5549_v52  ;;  %v2711_v43 = vmul.bf16 %v2703_v34, %v5640_v36  ;;  %v2728_v57 = vmul.bf16 %v6161_v21, %v5565_v55 }
 0xbea   :  { %v2719_v32 = vsel %vm1270_vm14, %v2717_v30, %v2718_v22  ;;  %v2709_v25 = vmul.bf16 %v2695_v38, %v5657_v9 }
 0xbeb   :  { %2747 = vrot.lane.b32.xlu0 %v2714_v16, %s5159_s22  ;;  %v2686_v4 = vpop.f32.mrf.mxu1  ;;  %v2730_v60 = vmul.bf16 %v2719_v32, %v5557_v54  ;;  %v2727_v34 = vmul.bf16 %v2719_v32, %v5588_v61  ;;  %v2726_v32 = vmul.bf16 %v2723_v50, %v5590_v62 }
 0xbec   :  { %v2687_v42 = vadd.f32 %v2686_v4, %v2576_v17 }
 0xbed   :  { %4709 = vmatprep.subr.bf16.mxu0 %v2730_v60  ;;  %2743 = vrot.lane.b32.xlu1 %v2712_v46, %s5159_s22  ;;  %v2688_v15 = vpop.f32.mrf.mxu1 }
 0xbee   :  { %v6181_v3 = vpack.c.bf16 %v2687_v42, %v2681_v37  ;;  %v2689_v11 = vadd.f32 %v2688_v15, %v2580_v40  ;;  %4710 = vmatpush3.bf16.msra.mxu0 %v2730_v60 }
 0xbef   :  { %4711 = vmatprep.subr.bf16.mxu0 %v2729_v45  ;;  %2739 = vrot.lane.b32.xlu0 %v2710_v39, %s5159_s22  ;;  %v2690_v51 = vpop.f32.mrf.mxu1 }
 0xbf0   :  { %v6185_v14 = vpack.c.bf16 %v2689_v11, %v2683_v63  ;;  %v2691_v18 = vadd.f32 %v2690_v51, %v2576_v17  ;;  %v2957_v53 = vrot.slane %v6181_v3, 4  ;;  %v2968_v37 = vmul.bf16 %v6181_v3, %v5633_v20 }
 0xbf1   :  { %2741 = vrot.lane.b32.xlu1 %v2711_v43, %s5159_s22  ;;  %v2692_v2 = vpop.f32.mrf.mxu1  ;;  %v2965_v50 = vmul.bf16 %v6181_v3, %v5657_v9 }
 0xbf2   :  { %v6190_v31 = vpack.c.bf16 %v2691_v18, %v2691_v18  ;;  %v2693_v58 = vadd.f32 %v2692_v2, %v2580_v40  ;;  %4712 = vmatpush3.bf16.msra.mxu0 %v2729_v45  ;;  %v2973_v30 = vrot.slane %v6185_v14, 4 }
 0xbf3   :  { %4713 = vmatprep.subr.bf16.mxu0 %v2728_v57 }
 0xbf4   :  { %v2958_v22 = vrot.slane %v6190_v31, 4  ;;  %v2954_v17 = vpack.c.bf16 %v2693_v58, %v2693_v58  ;;  %v2963_v63 = vsel %vm1270_vm14, %v6190_v31, %v2957_v53 }
 0xbf5   :  { %2737 = vrot.lane.b32.xlu1 %v2709_v25, %s5159_s22  ;;  %v2969_v38 = vmul.bf16 %v2963_v63, %v5626_v10  ;;  %v2725_v10 = vmul.bf16 %v6161_v21, %v5596_v0 }
 0xbf6   :  { %v2974_v16 = vrot.slane %v2954_v17, 4  ;;  %4714 = vmatpush3.bf16.msra.mxu0 %v2728_v57  ;;  %v2959_v40 = vsel %vm1270_vm14, %v2957_v53, %v2958_v22  ;;  %v6202_v4 = vsel %vm1270_vm14, %v2954_v17, %v2973_v30 }
 0xbf7   :  { %4715 = vmatprep.subr.bf16.mxu0 %v2727_v34  ;;  %v2970_v60 = vmul.bf16 %v2959_v40, %v5647_v8  ;;  %v2967_v42 = vmul.bf16 %v2959_v40, %v5640_v36  ;;  %v2966_v8 = vmul.bf16 %v2963_v63, %v5664_v19 }
 0xbf8   :  { %v6207_v46 = vsel %vm1270_vm14, %v2973_v30, %v2974_v16 }
 0xbf9   :  { %3001 = vrot.lane.b32.xlu1 %v2969_v38, %s5159_s22  ;;  %3003 = vrot.lane.b32.xlu0 %v2970_v60, %s5159_s22 }
 0xbfa   :  { %4716 = vmatpush3.bf16.msra.mxu0 %v2727_v34 }
 0xbfb   :  { %4717 = vmatprep.subr.bf16.mxu0 %v2726_v32 }
 0xbfd   :  { %2999 = vrot.lane.b32.xlu0 %v2968_v37, %s5159_s22  ;;  %2997 = vrot.lane.b32.xlu1 %v2967_v42, %s5159_s22 }
 0xbfe   :  { %4718 = vmatpush3.bf16.msra.mxu0 %v2726_v32 }
 0xbff   :  { %4719 = vmatprep.subr.bf16.mxu0 %v2725_v10 }
 0xc01   :  { %2995 = vrot.lane.b32.xlu0 %v2966_v8, %s5159_s22  ;;  %2993 = vrot.lane.b32.xlu1 %v2965_v50, %s5159_s22 }
 0xc02   :  { %4720 = vmatpush3.bf16.msra.mxu0 %v2725_v10 }
 0xc03   :  { %4725 = vmatprep.subr.msk.bf16.mxu0 %vm5752_vm0, %v5160_v6 }
 0xc5b   :  { %v2746_v21 = vpop.permute.xlu1 %2745 }
 0xc5c   :  { %v2767_v9 = vsel %vm1025_vm3, %v2746_v21, 0 }
 0xc5d   :  { %v2748_v20 = vpop.permute.xlu0 %2747 }
 0xc5e   :  { %v2770_v36 = vsel %vm1025_vm3, %v2748_v20, 0  ;;  %4837 = vmatprep.subr.msk.bf16.mxu1 %vm1025_vm3, %v2748_v20 }
 0xc5f   :  { %4694 = vmatpush3.bf16.xpose.msra.mxu1 %v2770_v36  ;;  %v2744_v19 = vpop.permute.xlu1 %2743 }
 0xc60   :  { %4838 = vmatprep.subr.msk.bf16.mxu1 %vm1025_vm3, %v2746_v21  ;;  %v2764_v15 = vsel %vm1025_vm3, %v2744_v19, 0 }
 0xc61   :  { %v2740_v11 = vpop.permute.xlu0 %2739 }
 0xc62   :  { %v2758_v51 = vsel %vm1025_vm3, %v2740_v11, 0 }
 0xc63   :  { %v2742_v45 = vpop.permute.xlu1 %2741 }
 0xc64   :  { %v2761_v39 = vsel %vm1025_vm3, %v2742_v45, 0 }
 0xc67   :  { %4696 = vmatpush3.bf16.xpose.msra.mxu1 %v2767_v9  ;;  %v2738_v43 = vpop.permute.xlu1 %2737 }
 0xc68   :  { %4839 = vmatprep.subr.msk.bf16.mxu1 %vm1025_vm3, %v2744_v19  ;;  %v2755_v18 = vsel %vm1025_vm3, %v2738_v43, 0 }
 0xc6b   :  { %v3004_v2 = vpop.permute.xlu0 %3003  ;;  %v3002_v58 = vpop.permute.xlu1 %3001 }
 0xc6c   :  { %v3026_v57 = vsel %vm1025_vm3, %v3004_v2, 0  ;;  %v3023_v53 = vsel %vm1025_vm3, %v3002_v58, 0 }
 0xc6f   :  { %4698 = vmatpush3.bf16.xpose.msra.mxu1 %v2764_v15  ;;  %v3000_v25 = vpop.permute.xlu0 %2999  ;;  %v2998_v22 = vpop.permute.xlu1 %2997 }
 0xc70   :  { %4840 = vmatprep.subr.msk.bf16.mxu1 %vm1025_vm3, %v2742_v45  ;;  %v3020_v30 = vsel %vm1025_vm3, %v3000_v25, 0 }
 0xc73   :  { %v2996_v17 = vpop.permute.xlu0 %2995  ;;  %v2994_v63 = vpop.permute.xlu1 %2993 }
 0xc74   :  { %v3011_v34 = vsel %vm1025_vm3, %v2994_v63, 0 }
 0xc77   :  { %4700 = vmatpush3.bf16.xpose.msra.mxu1 %v2761_v39 }
 0xc78   :  { %4841 = vmatprep.subr.msk.bf16.mxu1 %vm1025_vm3, %v2740_v11 }
 0xc7f   :  { %4702 = vmatpush3.bf16.xpose.msra.mxu1 %v2758_v51 }
 0xc80   :  { %4842 = vmatprep.subr.msk.bf16.mxu1 %vm1025_vm3, %v2738_v43 }
 0xc87   :  { %4704 = vmatpush3.bf16.xpose.msra.mxu1 %v2755_v18 }
 0xc88   :  { %4843 = vmatprep.subr.msk.bf16.mxu1 %vm1025_vm3, %v3004_v2 }
 0xc8e   :  { %4706 = vmatmul.mubr.msk.bf16.vlgmr.msra.gmra.mxu1 %vm1025_vm3, %v6163_v49  ;;  %v3017_v49 = vsel %vm1025_vm3, %v2998_v22, 0 }
 0xc8f   :  { %4742 = vmatpush3.bf16.xpose.msra.mxu1 %v3026_v57  ;;  %4753 = vmatprep.mubr.msk.bf16.mxu1 %vm1025_vm3, %v6181_v3  ;;  %v3014_v3 = vsel %vm1025_vm3, %v2996_v17, 0 }
 0xc90   :  { %4844 = vmatprep.subr.msk.bf16.mxu1 %vm1025_vm3, %v3002_v58 }
 0xc97   :  { %4744 = vmatpush3.bf16.xpose.msra.mxu1 %v3023_v53 }
 0xc98   :  { %4845 = vmatprep.subr.msk.bf16.mxu1 %vm1025_vm3, %v3000_v25 }
 0xc9f   :  { %4746 = vmatpush3.bf16.xpose.msra.mxu1 %v3020_v30 }
 0xca0   :  { %4846 = vmatprep.subr.msk.bf16.mxu1 %vm1025_vm3, %v2998_v22 }
 0xca7   :  { %4748 = vmatpush3.bf16.xpose.msra.mxu1 %v3017_v49 }
 0xca8   :  { %4847 = vmatprep.subr.msk.bf16.mxu1 %vm1025_vm3, %v2996_v17 }
 0xcaf   :  { %4750 = vmatpush3.bf16.xpose.msra.mxu1 %v3014_v3 }
 0xcb0   :  { %4848 = vmatprep.subr.msk.bf16.mxu1 %vm1025_vm3, %v2994_v63 }
 0xcb7   :  { %4752 = vmatpush3.bf16.xpose.msra.mxu1 %v3011_v34  ;;  %v2986_v34 = vmul.bf16 %v6207_v46, %v5557_v54  ;;  %v2984_v54 = vmul.bf16 %v6185_v14, %v5565_v55 }
 0xcb8   :  { %4789 = vmatprep.subr.bf16.mxu1 %v5156_v33 }
 0xcbe   :  { %4754 = vmatmul.mubr.msk.bf16.vlgmr.msra.gmra.mxu1 %vm1025_vm3, %v6190_v31 }
 0xcbf   :  { %4797 = vmatprep.mubr.msk.bf16.mxu1 %vm5157_vm1, %v5156_v33 }
 0xd4e   :  { %v4707_v16 = vpop.f32.mrf.mxu1 }
 0xd4f   :  { %v2822_v37 = vsel %vm5572_vm6, %v4707_v16, -1e+30 }
 0xd50   :  { %v2806_v40 = vpop.f32.mrf.mxu1  ;;  %v2829_v31 = vsel %vm1418_vm15, %v2822_v37, -inf }
 0xd51   :  { %v2820_v38 = vsel %vm5572_vm6, %v2806_v40, -1e+30 }
 0xd52   :  { %v4708_v60 = vpop.f32.mrf.mxu1  ;;  %v2823_v32 = vsel %vm1418_vm15, %v2820_v38, -inf }
 0xd53   :  { %2824 = vmax.xlane.f32.xlu0 %v2823_v32  ;;  %v2985_v60 = vmul.bf16 %v6202_v4, %v5549_v52  ;;  %v2982_v52 = vmul.bf16 %v6202_v4, %v5590_v62  ;;  %v4969_v62 = vld [vmem:[%s6599_s7 + $0x30] sm:$0xff]  }
 0xd54   :  { %v2809_v42 = vpop.f32.mrf.mxu1 }
 0xd55   :  { %v2821_v10 = vsel %vm5572_vm6, %v2809_v42, -1e+30 }
 0xd56   :  { %v2826_v8 = vsel %vm1418_vm15, %v2821_v10, -inf }
 0xd57   :  { %2830 = vmax.xlane.f32.xlu0 %v2829_v31  ;;  %2827 = vmax.xlane.f32.xlu1 %v2826_v8  ;;  %v2983_v8 = vmul.bf16 %v6207_v46, %v5588_v61  ;;  %v4968_v61 = vld [vmem:[%s6599_s7 + $0x38] sm:$0xff]  }
 0xd58   :  { %4790 = vmatpush3.bf16.msra.mxu1 %v4968_v61 }
 0xd59   :  { %4791 = vmatprep.subr.bf16.mxu1 %v5156_v33 }
 0xd5c   :  { %4792 = vmatpush3.bf16.msra.mxu1 %v4969_v62 }
 0xd5d   :  { %4793 = vmatprep.subr.bf16.mxu1 %v5156_v33 }
 0xd7e   :  { %v4755_v50 = vpop.f32.mrf.mxu1 }
 0xd7f   :  { %v3078_v20 = vsel %vm5572_vm6, %v4755_v50, -1e+30  ;;  %v2981_v50 = vmul.bf16 %v6185_v14, %v5596_v0  ;;  %v4970_v0 = vld [vmem:[%s6599_s7 + $0x28] sm:$0xff]  }
 0xd80   :  { %v3062_v36 = vpop.f32.mrf.mxu1  ;;  %v3085_v21 = vsel %vm1418_vm15, %v3078_v20, -inf  ;;  %4794 = vmatpush3.bf16.msra.mxu1 %v4970_v0 }
 0xd81   :  { %v3076_v9 = vsel %vm5572_vm6, %v3062_v36, -1e+30  ;;  %3086 = vmax.xlane.f32.xlu1 %v3085_v21  ;;  %4795 = vmatprep.subr.bf16.mxu1 %v5156_v33 }
 0xd82   :  { %v4756_v19 = vpop.f32.mrf.mxu1  ;;  %v3079_v15 = vsel %vm1418_vm15, %v3076_v9, -inf }
 0xd83   :  { %3080 = vmax.xlane.f32.xlu0 %v3079_v15 }
 0xd84   :  { %v3065_v45 = vpop.f32.mrf.mxu1  ;;  %4796 = vmatpush3.bf16.msra.mxu1 %v4971_v5 }
 0xd85   :  { %v3077_v39 = vsel %vm5572_vm6, %v3065_v45, -1e+30 }
 0xd86   :  { %v3082_v11 = vsel %vm1418_vm15, %v3077_v39, -inf }
 0xd87   :  { %3083 = vmax.xlane.f32.xlu0 %v3082_v11 }
 0xddc   :  { %v2825_v51 = vpop.xlane.xlu0 %2824 }
 0xddd   :  { %v2832_v43 = vsub.f32 %v2820_v38, %v2825_v51 }
 0xddf   :  { %v2835_v18 = vmul.f32 1.442695, %v2832_v43 }
 0xde0   :  { %v2828_v2 = vpop.xlane.xlu1 %2827  ;;  %v2831_v57 = vpop.xlane.xlu0 %2830 }
 0xde1   :  { %v2833_v58 = vsub.f32 %v2821_v10, %v2828_v2  ;;  %v2834_v53 = vsub.f32 %v2822_v37, %v2831_v57  ;;  %5084 = vpow2.f32 %v2835_v18 }
 0xde3   :  { %v2837_v25 = vmul.f32 1.442695, %v2833_v58  ;;  %v2839_v30 = vmul.f32 1.442695, %v2834_v53 }
 0xde5   :  { %5086 = vpow2.f32 %v2837_v25 }
 0xde6   :  { %5088 = vpow2.f32 %v2839_v30 }
 0xdee   :  { %v5085_v22 = vpop.eup %5084 }
 0xdf2   :  { %v5087_v49 = vpop.eup %5086 }
 0xdf3   :  { %v5089_v17 = vpop.eup %5088  ;;  %v2841_v56 = vpack.c.bf16 %v5087_v49, %v5085_v22 }
 0xdf4   :  { %v2842_v3 = vpack.c.bf16 %v5089_v17, %v5089_v17 }
 0xdf5   :  { %4721 = vmatprep.mubr.msk.bf16.mxu0 %vm1418_vm15, %v2841_v56 }
 0xdf6   :  { %4722 = vmatmul.mubr.msk.bf16.vlgmr.msra.gmra.mxu0 %vm1418_vm15, %v2842_v3 }
 0xdf7   :  { %4726 = vmatpush3.bf16.msk.msra.mxu0 %vm5752_vm0, %v5160_v6  ;;  %4737 = vmatprep.mubr.msk.bf16.mxu0 %vm1418_vm15, %v2841_v56 }
 0xdf8   :  { %4727 = vmatprep.subr.msk.bf16.mxu0 %vm5773_vm2, %v5160_v6 }
 0xdfb   :  { %4728 = vmatpush3.bf16.msk.msra.mxu0 %vm5773_vm2, %v5160_v6 }
 0xdfc   :  { %4729 = vmatprep.subr.msk.bf16.mxu0 %vm5788_vm4, %v5160_v6 }
 0xdff   :  { %4730 = vmatpush3.bf16.msk.msra.mxu0 %vm5788_vm4, %v5160_v6 }
 0xe00   :  { %4731 = vmatprep.subr.msk.bf16.mxu0 %vm5801_vm12, %v5160_v6 }
 0xe03   :  { %4732 = vmatpush3.bf16.msk.msra.mxu0 %vm5801_vm12, %v5160_v6 }
 0xe04   :  { %4733 = vmatprep.subr.msk.bf16.mxu0 %vm5815_vm8, %v5160_v6 }
 0xe07   :  { %4734 = vmatpush3.bf16.msk.msra.mxu0 %vm5815_vm8, %v5160_v6 }
 0xe08   :  { %4735 = vmatprep.subr.msk.bf16.mxu0 %vm5828_vm5, %v5160_v6 }
 0xe0a   :  { %v3087_v63 = vpop.xlane.xlu1 %3086 }
 0xe0b   :  { %v3090_v16 = vsub.f32 %v3078_v20, %v3087_v63  ;;  %4736 = vmatpush3.bf16.msk.msra.mxu0 %vm5828_vm5, %v5160_v6 }
 0xe0c   :  { %4757 = vmatprep.subr.bf16.mxu0 %v2986_v34  ;;  %v3081_v40 = vpop.xlane.xlu0 %3080 }
 0xe0d   :  { %v3088_v38 = vsub.f32 %v3076_v9, %v3081_v40  ;;  %v3095_v32 = vmul.f32 1.442695, %v3090_v16  ;;  %v4213_v40 = vld [vmem:[%s6600_s8 + $0x1] ss:$0 sm:$0xff] }
 0xe0e   :  { %4738 = vmatmul.mubr.msk.bf16.vlgmr.msra.gmra.mxu0 %vm1418_vm15, %v2842_v3 }
 0xe0f   :  { %4758 = vmatpush3.bf16.msra.mxu0 %v2986_v34  ;;  %v3091_v37 = vmul.f32 1.442695, %v3088_v38  ;;  %5090 = vpow2.f32 %v3095_v32 }
 0xe10   :  { %4759 = vmatprep.subr.bf16.mxu0 %v2985_v60  ;;  %v3084_v42 = vpop.xlane.xlu0 %3083 }
 0xe11   :  { %v3089_v10 = vsub.f32 %v3077_v39, %v3084_v42  ;;  %5092 = vpow2.f32 %v3091_v37 }
 0xe13   :  { %v3093_v31 = vmul.f32 1.442695, %v3089_v10  ;;  %4760 = vmatpush3.bf16.msra.mxu0 %v2985_v60  ;;  %v4222_v60 = vld [vmem:[%s6601_s9 + $0x1] ss:$0 sm:$0xff] }
 0xe14   :  { %4761 = vmatprep.subr.bf16.mxu0 %v2984_v54 }
 0xe15   :  { %5094 = vpow2.f32 %v3093_v31 }
 0xe17   :  { %4762 = vmatpush3.bf16.msra.mxu0 %v2984_v54 }
 0xe18   :  { %4763 = vmatprep.subr.bf16.mxu0 %v2983_v8 }
 0xe1b   :  { %4764 = vmatpush3.bf16.msra.mxu0 %v2983_v8 }
 0xe1c   :  { %4765 = vmatprep.subr.bf16.mxu0 %v2982_v52  ;;  %v5091_v55 = vpop.eup %5090 }
 0xe1d   :  { %v3098_v9 = vpack.c.bf16 %v5091_v55, %v5091_v55 }
 0xe1e   :  { %v5093_v20 = vpop.eup %5092 }
 0xe1f   :  { %4766 = vmatpush3.bf16.msra.mxu0 %v2982_v52 }
 0xe20   :  { %4767 = vmatprep.subr.bf16.mxu0 %v2981_v50 }
 0xe22   :  { %v5095_v36 = vpop.eup %5094 }
 0xe23   :  { %4768 = vmatpush3.bf16.msra.mxu0 %v2981_v50  ;;  %v3097_v21 = vpack.c.bf16 %v5095_v36, %v5093_v20 }
 0xe24   :  { %4773 = vmatprep.subr.msk.bf16.mxu0 %vm5752_vm0, %v5160_v6 }
 0xe25   :  { %4769 = vmatprep.mubr.msk.bf16.mxu0 %vm1418_vm15, %v3097_v21 }
 0xe26   :  { %4770 = vmatmul.mubr.msk.bf16.vlgmr.msra.gmra.mxu0 %vm1418_vm15, %v3098_v9 }
 0xe27   :  { %4774 = vmatpush3.bf16.msk.msra.mxu0 %vm5752_vm0, %v5160_v6  ;;  %4785 = vmatprep.mubr.msk.bf16.mxu0 %vm1418_vm15, %v3097_v21 }
 0xe28   :  { %4775 = vmatprep.subr.msk.bf16.mxu0 %vm5773_vm2, %v5160_v6 }
 0xe2b   :  { %4776 = vmatpush3.bf16.msk.msra.mxu0 %vm5773_vm2, %v5160_v6 }
 0xe2c   :  { %4777 = vmatprep.subr.msk.bf16.mxu0 %vm5788_vm4, %v5160_v6 }
 0xe2f   :  { %4778 = vmatpush3.bf16.msk.msra.mxu0 %vm5788_vm4, %v5160_v6 }
 0xe30   :  { %4779 = vmatprep.subr.msk.bf16.mxu0 %vm5801_vm12, %v5160_v6 }
 0xe33   :  { %4780 = vmatpush3.bf16.msk.msra.mxu0 %vm5801_vm12, %v5160_v6 }
 0xe34   :  { %4781 = vmatprep.subr.msk.bf16.mxu0 %vm5815_vm8, %v5160_v6 }
 0xe37   :  { %4782 = vmatpush3.bf16.msk.msra.mxu0 %vm5815_vm8, %v5160_v6 }
 0xe38   :  { %4783 = vmatprep.subr.msk.bf16.mxu0 %vm5828_vm5, %v5160_v6 }
 0xe3b   :  { %4784 = vmatpush3.bf16.msk.msra.mxu0 %vm5828_vm5, %v5160_v6 }
 0xe3e   :  { %4786 = vmatmul.mubr.msk.bf16.vlgmr.msra.gmra.mxu0 %vm1418_vm15, %v3098_v9 }
 0xe3f   :  { %3549 = vmatprep.mubr.bf16.mxu0 %v5158_v44 }
 0xeb6   :  { %v4723_v6 = vpop.f32.mrf.mxu0 }
 0xeb8   :  { %v2883_v59 = vpop.f32.mrf.mxu0 }
 0xeba   :  { %v4724_v48 = vpop.f32.mrf.mxu0 }
 0xebc   :  { %v2886_v1 = vpop.f32.mrf.mxu0 }
 0xece   :  { %v4739_v47 = vpop.f32.mrf.mxu0 }
 0xed0   :  { %v2931_v13 = vpop.f32.mrf.mxu0 }
 0xed1   :  { %5096 = vrcp.f32 %v2931_v13 }
 0xed2   :  { %v4740_v14 = vpop.f32.mrf.mxu0 }
 0xed4   :  { %v2934_v4 = vpop.f32.mrf.mxu0 }
 0xed5   :  { %5098 = vrcp.f32 %v2934_v4 }
 0xed6   :  { %5100 = vrcp.f32 %v4739_v47 }
 0xede   :  { %v5097_v46 = vpop.eup %5096 }
 0xedf   :  { %v2948_v15 = vmul.f32 %v5097_v46, %v2883_v59 }
 0xee2   :  { %v5099_v19 = vpop.eup %5098 }
 0xee3   :  { %v2949_v45 = vmul.f32 %v5099_v19, %v2886_v1  ;;  %v5101_v25 = vpop.eup %5100 }
 0xee4   :  { %v2950_v22 = vmul.f32 %v5101_v25, %v4723_v6  ;;  %v4972_v25 = vld [vmem:[%s6602_s12 + $0x70] ss:$8 sps:$4 sm:$0xff]  }
 0xee5   :  { %v3207_v39 = vpack.c.bf16 %v2949_v45, %v2948_v15 }
 0xee6   :  { %v4771_v11 = vpop.f32.mrf.mxu0 }
 0xee7   :  { %4798 = vmatmul.mubr.msk.bf16.vlgmr.msra.gmra.mxu1 %vm1025_vm3, %v3207_v39 }
 0xee8   :  { %v3139_v51 = vpop.f32.mrf.mxu0  ;;  %4801 = vmatprep.mubr.msk.bf16.mxu1 %vm5157_vm1, %v5156_v33 }
 0xeea   :  { %v4772_v43 = vpop.f32.mrf.mxu0 }
 0xeec   :  { %v3142_v18 = vpop.f32.mrf.mxu0 }
 0xefe   :  { %v4787_v2 = vpop.f32.mrf.mxu0 }
 0xf00   :  { %v3187_v57 = vpop.f32.mrf.mxu0 }
 0xf01   :  { %5102 = vrcp.f32 %v3187_v57 }
 0xf02   :  { %v4788_v58 = vpop.f32.mrf.mxu0 }
 0xf04   :  { %v3190_v53 = vpop.f32.mrf.mxu0 }
 0xf05   :  { %5104 = vrcp.f32 %v3190_v53  ;;  %v4974_v53 = vld [vmem:[%s6602_s12 + $0x74] ss:$8 sps:$4 sm:$0xff]  }
 0xf06   :  { %5106 = vrcp.f32 %v4787_v2  ;;  %3525 = vmatprep.subr.bf16.mxu0 %v4974_v53 }
 0xf07   :  { %3526 = vmatpush1.bf16.msra.mxu0 %v4972_v25 }
 0xf0e   :  { %v5103_v30 = vpop.eup %5102 }
 0xf0f   :  { %v3204_v49 = vmul.f32 %v5103_v30, %v3139_v51  ;;  %v4977_v30 = vld [vmem:[%s6602_s12 + $0x64] ss:$8 sps:$4 sm:$0xff]  }
 0xf10   :  { %3527 = vmatprep.subr.bf16.mxu0 %v4977_v30 }
 0xf11   :  { %v3208_v17 = vpack.c.bf16 %v3204_v49, %v2950_v22  ;;  %v4975_v22 = vld [vmem:[%s6602_s12 + $0x60] ss:$8 sps:$4 sm:$0xff]   ;;  %v4980_v49 = vld [vmem:[%s6602_s12 + $0x54] ss:$8 sps:$4 sm:$0xff]  }
 0xf12   :  { %v5105_v56 = vpop.eup %5104  ;;  %3528 = vmatpush1.bf16.msra.mxu0 %v4975_v22 }
 0xf13   :  { %4802 = vmatmul.mubr.msk.bf16.gmra.mxu1 %vm1025_vm3, %v3208_v17  ;;  %v5107_v3 = vpop.eup %5106  ;;  %v3205_v63 = vmul.f32 %v5105_v56, %v3142_v18  ;;  %v4978_v17 = vld [vmem:[%s6602_s12 + $0x50] ss:$8 sps:$4 sm:$0xff]   ;;  %3529 = vmatprep.subr.bf16.mxu0 %v4980_v49  ;;  %v4983_v56 = vld [vmem:[%s6602_s12 + $0x44] ss:$8 sps:$4 sm:$0xff]  }
 0xf14   :  { %4805 = vmatprep.mubr.msk.bf16.mxu1 %vm5157_vm1, %v5156_v33  ;;  %v3206_v34 = vmul.f32 %v5107_v3, %v4771_v11  ;;  %v4981_v3 = vld [vmem:[%s6602_s12 + $0x40] ss:$8 sps:$4 sm:$0xff]  }
 0xf16   :  { %v3209_v16 = vpack.c.bf16 %v3206_v34, %v3205_v63  ;;  %3530 = vmatpush1.bf16.msra.mxu0 %v4978_v17 }
 0xf17   :  { %3531 = vmatprep.subr.bf16.mxu0 %v4983_v56 }
 0xf1a   :  { %3532 = vmatpush1.bf16.msra.mxu0 %v4981_v3 }
 0xf1b   :  { %4806 = vmatmul.mubr.msk.bf16.gmra.mxu1 %vm1025_vm3, %v3209_v16 }
 0xfa7   :  { %v3294_v38 = vpop.f32.mrf.mxu1 }
 0xfa8   :  { %v3295_v32 = vadd.f32 %v4213_v40, %v3294_v38 }
 0xfa9   :  { %v4799_v37 = vpop.f32.mrf.mxu1 }
 0xfaa   :  { %v3325_v42 = vmul.f32 %v4222_v60, %v3295_v32 }
 0xfab   :  { %v3297_v10 = vpop.f32.mrf.mxu1 }
 0xfac   :  { %v6397_v33 = vadd.f32 %v3325_v42, %v6069_v28  ;;  %v3298_v54 = vadd.f32 %v4213_v40, %v3297_v10 }
 0xfad   :  { %v4800_v31 = vpop.f32.mrf.mxu1 }
 0xfae   :  { %v3326_v8 = vmul.f32 %v4222_v60, %v3298_v54  ;;  %v3341_v52 = vsel %vm1025_vm3, %v6397_v33, 0.0 }
 0xfaf   :  { %3342 = vadd.xlane.f32.xlu0 %v3341_v52 }
 0xfb0   :  { %v6402_v50 = vadd.f32 %v3326_v8, %v6074_v29 }
 0xfb2   :  { %v3344_v55 = vsel %vm1025_vm3, %v6402_v50, 0.0 }
 0xfb3   :  { %3345 = vadd.xlane.f32.xlu1 %v3344_v55 }
 0xfd3   :  { %v3302_v20 = vpop.f32.mrf.mxu1 }
 0xfd4   :  { %v3303_v36 = vadd.f32 %v4213_v40, %v3302_v20 }
 0xfd5   :  { %v4803_v21 = vpop.f32.mrf.mxu1 }
 0xfd6   :  { %v3327_v9 = vmul.f32 %v4222_v60, %v3303_v36 }
 0xfd7   :  { %v3305_v28 = vpop.f32.mrf.mxu1 }
 0xfd8   :  { %v6407_v61 = vadd.f32 %v3327_v9, %v6084_v41  ;;  %v3306_v62 = vadd.f32 %v4213_v40, %v3305_v28 }
 0xfd9   :  { %v4804_v0 = vpop.f32.mrf.mxu1 }
 0xfda   :  { %v3328_v5 = vmul.f32 %v4222_v60, %v3306_v62  ;;  %v3347_v6 = vsel %vm1025_vm3, %v6407_v61, 0.0 }
 0xfdb   :  { %3348 = vadd.xlane.f32.xlu0 %v3347_v6  ;;  %v3310_v29 = vpop.f32.mrf.mxu1 }
 0xfdc   :  { %v6412_v59 = vadd.f32 %v3328_v5, %v6089_v23  ;;  %v3311_v48 = vadd.f32 %v4213_v40, %v3310_v29 }
 0xfdd   :  { %v4807_v1 = vpop.f32.mrf.mxu1 }
 0xfde   :  { %v3329_v47 = vmul.f32 %v4222_v60, %v3311_v48  ;;  %v3350_v13 = vsel %vm1025_vm3, %v6412_v59, 0.0 }
 0xfdf   :  { %3351 = vadd.xlane.f32.xlu1 %v3350_v13  ;;  %v3313_v41 = vpop.f32.mrf.mxu1  ;;  %v4225_v13 = vld [vmem:[%s6603_s10 + $0x1] ss:$0 sm:$0xff] }
 0xfe0   :  { %v6417_v14 = vadd.f32 %v3329_v47, %v6095_v26  ;;  %v3314_v4 = vadd.f32 %v4213_v40, %v3313_v41 }
 0xfe1   :  { %v4808_v46 = vpop.f32.mrf.mxu1 }
 0xfe2   :  { %v3330_v19 = vmul.f32 %v4222_v60, %v3314_v4  ;;  %v3353_v15 = vsel %vm1025_vm3, %v6417_v14, 0.0 }
 0xfe3   :  { %3354 = vadd.xlane.f32.xlu0 %v3353_v15 }
 0xfe4   :  { %v6422_v23 = vadd.f32 %v3330_v19, %v6104_v35  ;;  %v4226_v19 = vld [vmem:[%s6604_s11 + $0x1] ss:$0 sm:$0xff] }
 0xfe6   :  { %v3356_v45 = vsel %vm1025_vm3, %v6422_v23, 0.0 }
 0xfe7   :  { %3357 = vadd.xlane.f32.xlu1 %v3356_v45 }
0x1038   :  { %v3343_v39 = vpop.xlane.xlu0 %3342 }
0x1039   :  { %v3359_v11 = vmul.f32 0.015625, %v3343_v39 }
0x103b   :  { %v3365_v51 = vsub.f32 %v6397_v33, %v3359_v11 }
0x103c   :  { %v3346_v26 = vpop.xlane.xlu1 %3345 }
0x103d   :  { %v3360_v43 = vmul.f32 0.015625, %v3346_v26  ;;  %v3371_v18 = vmul.f32 %v3365_v51, %v3365_v51 }
0x103f   :  { %v3366_v2 = vsub.f32 %v6402_v50, %v3360_v43  ;;  %v3377_v57 = vsel %vm1025_vm3, %v3371_v18, 0.0 }
0x1040   :  { %3378 = vadd.xlane.f32.xlu0 %v3377_v57 }
0x1041   :  { %v3372_v58 = vmul.f32 %v3366_v2, %v3366_v2 }
0x1043   :  { %v3380_v35 = vsel %vm1025_vm3, %v3372_v58, 0.0 }
0x1044   :  { %3381 = vadd.xlane.f32.xlu1 %v3380_v35 }
0x1064   :  { %v3349_v63 = vpop.xlane.xlu0 %3348 }
0x1065   :  { %v3361_v34 = vmul.f32 0.015625, %v3349_v63 }
0x1067   :  { %v3367_v16 = vsub.f32 %v6407_v61, %v3361_v34 }
0x1068   :  { %v3352_v40 = vpop.xlane.xlu1 %3351 }
0x1069   :  { %v3362_v38 = vmul.f32 0.015625, %v3352_v40  ;;  %v3373_v60 = vmul.f32 %v3367_v16, %v3367_v16 }
0x106b   :  { %v3368_v32 = vsub.f32 %v6412_v59, %v3362_v38  ;;  %v3383_v37 = vsel %vm1025_vm3, %v3373_v60, 0.0 }
0x106c   :  { %3384 = vadd.xlane.f32.xlu0 %v3383_v37  ;;  %v3355_v42 = vpop.xlane.xlu0 %3354 }
0x106d   :  { %v3363_v10 = vmul.f32 0.015625, %v3355_v42  ;;  %v3374_v54 = vmul.f32 %v3368_v32, %v3368_v32 }
0x106f   :  { %v3369_v31 = vsub.f32 %v6417_v14, %v3363_v10  ;;  %v3386_v8 = vsel %vm1025_vm3, %v3374_v54, 0.0 }
0x1070   :  { %3387 = vadd.xlane.f32.xlu1 %v3386_v8  ;;  %v3358_v52 = vpop.xlane.xlu1 %3357 }
0x1071   :  { %v3364_v55 = vmul.f32 0.015625, %v3358_v52  ;;  %v3375_v20 = vmul.f32 %v3369_v31, %v3369_v31 }
0x1073   :  { %v3370_v36 = vsub.f32 %v6422_v23, %v3364_v55  ;;  %v3389_v21 = vsel %vm1025_vm3, %v3375_v20, 0.0 }
0x1074   :  { %3390 = vadd.xlane.f32.xlu0 %v3389_v21  ;;  %v4988_v21 = vld [vmem:[%s6605_s14 + $0xe8] sm:$0xff]  }
0x1075   :  { %v3376_v9 = vmul.f32 %v3370_v36, %v3370_v36 }
0x1077   :  { %v3392_v28 = vsel %vm1025_vm3, %v3376_v9, 0.0  ;;  %v4989_v9 = vld [vmem:[%s6605_s14 + $0xa8] sm:$0xff]  }
0x1078   :  { %3393 = vadd.xlane.f32.xlu1 %v3392_v28  ;;  %v4990_v28 = vld [vmem:[%s6605_s14 + $0xe0] sm:$0xff]  }
0x10c9   :  { %v3379_v62 = vpop.xlane.xlu0 %3378 }
0x10ca   :  { %v3395_v0 = vmul.f32 0.015625, %v3379_v62  ;;  %v4991_v62 = vld [vmem:[%s6605_s14 + $0xa0] sm:$0xff]  }
0x10cc   :  { %v3401_v5 = vadd.f32 1e-06, %v3395_v0  ;;  %v4992_v0 = vld [vmem:[%s6605_s14 + $0xd8] sm:$0xff]  }
0x10cd   :  { %v3382_v6 = vpop.xlane.xlu1 %3381 }
0x10ce   :  { %5108 = vrsqrt.f32 %v3401_v5  ;;  %v3396_v29 = vmul.f32 0.015625, %v3382_v6  ;;  %v4993_v5 = vld [vmem:[%s6605_s14 + $0x98] sm:$0xff]   ;;  %v4994_v6 = vld [vmem:[%s6605_s14 + $0xd0] sm:$0xff]  }
0x10d0   :  { %v3402_v48 = vadd.f32 1e-06, %v3396_v29  ;;  %v4995_v29 = vld [vmem:[%s6605_s14 + $0x90] sm:$0xff]  }
0x10d2   :  { %5110 = vrsqrt.f32 %v3402_v48  ;;  %v4996_v48 = vld [vmem:[%s6605_s14 + $0xc8] sm:$0xff]  }
0x10db   :  { %v5109_v1 = vpop.eup %5108 }
0x10dc   :  { %v3413_v47 = vmul.f32 %v5109_v1, %v3365_v51  ;;  %v4997_v1 = vld [vmem:[%s6605_s14 + $0x88] sm:$0xff]  }
0x10de   :  { %v3425_v46 = vmul.f32 %v4225_v13, %v3413_v47  ;;  %v4998_v47 = vld [vmem:[%s6605_s14 + $0xc0] sm:$0xff]  }
0x10df   :  { %v5111_v41 = vpop.eup %5110 }
0x10e0   :  { %v3414_v4 = vmul.f32 %v5111_v41, %v3366_v2  ;;  %v3437_v45 = vadd.f32 %v4226_v19, %v3425_v46  ;;  %v4235_v41 = vld [vmem:[%s6606_s13 + $0x2] sm:$0x3] }
0x10e1   :  { %v6526_v46 = vrot.slane %v4235_v41, %v5630_v12 }
0x10e2   :  { %v3426_v15 = vmul.f32 %v4225_v13, %v3414_v4  ;;  %v3461_v4 = vrot.slane %v4235_v41, %v5621_v24 }
0x10e4   :  { %v3438_v39 = vadd.f32 %v4226_v19, %v3426_v15 }
0x10e6   :  { %v3443_v11 = vpack.c.bf16 %v3438_v39, %v3437_v45 }
0x10e8   :  { %4244 = vmatmul.mubr.msk.bf16.vlgmr.msra.gmra.mxu0 %vm1025_vm3, %v3443_v11 }
0x10e9   :  { %3559 = vmatprep.mubr.bf16.mxu0 %v5158_v44 }
0x10f5   :  { %v3385_v51 = vpop.xlane.xlu0 %3384 }
0x10f6   :  { %v3397_v26 = vmul.f32 0.015625, %v3385_v51 }
0x10f8   :  { %v3403_v43 = vadd.f32 1e-06, %v3397_v26 }
0x10f9   :  { %v3388_v18 = vpop.xlane.xlu1 %3387 }
0x10fa   :  { %5112 = vrsqrt.f32 %v3403_v43  ;;  %v3398_v57 = vmul.f32 0.015625, %v3388_v18 }
0x10fc   :  { %v3404_v2 = vadd.f32 1e-06, %v3398_v57 }
0x10fd   :  { %v3391_v58 = vpop.xlane.xlu0 %3390 }
0x10fe   :  { %5114 = vrsqrt.f32 %v3404_v2  ;;  %v3399_v35 = vmul.f32 0.015625, %v3391_v58 }
0x1100   :  { %v3405_v53 = vadd.f32 1e-06, %v3399_v35 }
0x1101   :  { %v3394_v25 = vpop.xlane.xlu1 %3393 }
0x1102   :  { %5116 = vrsqrt.f32 %v3405_v53  ;;  %v3400_v30 = vmul.f32 0.015625, %v3394_v25 }
0x1104   :  { %v3406_v22 = vadd.f32 1e-06, %v3400_v30 }
0x1106   :  { %5118 = vrsqrt.f32 %v3406_v22 }
0x1107   :  { %v5113_v49 = vpop.eup %5112 }
0x1108   :  { %v3415_v17 = vmul.f32 %v5113_v49, %v3367_v16 }
0x110a   :  { %v3427_v63 = vmul.f32 %v4225_v13, %v3415_v17 }
0x110b   :  { %v5115_v56 = vpop.eup %5114 }
0x110c   :  { %v3416_v3 = vmul.f32 %v5115_v56, %v3368_v32  ;;  %v3439_v38 = vadd.f32 %v4226_v19, %v3427_v63  ;;  %v4984_v32 = vld [vmem:[%s6605_s14 + $0xf8] sm:$0xff]  }
0x110d   :  { %4521 = vmatprep.subr.bf16.mxu0 %v4984_v32  ;;  %4809 = vmatprep.subr.bf16.mxu1 %v4984_v32 }
0x110e   :  { %v3428_v34 = vmul.f32 %v4225_v13, %v3416_v3 }
0x110f   :  { %v5117_v40 = vpop.eup %5116 }
0x1110   :  { %v3440_v60 = vadd.f32 %v4226_v19, %v3428_v34  ;;  %v3417_v37 = vmul.f32 %v5117_v40, %v3369_v31  ;;  %v4985_v31 = vld [vmem:[%s6605_s14 + $0xb8] sm:$0xff]  }
0x1111   :  { %4522 = vmatpush3.bf16.msra.mxu0 %v4985_v31  ;;  %4817 = vmatpush3.bf16.msra.mxu1 %v4985_v31 }
0x1112   :  { %v3444_v42 = vpack.c.bf16 %v3440_v60, %v3439_v38  ;;  %v3429_v8 = vmul.f32 %v4225_v13, %v3417_v37 }
0x1113   :  { %v5119_v10 = vpop.eup %5118 }
0x1114   :  { %4245 = vmatmul.mubr.msk.bf16.gmra.mxu0 %vm1025_vm3, %v3444_v42  ;;  %v3418_v54 = vmul.f32 %v5119_v10, %v3370_v36  ;;  %v3441_v55 = vadd.f32 %v4226_v19, %v3429_v8  ;;  %v4987_v36 = vld [vmem:[%s6605_s14 + $0xb0] sm:$0xff]  }
0x1115   :  { %3569 = vmatprep.mubr.bf16.mxu0 %v5158_v44  ;;  %v4986_v44 = vld [vmem:[%s6605_s14 + $0xf0] sm:$0xff]  }
0x1116   :  { %v3430_v52 = vmul.f32 %v4225_v13, %v3418_v54  ;;  %4523 = vmatprep.subr.bf16.mxu0 %v4986_v44  ;;  %4810 = vmatprep.subr.bf16.mxu1 %v4986_v44  ;;  %v4999_v13 = vld [vmem:[%s6605_s14 + $0x80] sm:$0xff]  }
0x1117   :  { %4524 = vmatpush3.bf16.msra.mxu0 %v4987_v36  ;;  %4818 = vmatpush3.bf16.msra.mxu1 %v4987_v36 }
0x1118   :  { %v3442_v20 = vadd.f32 %v4226_v19, %v3430_v52  ;;  %4525 = vmatprep.subr.bf16.mxu0 %v4988_v21  ;;  %4811 = vmatprep.subr.bf16.mxu1 %v4988_v21 }
0x111a   :  { %v3445_v16 = vpack.c.bf16 %v3442_v20, %v3441_v55 }
0x111b   :  { %4526 = vmatpush3.bf16.msra.mxu0 %v4989_v9  ;;  %4819 = vmatpush3.bf16.msra.mxu1 %v4989_v9 }
0x111c   :  { %4246 = vmatmul.mubr.msk.bf16.gmra.mxu0 %vm1025_vm3, %v3445_v16  ;;  %4527 = vmatprep.subr.bf16.mxu0 %v4990_v28 }
0x111d   :  { %4812 = vmatprep.subr.bf16.mxu1 %v4990_v28 }
0x111f   :  { %4528 = vmatpush3.bf16.msra.mxu0 %v4991_v62  ;;  %4820 = vmatpush3.bf16.msra.mxu1 %v4991_v62 }
0x1120   :  { %4529 = vmatprep.subr.bf16.mxu0 %v4992_v0  ;;  %4813 = vmatprep.subr.bf16.mxu1 %v4992_v0 }
0x1123   :  { %4530 = vmatpush3.bf16.msra.mxu0 %v4993_v5  ;;  %4821 = vmatpush3.bf16.msra.mxu1 %v4993_v5 }
0x1124   :  { %4531 = vmatprep.subr.bf16.mxu0 %v4994_v6  ;;  %4814 = vmatprep.subr.bf16.mxu1 %v4994_v6 }
0x1127   :  { %4532 = vmatpush3.bf16.msra.mxu0 %v4995_v29  ;;  %4822 = vmatpush3.bf16.msra.mxu1 %v4995_v29 }
0x1128   :  { %4533 = vmatprep.subr.bf16.mxu0 %v4996_v48  ;;  %4815 = vmatprep.subr.bf16.mxu1 %v4996_v48 }
0x112b   :  { %4534 = vmatpush3.bf16.msra.mxu0 %v4997_v1  ;;  %4823 = vmatpush3.bf16.msra.mxu1 %v4997_v1 }
0x112c   :  { %4535 = vmatprep.subr.bf16.mxu0 %v4998_v47  ;;  %4816 = vmatprep.subr.bf16.mxu1 %v4998_v47 }
0x112f   :  { %4536 = vmatpush3.bf16.msra.mxu0 %v4999_v13  ;;  %4824 = vmatpush3.bf16.msra.mxu1 %v4999_v13 }
0x11a8   :  { %v3551_v19 = vpop.f32.mrf.mxu0 }
0x11a9   :  { %v3552_v15 = vadd.f32 %v3551_v19, %v3461_v4 }
0x11aa   :  { %v3553_v45 = vpop.f32.mrf.mxu0 }
0x11ab   :  { %v3554_v39 = vadd.f32 %v3553_v45, %v6526_v46  ;;  %v3592_v11 = vmul.f32 0.70710677, %v3552_v15  ;;  %v3580_v63 = vmul.f32 0.5, %v3552_v15 }
0x11ac   :  { %v3555_v51 = vpop.f32.mrf.mxu0 }
0x11ad   :  { %v3593_v26 = vmul.f32 0.70710677, %v3554_v39  ;;  %v3556_v43 = vadd.f32 %v3555_v51, %v3461_v4  ;;  %v3581_v17 = vmul.f32 0.5, %v3554_v39 }
0x11ae   :  { %v3557_v18 = vpop.f32.mrf.mxu0 }
0x11af   :  { %5120 = verf.f32 %v3593_v26  ;;  %v3594_v57 = vmul.f32 0.70710677, %v3556_v43  ;;  %v3558_v2 = vadd.f32 %v3557_v18, %v6526_v46  ;;  %v3582_v49 = vmul.f32 0.5, %v3556_v43 }
0x11b0   :  { %5122 = verf.f32 %v3592_v11 }
0x11b1   :  { %5124 = verf.f32 %v3594_v57  ;;  %v3595_v24 = vmul.f32 0.70710677, %v3558_v2  ;;  %v3583_v56 = vmul.f32 0.5, %v3558_v2 }
0x11b3   :  { %5126 = verf.f32 %v3595_v24 }
0x11bc   :  { %v5121_v12 = vpop.eup %5120 }
0x11bd   :  { %v5123_v58 = vpop.eup %5122  ;;  %v3617_v53 = vadd.f32 1.0, %v5121_v12 }
0x11be   :  { %v5125_v35 = vpop.eup %5124  ;;  %v3616_v22 = vadd.f32 1.0, %v5123_v58 }
0x11bf   :  { %v3618_v25 = vadd.f32 1.0, %v5125_v35  ;;  %v3629_v40 = vmul.f32 %v3617_v53, %v3581_v17 }
0x11c0   :  { %v5127_v30 = vpop.eup %5126  ;;  %v3628_v60 = vmul.f32 %v3616_v22, %v3580_v63 }
0x11c1   :  { %v3619_v3 = vadd.f32 1.0, %v5127_v30  ;;  %v3630_v34 = vmul.f32 %v3618_v25, %v3582_v49 }
0x11c3   :  { %v3631_v38 = vmul.f32 %v3619_v3, %v3583_v56  ;;  %v3640_v42 = vpack.c.bf16 %v3630_v34, %v3628_v60 }
0x11c5   :  { %v3641_v37 = vpack.c.bf16 %v3631_v38, %v3629_v40 }
0x11c7   :  { %3815 = vmatprep.mubr.bf16.mxu0 %v3641_v37 }
0x11c8   :  { %3816 = vmatmul.mubr.bf16.vlgmr.msra.gmra.mxu0 %v3640_v42 }
0x11d4   :  { %v3561_v10 = vpop.f32.mrf.mxu0 }
0x11d5   :  { %v3562_v54 = vadd.f32 %v3561_v10, %v3461_v4 }
0x11d6   :  { %v3563_v8 = vpop.f32.mrf.mxu0 }
0x11d7   :  { %v3564_v52 = vadd.f32 %v3563_v8, %v6526_v46  ;;  %v3596_v55 = vmul.f32 0.70710677, %v3562_v54  ;;  %v3584_v2 = vmul.f32 0.5, %v3562_v54 }
0x11d8   :  { %v3565_v20 = vpop.f32.mrf.mxu0 }
0x11d9   :  { %v3597_v16 = vmul.f32 0.70710677, %v3564_v52  ;;  %v3566_v32 = vadd.f32 %v3565_v20, %v3461_v4  ;;  %v3585_v18 = vmul.f32 0.5, %v3564_v52  ;;  %v4280_v20 = vld [vmem:[%s6607_s15 + $0x1] ss:$0 sm:$0xff] }
0x11da   :  { %v3567_v31 = vpop.f32.mrf.mxu0 }
0x11db   :  { %5128 = verf.f32 %v3597_v16  ;;  %v3598_v44 = vmul.f32 0.70710677, %v3566_v32  ;;  %v3568_v36 = vadd.f32 %v3567_v31, %v6526_v46  ;;  %v3586_v43 = vmul.f32 0.5, %v3566_v32 }
0x11dc   :  { %5130 = verf.f32 %v3596_v55  ;;  %v3571_v21 = vpop.f32.mrf.mxu0 }
0x11dd   :  { %5132 = verf.f32 %v3598_v44  ;;  %v3599_v9 = vmul.f32 0.70710677, %v3568_v36  ;;  %v3572_v28 = vadd.f32 %v3571_v21, %v3461_v4  ;;  %v3587_v57 = vmul.f32 0.5, %v3568_v36  ;;  %v4298_v44 = vld [vmem:[%s6608_s16 + $0x1] ss:$0 sm:$0xff] }
0x11de   :  { %v3573_v62 = vpop.f32.mrf.mxu0 }
0x11df   :  { %5134 = verf.f32 %v3599_v9  ;;  %v3574_v0 = vadd.f32 %v3573_v62, %v6526_v46  ;;  %v3600_v5 = vmul.f32 0.70710677, %v3572_v28  ;;  %v3588_v60 = vmul.f32 0.5, %v3572_v28 }
0x11e0   :  { %v3575_v6 = vpop.f32.mrf.mxu0 }
0x11e1   :  { %v3601_v29 = vmul.f32 0.70710677, %v3574_v0  ;;  %v3576_v48 = vadd.f32 %v3575_v6, %v3461_v4  ;;  %v3589_v34 = vmul.f32 0.5, %v3574_v0 }
0x11e2   :  { %v3577_v1 = vpop.f32.mrf.mxu0 }
0x11e3   :  { %5136 = verf.f32 %v3601_v29  ;;  %v3602_v47 = vmul.f32 0.70710677, %v3576_v48  ;;  %v3578_v13 = vadd.f32 %v3577_v1, %v6526_v46  ;;  %v3590_v63 = vmul.f32 0.5, %v3576_v48 }
0x11e4   :  { %5138 = verf.f32 %v3600_v5 }
0x11e5   :  { %5140 = verf.f32 %v3602_v47  ;;  %v3603_v41 = vmul.f32 0.70710677, %v3578_v13  ;;  %v3591_v40 = vmul.f32 0.5, %v3578_v13 }
0x11e7   :  { %5142 = verf.f32 %v3603_v41 }
0x11e8   :  { %v5129_v19 = vpop.eup %5128 }
0x11e9   :  { %v5131_v15 = vpop.eup %5130  ;;  %v3621_v39 = vadd.f32 1.0, %v5129_v19 }
0x11ea   :  { %v5133_v45 = vpop.eup %5132  ;;  %v3620_v26 = vadd.f32 1.0, %v5131_v15 }
0x11eb   :  { %v3622_v11 = vadd.f32 1.0, %v5133_v45  ;;  %v3633_v12 = vmul.f32 %v3621_v39, %v3585_v18 }
0x11ec   :  { %v5135_v51 = vpop.eup %5134  ;;  %v3632_v35 = vmul.f32 %v3620_v26, %v3584_v2 }
0x11ed   :  { %v3623_v4 = vadd.f32 1.0, %v5135_v51  ;;  %v3634_v24 = vmul.f32 %v3622_v11, %v3586_v43 }
0x11ef   :  { %v3635_v58 = vmul.f32 %v3623_v4, %v3587_v57  ;;  %v3642_v22 = vpack.c.bf16 %v3634_v24, %v3632_v35 }
0x11f0   :  { %v5137_v46 = vpop.eup %5136 }
0x11f1   :  { %v5139_v53 = vpop.eup %5138  ;;  %v3643_v25 = vpack.c.bf16 %v3635_v58, %v3633_v12  ;;  %v3625_v49 = vadd.f32 1.0, %v5137_v46 }
0x11f2   :  { %v5141_v30 = vpop.eup %5140  ;;  %v3624_v3 = vadd.f32 1.0, %v5139_v53 }
0x11f3   :  { %v3626_v17 = vadd.f32 1.0, %v5141_v30  ;;  %3823 = vmatprep.mubr.bf16.mxu1 %v3643_v25  ;;  %v3637_v42 = vmul.f32 %v3625_v49, %v3589_v34 }
0x11f4   :  { %v5143_v56 = vpop.eup %5142  ;;  %3824 = vmatmul.mubr.bf16.vlgmr.msra.gmra.mxu1 %v3642_v22  ;;  %v3636_v54 = vmul.f32 %v3624_v3, %v3588_v60 }
0x11f5   :  { %v3627_v38 = vadd.f32 1.0, %v5143_v56  ;;  %v3638_v37 = vmul.f32 %v3626_v17, %v3590_v63 }
0x11f7   :  { %v3639_v10 = vmul.f32 %v3627_v38, %v3591_v40  ;;  %v3644_v52 = vpack.c.bf16 %v3638_v37, %v3636_v54 }
0x11f9   :  { %v3645_v8 = vpack.c.bf16 %v3639_v10, %v3637_v42 }
0x11fb   :  { %3831 = vmatprep.mubr.bf16.mxu1 %v3645_v8 }
0x11fc   :  { %3832 = vmatmul.mubr.bf16.gmra.mxu1 %v3644_v52 }
0x1288   :  { %v4537_v55 = vpop.f32.mrf.mxu0 }
0x128a   :  { %v4538_v16 = vpop.f32.mrf.mxu0 }
0x128b   :  { %v4539_v32 = vadd.f32 %v4538_v16, %v4537_v55 }
0x128c   :  { %v4540_v31 = vpop.f32.mrf.mxu0 }
0x128d   :  { %v3818_v36 = vadd.f32 %v4539_v32, %v4280_v20 }
0x128e   :  { %v4541_v21 = vpop.f32.mrf.mxu0 }
0x128f   :  { %v4542_v9 = vadd.f32 %v4541_v21, %v4540_v31  ;;  %v3848_v28 = vmul.f32 %v4298_v44, %v3818_v36 }
0x1291   :  { %v3821_v62 = vadd.f32 %v4542_v9, %v4280_v20  ;;  %v3854_v0 = vadd.f32 %v3848_v28, %v6397_v33 }
0x1293   :  { %v3868_v5 = vsel %vm1025_vm3, %v3854_v0, 0.0  ;;  %v3849_v6 = vmul.f32 %v4298_v44, %v3821_v62 }
0x1294   :  { %3869 = vadd.xlane.f32.xlu0 %v3868_v5 }
0x1295   :  { %v3855_v29 = vadd.f32 %v3849_v6, %v6402_v50 }
0x1297   :  { %v3871_v48 = vsel %vm1025_vm3, %v3855_v29, 0.0 }
0x1298   :  { %3872 = vadd.xlane.f32.xlu1 %v3871_v48 }
0x12b4   :  { %v4543_v1 = vpop.f32.mrf.mxu1 }
0x12b6   :  { %v4544_v47 = vpop.f32.mrf.mxu1 }
0x12b7   :  { %v4545_v13 = vadd.f32 %v4544_v47, %v4543_v1 }
0x12b8   :  { %v4546_v41 = vpop.f32.mrf.mxu1 }
0x12b9   :  { %v3826_v19 = vadd.f32 %v4545_v13, %v4280_v20 }
0x12ba   :  { %v4547_v15 = vpop.f32.mrf.mxu1 }
0x12bb   :  { %v3850_v45 = vmul.f32 %v4298_v44, %v3826_v19  ;;  %v4548_v39 = vadd.f32 %v4547_v15, %v4546_v41  ;;  %v4299_v15 = vld [vmem:[%s6609_s17] ss:$0 sm:$0xff] }
0x12bc   :  { %v4549_v11 = vpop.f32.mrf.mxu1 }
0x12bd   :  { %v3829_v51 = vadd.f32 %v4548_v39, %v4280_v20  ;;  %v3856_v33 = vadd.f32 %v3850_v45, %v6407_v61  ;;  %v4300_v39 = vld [vmem:[%s6610_s18] ss:$0 sm:$0xff] }
0x12be   :  { %v4550_v26 = vpop.f32.mrf.mxu1 }
0x12bf   :  { %v3862_v43 = vmul.f32 %v6080_v27, %v3856_v33  ;;  %v3851_v18 = vmul.f32 %v4298_v44, %v3829_v51  ;;  %v4551_v57 = vadd.f32 %v4550_v26, %v4549_v11 }
0x12c0   :  { %v4552_v50 = vpop.f32.mrf.mxu1 }
0x12c1   :  { %v3874_v4 = vsel %vm1025_vm3, %v3862_v43, 0.0  ;;  %v3857_v2 = vadd.f32 %v3851_v18, %v6412_v59  ;;  %v3834_v58 = vadd.f32 %v4551_v57, %v4280_v20 }
0x12c2   :  { %3875 = vadd.xlane.f32.xlu0 %v3874_v4  ;;  %v4553_v24 = vpop.f32.mrf.mxu1 }
0x12c3   :  { %v4554_v12 = vadd.f32 %v4553_v24, %v4552_v50  ;;  %v3877_v35 = vsel %vm1025_vm3, %v3857_v2, 0.0  ;;  %v3852_v25 = vmul.f32 %v4298_v44, %v3834_v58 }
0x12c5   :  { %v3837_v46 = vadd.f32 %v4554_v12, %v4280_v20  ;;  %v3858_v49 = vadd.f32 %v3852_v25, %v6417_v14 }
0x12c6   :  { %3878 = vadd.xlane.f32.xlu0 %v3877_v35 }
0x12c7   :  { %v3853_v53 = vmul.f32 %v4298_v44, %v3837_v46  ;;  %v3880_v59 = vsel %vm1025_vm3, %v3858_v49, 0.0 }
0x12c9   :  { %v3859_v61 = vadd.f32 %v3853_v53, %v6422_v23 }
0x12cb   :  { %v3865_v30 = vmul.f32 %v6100_v7, %v3859_v61 }
0x12cd   :  { %v3883_v22 = vsel %vm1025_vm3, %v3865_v30, 0.0 }
0x12ce   :  { %3884 = vadd.xlane.f32.xlu1 %v3883_v22 }
0x12d2   :  { %3881 = vadd.xlane.f32.xlu1 %v3880_v59 }
0x131d   :  { %v3870_v17 = vpop.xlane.xlu0 %3869 }
0x131e   :  { %v3886_v56 = vmul.f32 0.015625, %v3870_v17 }
0x1320   :  { %v3892_v3 = vsub.f32 %v3854_v0, %v3886_v56 }
0x1321   :  { %v3873_v63 = vpop.xlane.xlu1 %3872 }
0x1322   :  { %v3887_v34 = vmul.f32 0.015625, %v3873_v63  ;;  %v3898_v40 = vmul.f32 %v3892_v3, %v3892_v3 }
0x1324   :  { %v3893_v38 = vsub.f32 %v3855_v29, %v3887_v34  ;;  %v3904_v23 = vsel %vm1025_vm3, %v3898_v40, 0.0 }
0x1325   :  { %3905 = vadd.xlane.f32.xlu0 %v3904_v23 }
0x1326   :  { %v3899_v60 = vmul.f32 %v3893_v38, %v3893_v38 }
0x1328   :  { %v3907_v37 = vsel %vm1025_vm3, %v3899_v60, 0.0 }
0x1329   :  { %3908 = vadd.xlane.f32.xlu1 %v3907_v37 }
0x134b   :  { %v3876_v42 = vpop.xlane.xlu0 %3875 }
0x134c   :  { %v3888_v14 = vmul.f32 0.015625, %v3876_v42 }
0x134e   :  { %v3894_v10 = vsub.f32 %v3862_v43, %v3888_v14 }
0x134f   :  { %v3879_v54 = vpop.xlane.xlu0 %3878 }
0x1350   :  { %v3889_v8 = vmul.f32 0.015625, %v3879_v54  ;;  %v3900_v52 = vmul.f32 %v3894_v10, %v3894_v10 }
0x1352   :  { %v3895_v55 = vsub.f32 %v3857_v2, %v3889_v8  ;;  %v3910_v20 = vsel %vm1025_vm3, %v3900_v52, 0.0 }
0x1353   :  { %3911 = vadd.xlane.f32.xlu0 %v3910_v20 }
0x1354   :  { %v3901_v16 = vmul.f32 %v3895_v55, %v3895_v55 }
0x1356   :  { %v3913_v32 = vsel %vm1025_vm3, %v3901_v16, 0.0 }
0x1357   :  { %3914 = vadd.xlane.f32.xlu0 %v3913_v32  ;;  %v3885_v31 = vpop.xlane.xlu1 %3884 }
0x1358   :  { %v3891_v44 = vmul.f32 0.015625, %v3885_v31 }
0x135a   :  { %v3897_v36 = vsub.f32 %v3865_v30, %v3891_v44 }
0x135b   :  { %v3882_v21 = vpop.xlane.xlu1 %3881 }
0x135c   :  { %v3890_v9 = vmul.f32 0.015625, %v3882_v21  ;;  %v3903_v28 = vmul.f32 %v3897_v36, %v3897_v36 }
0x135e   :  { %v3896_v62 = vsub.f32 %v3858_v49, %v3890_v9  ;;  %v3919_v0 = vsel %vm1025_vm3, %v3903_v28, 0.0 }
0x135f   :  { %3920 = vadd.xlane.f32.xlu1 %v3919_v0 }
0x1360   :  { %v3902_v5 = vmul.f32 %v3896_v62, %v3896_v62 }
0x1362   :  { %v3916_v6 = vsel %vm1025_vm3, %v3902_v5, 0.0 }
0x1363   :  { %3917 = vadd.xlane.f32.xlu1 %v3916_v6 }
0x13ae   :  { %v3906_v29 = vpop.xlane.xlu0 %3905 }
0x13af   :  { %v3922_v48 = vmul.f32 0.015625, %v3906_v29 }
0x13b1   :  { %v3928_v1 = vadd.f32 1e-06, %v3922_v48 }
0x13b2   :  { %v3909_v47 = vpop.xlane.xlu1 %3908 }
0x13b3   :  { %5144 = vrsqrt.f32 %v3928_v1  ;;  %v3923_v13 = vmul.f32 0.015625, %v3909_v47 }
0x13b5   :  { %v3929_v41 = vadd.f32 1e-06, %v3923_v13 }
0x13b7   :  { %5146 = vrsqrt.f32 %v3929_v41 }
0x13c0   :  { %v5145_v19 = vpop.eup %5144 }
0x13c1   :  { %v3940_v45 = vmul.f32 %v5145_v19, %v3892_v3 }
0x13c3   :  { %v3952_v11 = vmul.f32 %v4299_v15, %v3940_v45 }
0x13c4   :  { %v5147_v51 = vpop.eup %5146 }
0x13c5   :  { %v3964_v33 = vadd.f32 %v4300_v39, %v3952_v11  ;;  %v3941_v26 = vmul.f32 %v5147_v51, %v3893_v38 }
0x13c7   :  { %3976 = vst.msk [vmem:[%s6611_s19] sm:$0xff] %vm1025_vm3, %v3964_v33  ;;  %v3953_v43 = vmul.f32 %v4299_v15, %v3941_v26 }
0x13c9   :  { %v3965_v18 = vadd.f32 %v4300_v39, %v3953_v43 }
0x13cb   :  { %3977 = vst.msk [vmem:[%s6611_s19 + $0x8] sm:$0xff] %vm1025_vm3, %v3965_v18 }
0x13dc   :  { %v3912_v50 = vpop.xlane.xlu0 %3911 }
0x13dd   :  { %v3924_v57 = vmul.f32 0.015625, %v3912_v50 }
0x13df   :  { %v3930_v4 = vadd.f32 1e-06, %v3924_v57 }
0x13e0   :  { %v3915_v2 = vpop.xlane.xlu0 %3914 }
0x13e1   :  { %5148 = vrsqrt.f32 %v3930_v4  ;;  %v3925_v24 = vmul.f32 0.015625, %v3915_v2 }
0x13e3   :  { %v3931_v12 = vadd.f32 1e-06, %v3925_v24 }
0x13e5   :  { %5150 = vrsqrt.f32 %v3931_v12 }
0x13e8   :  { %v3921_v58 = vpop.xlane.xlu1 %3920 }
0x13e9   :  { %v3927_v46 = vmul.f32 0.015625, %v3921_v58 }
0x13eb   :  { %v3933_v35 = vadd.f32 1e-06, %v3927_v46 }
0x13ec   :  { %v3918_v53 = vpop.xlane.xlu1 %3917 }
0x13ed   :  { %5152 = vrsqrt.f32 %v3933_v35  ;;  %v3926_v61 = vmul.f32 0.015625, %v3918_v53 }
0x13ee   :  { %v5149_v25 = vpop.eup %5148 }
0x13ef   :  { %v3942_v30 = vmul.f32 %v5149_v25, %v3894_v10  ;;  %v3932_v22 = vadd.f32 1e-06, %v3926_v61 }
0x13f1   :  { %v3954_v49 = vmul.f32 %v4299_v15, %v3942_v30  ;;  %5154 = vrsqrt.f32 %v3932_v22 }
0x13f2   :  { %v5151_v59 = vpop.eup %5150 }
0x13f3   :  { %v3966_v17 = vadd.f32 %v4300_v39, %v3954_v49  ;;  %v3943_v56 = vmul.f32 %v5151_v59, %v3895_v55 }
0x13f5   :  { %v3972_v3 = vmul.f32 %v6080_v27, %v3966_v17  ;;  %v3955_v63 = vmul.f32 %v4299_v15, %v3943_v56 }
0x13f7   :  { %3978 = vst.msk [vmem:[%s6611_s19 + $0x10] sm:$0xff] %vm1025_vm3, %v3972_v3  ;;  %v3967_v34 = vadd.f32 %v4300_v39, %v3955_v63 }
0x13f9   :  { %3979 = vst.msk [vmem:[%s6611_s19 + $0x18] sm:$0xff] %vm1025_vm3, %v3967_v34 }
0x13fa   :  { %v5153_v40 = vpop.eup %5152 }
0x13fb   :  { %v3945_v38 = vmul.f32 %v5153_v40, %v3897_v36 }
0x13fd   :  { %v3957_v23 = vmul.f32 %v4299_v15, %v3945_v38 }
0x13fe   :  { %v5155_v60 = vpop.eup %5154 }
0x13ff   :  { %v3969_v37 = vadd.f32 %v4300_v39, %v3957_v23  ;;  %v3944_v42 = vmul.f32 %v5155_v60, %v3896_v62 }
0x1401   :  { %v3975_v27 = vmul.f32 %v6100_v7, %v3969_v37  ;;  %v3956_v14 = vmul.f32 %v4299_v15, %v3944_v42 }
0x1403   :  { %3981 = vst.msk [vmem:[%s6611_s19 + $0x28] sm:$0xff] %vm1025_vm3, %v3975_v27  ;;  %v3968_v10 = vadd.f32 %v4300_v39, %v3956_v14 }
0x1405   :  { %3980 = vst.msk [vmem:[%s6611_s19 + $0x20] sm:$0xff] %vm1025_vm3, %v3968_v10 }

// kernel: dino2seg_forward.3
= control target key start
LH: loop header
LB: loop body
LE: loop exit
PB: predicated region body
PF: predicated region fallthrough
CT: control target
= control target key end

     0   :  { %s1470_s12 = smov 0   ;;  %s1472_s13 = smov 0   ;;  %s1779_s0 = inlined_call_operand.vmem [shape: bf16[16,576], index: 0, kind: input, shape index: {}]   ;;  %s1780_s1 = inlined_call_operand.vmem [shape: bf16[576,512], index: 1, kind: input, shape index: {}]   ;;  %s1781_s2 = inlined_call_operand.vmem [shape: f32[16,1], index: 2, kind: input, shape index: {}]   ;;  %s1782_s3 = inlined_call_operand.vmem [shape: f32[16,512], index: 3, kind: output, shape index: {}]  }
   0x1   :  { %s1474_s14 = smov 0  }
   0x2 LB: > { %s1189_s15 = sadd.s32 4294967295, %s1447_s14   ;;  %s1487_s16 = sadd.s32 1, %s1447_s14   ;;  %s1447_s14 = sphi %s1474_s14, %s1786_s14   ;;  %s1443_s13 = sphi %s1472_s13, %s1785_s13   ;;  %s1439_s12 = sphi %s1470_s12, %s1784_s12  }
   0x3   : > { %s38_s17 = ssub.s32 %s1447_s14, %s1487_s16  ;;  %s41_s18 = sadd.s32 1, %s1443_s13 }
   0x4   : > { %p39_p0 = scmp.eq.s32.totalorder %s38_s17, 0  ;;  %p48_p1 = scmp.ne.s32.totalorder %s1443_s13, %s1439_s12 }
   0x5   : > { %p49_p2 = scmp.eq.s32.totalorder %s1447_s14, 0  ;;  %p99_p3 = scmp.eq.s32.totalorder %s1189_s15, 1 }
   0x6   : > { %s1498_s19 = scalar_select %p39_p0, %s1443_s13, %s41_s18  }
   0x7   : > { %p50_p4 = por %p49_p2, %p48_p1  ;;  %p1500_p5 = por %p99_p3, %p48_p1 }
   0x8   : > { %p1192_p6 = scmp.ge.s32.totalorder %s1447_s14, 2 }
   0xa   : > { %127 = sbr.rel (%p1192_p6) target bundleno = 55 (0x37), region = 24 }
   0xf   : > { %130 = sbr.rel (!%p50_p4) target bundleno = 55 (0x37), region = 28  ;;  %s132_s21 = sand.u32 (%p50_p4), 1, %s1443_s13  }
  0x10   : > { %s1280_s22 = sshll.u32 (%p50_p4), %s1447_s14, 3  ;;  %s1282_s23 = smul.u32 (%p50_p4), 576, %s132_s21 }
  0x11   : > { %s1510_s26 = scalar_lea.vmem (%p50_p4), %s1780_s1, %s1280_s22 }
  0x12   : > { %v308_v0 = vld [vmem:[%s1510_s26] sm:$0xff] (%p50_p4)  ;;  %v310_v1 = vld [vmem:[%s1510_s26 + $0x10] sm:$0xff] (%p50_p4)  ;;  %s1518_s27 = scalar_lea.vmem (%p50_p4), [#allocation2], %s1282_s23 }
  0x13   : > { %v312_v2 = vld [vmem:[%s1510_s26 + $0x20] sm:$0xff] (%p50_p4)  ;;  %v314_v3 = vld [vmem:[%s1510_s26 + $0x30] sm:$0xff] (%p50_p4)  ;;  %309 = vst [vmem:[%s1518_s27] sm:$0xff] (%p50_p4), %v308_v0  ;;  %311 = vst [vmem:[%s1518_s27 + $0x8] sm:$0xff] (%p50_p4), %v310_v1 }
  0x14   : > { %v316_v4 = vld [vmem:[%s1510_s26 + $0x40] sm:$0xff]  ;;  %v318_v5 = vld [vmem:[%s1510_s26 + $0x50] sm:$0xff]  ;;  %313 = vst [vmem:[%s1518_s27 + $0x10] sm:$0xff] %v312_v2  ;;  %315 = vst [vmem:[%s1518_s27 + $0x18] sm:$0xff] %v314_v3 }
  0x15   : > { %317 = vst [vmem:[%s1518_s27 + $0x20] sm:$0xff] %v316_v4  ;;  %319 = vst [vmem:[%s1518_s27 + $0x28] sm:$0xff] %v318_v5  ;;  %v320_v6 = vld [vmem:[%s1510_s26 + $0x60] sm:$0xff]  ;;  %v322_v7 = vld [vmem:[%s1510_s26 + $0x70] sm:$0xff] }
  0x16   : > { %v324_v8 = vld [vmem:[%s1510_s26 + $0x80] sm:$0xff]  ;;  %321 = vst [vmem:[%s1518_s27 + $0x30] sm:$0xff] %v320_v6  ;;  %323 = vst [vmem:[%s1518_s27 + $0x38] sm:$0xff] %v322_v7  ;;  %v326_v9 = vld [vmem:[%s1510_s26 + $0x90] sm:$0xff] }
  0x17   : > { %325 = vst [vmem:[%s1518_s27 + $0x40] sm:$0xff] %v324_v8  ;;  %v328_v10 = vld [vmem:[%s1510_s26 + $0xa0] sm:$0xff]  ;;  %v330_v11 = vld [vmem:[%s1510_s26 + $0xb0] sm:$0xff]  ;;  %327 = vst [vmem:[%s1518_s27 + $0x48] sm:$0xff] %v326_v9 }
  0x18   : > { %329 = vst [vmem:[%s1518_s27 + $0x50] sm:$0xff] %v328_v10  ;;  %331 = vst [vmem:[%s1518_s27 + $0x58] sm:$0xff] %v330_v11  ;;  %v332_v12 = vld [vmem:[%s1510_s26 + $0xc0] sm:$0xff]  ;;  %v334_v13 = vld [vmem:[%s1510_s26 + $0xd0] sm:$0xff] }
  0x19   : > { %v336_v14 = vld [vmem:[%s1510_s26 + $0xe0] sm:$0xff]  ;;  %333 = vst [vmem:[%s1518_s27 + $0x60] sm:$0xff] %v332_v12  ;;  %335 = vst [vmem:[%s1518_s27 + $0x68] sm:$0xff] %v334_v13  ;;  %v338_v15 = vld [vmem:[%s1510_s26 + $0xf0] sm:$0xff] }
  0x1a   : > { %337 = vst [vmem:[%s1518_s27 + $0x70] sm:$0xff] %v336_v14  ;;  %v340_v16 = vld [vmem:[%s1510_s26 + $0x100] sm:$0xff]  ;;  %v342_v17 = vld [vmem:[%s1510_s26 + $0x110] sm:$0xff]  ;;  %339 = vst [vmem:[%s1518_s27 + $0x78] sm:$0xff] %v338_v15 }
  0x1b   : > { %341 = vst [vmem:[%s1518_s27 + $0x80] sm:$0xff] %v340_v16  ;;  %343 = vst [vmem:[%s1518_s27 + $0x88] sm:$0xff] %v342_v17  ;;  %v344_v18 = vld [vmem:[%s1510_s26 + $0x120] sm:$0xff]  ;;  %v346_v19 = vld [vmem:[%s1510_s26 + $0x130] sm:$0xff] }
  0x1c   : > { %v348_v20 = vld [vmem:[%s1510_s26 + $0x140] sm:$0xff]  ;;  %345 = vst [vmem:[%s1518_s27 + $0x90] sm:$0xff] %v344_v18  ;;  %347 = vst [vmem:[%s1518_s27 + $0x98] sm:$0xff] %v346_v19  ;;  %v350_v21 = vld [vmem:[%s1510_s26 + $0x150] sm:$0xff] }
  0x1d   : > { %349 = vst [vmem:[%s1518_s27 + $0xa0] sm:$0xff] %v348_v20  ;;  %v352_v22 = vld [vmem:[%s1510_s26 + $0x160] sm:$0xff]  ;;  %v354_v23 = vld [vmem:[%s1510_s26 + $0x170] sm:$0xff]  ;;  %351 = vst [vmem:[%s1518_s27 + $0xa8] sm:$0xff] %v350_v21 }
  0x1e   : > { %353 = vst [vmem:[%s1518_s27 + $0xb0] sm:$0xff] %v352_v22  ;;  %355 = vst [vmem:[%s1518_s27 + $0xb8] sm:$0xff] %v354_v23  ;;  %v356_v24 = vld [vmem:[%s1510_s26 + $0x180] sm:$0xff]  ;;  %v358_v25 = vld [vmem:[%s1510_s26 + $0x190] sm:$0xff] }
  0x1f   : > { %v360_v26 = vld [vmem:[%s1510_s26 + $0x1a0] sm:$0xff]  ;;  %357 = vst [vmem:[%s1518_s27 + $0xc0] sm:$0xff] %v356_v24  ;;  %359 = vst [vmem:[%s1518_s27 + $0xc8] sm:$0xff] %v358_v25  ;;  %v362_v27 = vld [vmem:[%s1510_s26 + $0x1b0] sm:$0xff] }
  0x20   : > { %361 = vst [vmem:[%s1518_s27 + $0xd0] sm:$0xff] %v360_v26  ;;  %v364_v28 = vld [vmem:[%s1510_s26 + $0x1c0] sm:$0xff]  ;;  %v366_v29 = vld [vmem:[%s1510_s26 + $0x1d0] sm:$0xff]  ;;  %363 = vst [vmem:[%s1518_s27 + $0xd8] sm:$0xff] %v362_v27 }
  0x21   : > { %365 = vst [vmem:[%s1518_s27 + $0xe0] sm:$0xff] %v364_v28  ;;  %367 = vst [vmem:[%s1518_s27 + $0xe8] sm:$0xff] %v366_v29  ;;  %v368_v30 = vld [vmem:[%s1510_s26 + $0x1e0] sm:$0xff]  ;;  %v370_v31 = vld [vmem:[%s1510_s26 + $0x1f0] sm:$0xff] }
  0x22   : > { %v372_v32 = vld [vmem:[%s1510_s26 + $0x200] sm:$0xff]  ;;  %369 = vst [vmem:[%s1518_s27 + $0xf0] sm:$0xff] %v368_v30  ;;  %371 = vst [vmem:[%s1518_s27 + $0xf8] sm:$0xff] %v370_v31  ;;  %v374_v33 = vld [vmem:[%s1510_s26 + $0x210] sm:$0xff] }
  0x23   : > { %373 = vst [vmem:[%s1518_s27 + $0x100] sm:$0xff] %v372_v32  ;;  %v376_v34 = vld [vmem:[%s1510_s26 + $0x220] sm:$0xff]  ;;  %v378_v35 = vld [vmem:[%s1510_s26 + $0x230] sm:$0xff]  ;;  %375 = vst [vmem:[%s1518_s27 + $0x108] sm:$0xff] %v374_v33 }
  0x24   : > { %377 = vst [vmem:[%s1518_s27 + $0x110] sm:$0xff] %v376_v34  ;;  %379 = vst [vmem:[%s1518_s27 + $0x118] sm:$0xff] %v378_v35  ;;  %v380_v36 = vld [vmem:[%s1510_s26 + $0x240] sm:$0xff]  ;;  %v382_v37 = vld [vmem:[%s1510_s26 + $0x250] sm:$0xff] }
  0x25   : > { %v384_v38 = vld [vmem:[%s1510_s26 + $0x260] sm:$0xff]  ;;  %381 = vst [vmem:[%s1518_s27 + $0x120] sm:$0xff] %v380_v36  ;;  %383 = vst [vmem:[%s1518_s27 + $0x128] sm:$0xff] %v382_v37  ;;  %v386_v39 = vld [vmem:[%s1510_s26 + $0x270] sm:$0xff] }
  0x26   : > { %385 = vst [vmem:[%s1518_s27 + $0x130] sm:$0xff] %v384_v38  ;;  %v388_v40 = vld [vmem:[%s1510_s26 + $0x280] sm:$0xff]  ;;  %v390_v41 = vld [vmem:[%s1510_s26 + $0x290] sm:$0xff]  ;;  %387 = vst [vmem:[%s1518_s27 + $0x138] sm:$0xff] %v386_v39 }
  0x27   : > { %389 = vst [vmem:[%s1518_s27 + $0x140] sm:$0xff] %v388_v40  ;;  %391 = vst [vmem:[%s1518_s27 + $0x148] sm:$0xff] %v390_v41  ;;  %v392_v42 = vld [vmem:[%s1510_s26 + $0x2a0] sm:$0xff]  ;;  %v394_v43 = vld [vmem:[%s1510_s26 + $0x2b0] sm:$0xff] }
  0x28   : > { %v396_v44 = vld [vmem:[%s1510_s26 + $0x2c0] sm:$0xff]  ;;  %393 = vst [vmem:[%s1518_s27 + $0x150] sm:$0xff] %v392_v42  ;;  %395 = vst [vmem:[%s1518_s27 + $0x158] sm:$0xff] %v394_v43  ;;  %v398_v45 = vld [vmem:[%s1510_s26 + $0x2d0] sm:$0xff] }
  0x29   : > { %397 = vst [vmem:[%s1518_s27 + $0x160] sm:$0xff] %v396_v44  ;;  %v400_v46 = vld [vmem:[%s1510_s26 + $0x2e0] sm:$0xff]  ;;  %v402_v47 = vld [vmem:[%s1510_s26 + $0x2f0] sm:$0xff]  ;;  %399 = vst [vmem:[%s1518_s27 + $0x168] sm:$0xff] %v398_v45 }
  0x2a   : > { %401 = vst [vmem:[%s1518_s27 + $0x170] sm:$0xff] %v400_v46  ;;  %403 = vst [vmem:[%s1518_s27 + $0x178] sm:$0xff] %v402_v47  ;;  %v404_v48 = vld [vmem:[%s1510_s26 + $0x300] sm:$0xff]  ;;  %v406_v49 = vld [vmem:[%s1510_s26 + $0x310] sm:$0xff] }
  0x2b   : > { %v408_v50 = vld [vmem:[%s1510_s26 + $0x320] sm:$0xff]  ;;  %405 = vst [vmem:[%s1518_s27 + $0x180] sm:$0xff] %v404_v48  ;;  %407 = vst [vmem:[%s1518_s27 + $0x188] sm:$0xff] %v406_v49  ;;  %v410_v51 = vld [vmem:[%s1510_s26 + $0x330] sm:$0xff] }
  0x2c   : > { %409 = vst [vmem:[%s1518_s27 + $0x190] sm:$0xff] %v408_v50  ;;  %v412_v52 = vld [vmem:[%s1510_s26 + $0x340] sm:$0xff]  ;;  %v414_v53 = vld [vmem:[%s1510_s26 + $0x350] sm:$0xff]  ;;  %411 = vst [vmem:[%s1518_s27 + $0x198] sm:$0xff] %v410_v51 }
  0x2d   : > { %413 = vst [vmem:[%s1518_s27 + $0x1a0] sm:$0xff] %v412_v52  ;;  %415 = vst [vmem:[%s1518_s27 + $0x1a8] sm:$0xff] %v414_v53  ;;  %v416_v54 = vld [vmem:[%s1510_s26 + $0x360] sm:$0xff]  ;;  %v418_v55 = vld [vmem:[%s1510_s26 + $0x370] sm:$0xff] }
  0x2e   : > { %v420_v56 = vld [vmem:[%s1510_s26 + $0x380] sm:$0xff]  ;;  %417 = vst [vmem:[%s1518_s27 + $0x1b0] sm:$0xff] %v416_v54  ;;  %419 = vst [vmem:[%s1518_s27 + $0x1b8] sm:$0xff] %v418_v55  ;;  %v422_v57 = vld [vmem:[%s1510_s26 + $0x390] sm:$0xff] }
  0x2f   : > { %421 = vst [vmem:[%s1518_s27 + $0x1c0] sm:$0xff] %v420_v56  ;;  %v424_v58 = vld [vmem:[%s1510_s26 + $0x3a0] sm:$0xff]  ;;  %v426_v59 = vld [vmem:[%s1510_s26 + $0x3b0] sm:$0xff]  ;;  %423 = vst [vmem:[%s1518_s27 + $0x1c8] sm:$0xff] %v422_v57 }
  0x30   : > { %425 = vst [vmem:[%s1518_s27 + $0x1d0] sm:$0xff] %v424_v58  ;;  %427 = vst [vmem:[%s1518_s27 + $0x1d8] sm:$0xff] %v426_v59  ;;  %v428_v60 = vld [vmem:[%s1510_s26 + $0x3c0] sm:$0xff]  ;;  %v430_v61 = vld [vmem:[%s1510_s26 + $0x3d0] sm:$0xff] }
  0x31   : > { %v432_v62 = vld [vmem:[%s1510_s26 + $0x3e0] sm:$0xff]  ;;  %429 = vst [vmem:[%s1518_s27 + $0x1e0] sm:$0xff] %v428_v60  ;;  %431 = vst [vmem:[%s1518_s27 + $0x1e8] sm:$0xff] %v430_v61  ;;  %v434_v63 = vld [vmem:[%s1510_s26 + $0x3f0] sm:$0xff] }
  0x32   : > { %433 = vst [vmem:[%s1518_s27 + $0x1f0] sm:$0xff] %v432_v62  ;;  %v436_v0 = vld [vmem:[%s1510_s26 + $0x400] sm:$0xff]  ;;  %v438_v1 = vld [vmem:[%s1510_s26 + $0x410] sm:$0xff]  ;;  %435 = vst [vmem:[%s1518_s27 + $0x1f8] sm:$0xff] %v434_v63 }
  0x33   : > { %437 = vst [vmem:[%s1518_s27 + $0x200] sm:$0xff] %v436_v0  ;;  %439 = vst [vmem:[%s1518_s27 + $0x208] sm:$0xff] %v438_v1  ;;  %v440_v2 = vld [vmem:[%s1510_s26 + $0x420] sm:$0xff]  ;;  %v442_v3 = vld [vmem:[%s1510_s26 + $0x430] sm:$0xff] }
  0x34   : > { %v444_v4 = vld [vmem:[%s1510_s26 + $0x440] sm:$0xff]  ;;  %441 = vst [vmem:[%s1518_s27 + $0x210] sm:$0xff] %v440_v2  ;;  %443 = vst [vmem:[%s1518_s27 + $0x218] sm:$0xff] %v442_v3  ;;  %v446_v5 = vld [vmem:[%s1510_s26 + $0x450] sm:$0xff] }
  0x35   : > { %445 = vst [vmem:[%s1518_s27 + $0x220] sm:$0xff] %v444_v4  ;;  %v448_v6 = vld [vmem:[%s1510_s26 + $0x460] sm:$0xff]  ;;  %v450_v7 = vld [vmem:[%s1510_s26 + $0x470] sm:$0xff]  ;;  %447 = vst [vmem:[%s1518_s27 + $0x228] sm:$0xff] %v446_v5 }
  0x36   : > { %449 = vst [vmem:[%s1518_s27 + $0x230] sm:$0xff] %v448_v6  ;;  %451 = vst [vmem:[%s1518_s27 + $0x238] sm:$0xff] %v450_v7 }
  0x37 PF: > { %p1195_p7 = scmp.ge.s32.totalorder %s1447_s14, 1  ;;  %p456_p8 = scmp.lt.s32.totalorder %s1447_s14, 3 }
  0x39   : > { %p457_p9 = pnand %p1195_p7, %p456_p8 }
  0x3a   : > { %s463_s28 = sand.u32 (!%p457_p9), 1, %s1439_s12  }
  0x3b   : > { %460 = sbr.rel (%p457_p9) target bundleno = 357 (0x165), region = 66  ;;  %s1196_s25 = sshll.u32 (!%p457_p9), %s463_s28, 5 }
  0x3c   : > { %s1283_s29 = smul.u32 (!%p457_p9), 576, %s463_s28  ;;  %s484_s26 = scalar_lea.vmem (!%p457_p9), [#allocation3], %s1196_s25 }
  0x3e   : > { %s1673_s9 = scalar_lea.vmem (!%p457_p9), [#allocation2], %s1283_s29 }
  0x40   : > { %v1407_v8 = vld [vmem:[%s1779_s0 + $0x4] ss:$20 sps:$4 sm:$0xff]   ;;  %v1449_v9 = vmov 0   ;;  %v1414_v10 = vld [vmem:[%s1779_s0 + $0xc] ss:$20 sps:$4 sm:$0xff]   ;;  %vm963_vm0 = vcmask 523264  }
  0x41   : > { %1309 = vset.pattern.permute.xlu0 %v1449_v9  ;;  %999 = vmatprep.mubr.bf16.mxu0 %v1407_v8  ;;  %v566_v11 = vld [vmem:[%s1781_s2] sm:$0xff]  ;;  %v1310_v12 = vld [vmem:[%s1673_s9 + $0x74] ss:$8 sps:$4 sm:$0xff]   ;;  %v1312_v13 = vld [vmem:[%s1673_s9 + $0x70] ss:$8 sps:$4 sm:$0xff]   ;;  %s1281_s12 = sshll.u32 (%p1500_p5), %s1189_s15, 4 }
  0x42   : > { %1042 = vmatprep.mubr.bf16.mxu1 %v1414_v10  ;;  %570 = vperm.xlu0 %1309, %v566_v11   ;;  %v1313_v14 = vld [vmem:[%s1673_s9 + $0x174] ss:$8 sps:$4 sm:$0xff]   ;;  %v1315_v15 = vld [vmem:[%s1673_s9 + $0x170] ss:$8 sps:$4 sm:$0xff]   ;;  %v1316_v16 = vld [vmem:[%s1673_s9 + $0x64] ss:$8 sps:$4 sm:$0xff]   ;;  %s1109_s29 = scalar_lea.vmem (%p1500_p5), %s1782_s3, %s1281_s12 }
  0x43   : > { %967 = vmatprep.subr.bf16.mxu0 %v1310_v12  ;;  %v1318_v17 = vld [vmem:[%s1673_s9 + $0x60] ss:$8 sps:$4 sm:$0xff]   ;;  %1010 = vmatprep.subr.bf16.mxu1 %v1313_v14  ;;  %v1319_v18 = vld [vmem:[%s1673_s9 + $0x164] ss:$8 sps:$4 sm:$0xff]   ;;  %v1322_v20 = vld [vmem:[%s1673_s9 + $0x54] ss:$8 sps:$4 sm:$0xff]  }
  0x44   : > { %968 = vmatpush1.bf16.msra.mxu0 %v1312_v13  ;;  %1011 = vmatpush1.bf16.msra.mxu1 %v1315_v15  ;;  %v1321_v19 = vld [vmem:[%s1673_s9 + $0x160] ss:$8 sps:$4 sm:$0xff]   ;;  %v1324_v21 = vld [vmem:[%s1673_s9 + $0x50] ss:$8 sps:$4 sm:$0xff]   ;;  %v1325_v22 = vld [vmem:[%s1673_s9 + $0x154] ss:$8 sps:$4 sm:$0xff]  }
  0x45   : > { %969 = vmatprep.subr.bf16.mxu0 %v1316_v16  ;;  %1012 = vmatprep.subr.bf16.mxu1 %v1319_v18  ;;  %v1328_v23 = vld [vmem:[%s1673_s9 + $0x44] ss:$8 sps:$4 sm:$0xff]   ;;  %v1327_v24 = vld [vmem:[%s1673_s9 + $0x150] ss:$8 sps:$4 sm:$0xff]   ;;  %v1330_v26 = vld [vmem:[%s1673_s9 + $0x40] ss:$8 sps:$4 sm:$0xff]  }
  0x46   : > { %v1331_v25 = vld [vmem:[%s1673_s9 + $0x144] ss:$8 sps:$4 sm:$0xff]   ;;  %v1334_v27 = vld [vmem:[%s1673_s9 + $0x34] ss:$8 sps:$4 sm:$0xff]   ;;  %v1333_v28 = vld [vmem:[%s1673_s9 + $0x140] ss:$8 sps:$4 sm:$0xff]  }
  0x47   : > { %v1337_v29 = vld [vmem:[%s1673_s9 + $0x134] ss:$8 sps:$4 sm:$0xff]   ;;  %v1336_v30 = vld [vmem:[%s1673_s9 + $0x30] ss:$8 sps:$4 sm:$0xff]   ;;  %v1340_v31 = vld [vmem:[%s1673_s9 + $0x24] ss:$8 sps:$4 sm:$0xff]  }
  0x48   : > { %970 = vmatpush1.bf16.msra.mxu0 %v1318_v17  ;;  %1013 = vmatpush1.bf16.msra.mxu1 %v1321_v19  ;;  %v1339_v32 = vld [vmem:[%s1673_s9 + $0x130] ss:$8 sps:$4 sm:$0xff]   ;;  %v1343_v33 = vld [vmem:[%s1673_s9 + $0x124] ss:$8 sps:$4 sm:$0xff]   ;;  %v1342_v34 = vld [vmem:[%s1673_s9 + $0x20] ss:$8 sps:$4 sm:$0xff]  }
  0x49   : > { %971 = vmatprep.subr.bf16.mxu0 %v1322_v20  ;;  %1014 = vmatprep.subr.bf16.mxu1 %v1325_v22  ;;  %v1346_v35 = vld [vmem:[%s1673_s9 + $0x14] ss:$8 sps:$4 sm:$0xff]   ;;  %v1345_v36 = vld [vmem:[%s1673_s9 + $0x120] ss:$8 sps:$4 sm:$0xff]   ;;  %v1348_v38 = vld [vmem:[%s1673_s9 + $0x10] ss:$8 sps:$4 sm:$0xff]  }
  0x4a   : > { %v1349_v37 = vld [vmem:[%s1673_s9 + $0x114] ss:$8 sps:$4 sm:$0xff]   ;;  %v1352_v39 = vld [vmem:[%s1673_s9 + $0x4] ss:$8 sps:$4 sm:$0xff]   ;;  %v1351_v40 = vld [vmem:[%s1673_s9 + $0x110] ss:$8 sps:$4 sm:$0xff]  }
  0x4b   : > { %v1355_v41 = vld [vmem:[%s1673_s9 + $0x104] ss:$8 sps:$4 sm:$0xff]   ;;  %v1354_v42 = vld [vmem:[%s1673_s9] ss:$8 sps:$4 sm:$0xff]   ;;  %v1358_v43 = vld [vmem:[%s1673_s9 + $0xf4] ss:$8 sps:$4 sm:$0xff]  }
  0x4c   : > { %972 = vmatpush1.bf16.msra.mxu0 %v1324_v21  ;;  %1015 = vmatpush1.bf16.msra.mxu1 %v1327_v24  ;;  %v1357_v44 = vld [vmem:[%s1673_s9 + $0x100] ss:$8 sps:$4 sm:$0xff]   ;;  %v1361_v45 = vld [vmem:[%s1673_s9 + $0x1f4] ss:$8 sps:$4 sm:$0xff]   ;;  %v1360_v46 = vld [vmem:[%s1673_s9 + $0xf0] ss:$8 sps:$4 sm:$0xff]  }
  0x4d   : > { %973 = vmatprep.subr.bf16.mxu0 %v1328_v23  ;;  %1016 = vmatprep.subr.bf16.mxu1 %v1331_v25  ;;  %v1364_v47 = vld [vmem:[%s1673_s9 + $0xe4] ss:$8 sps:$4 sm:$0xff]   ;;  %v1363_v48 = vld [vmem:[%s1673_s9 + $0x1f0] ss:$8 sps:$4 sm:$0xff]   ;;  %v1366_v50 = vld [vmem:[%s1673_s9 + $0xe0] ss:$8 sps:$4 sm:$0xff]  }
  0x4e   : > { %v1367_v49 = vld [vmem:[%s1673_s9 + $0x1e4] ss:$8 sps:$4 sm:$0xff]   ;;  %v1370_v51 = vld [vmem:[%s1673_s9 + $0xd4] ss:$8 sps:$4 sm:$0xff]   ;;  %v1369_v52 = vld [vmem:[%s1673_s9 + $0x1e0] ss:$8 sps:$4 sm:$0xff]  }
  0x4f   : > { %v1373_v53 = vld [vmem:[%s1673_s9 + $0x1d4] ss:$8 sps:$4 sm:$0xff]   ;;  %v1372_v54 = vld [vmem:[%s1673_s9 + $0xd0] ss:$8 sps:$4 sm:$0xff]   ;;  %v1376_v55 = vld [vmem:[%s1673_s9 + $0xc4] ss:$8 sps:$4 sm:$0xff]  }
  0x50   : > { %974 = vmatpush1.bf16.msra.mxu0 %v1330_v26  ;;  %1017 = vmatpush1.bf16.msra.mxu1 %v1333_v28  ;;  %v1375_v56 = vld [vmem:[%s1673_s9 + $0x1d0] ss:$8 sps:$4 sm:$0xff]   ;;  %v1379_v57 = vld [vmem:[%s1673_s9 + $0x1c4] ss:$8 sps:$4 sm:$0xff]   ;;  %v1378_v58 = vld [vmem:[%s1673_s9 + $0xc0] ss:$8 sps:$4 sm:$0xff]  }
  0x51   : > { %975 = vmatprep.subr.bf16.mxu0 %v1334_v27  ;;  %1018 = vmatprep.subr.bf16.mxu1 %v1337_v29  ;;  %v1382_v59 = vld [vmem:[%s1673_s9 + $0xb4] ss:$8 sps:$4 sm:$0xff]   ;;  %v1381_v60 = vld [vmem:[%s1673_s9 + $0x1c0] ss:$8 sps:$4 sm:$0xff]   ;;  %v1384_v62 = vld [vmem:[%s1673_s9 + $0xb0] ss:$8 sps:$4 sm:$0xff]  }
  0x52   : > { %v1385_v61 = vld [vmem:[%s1673_s9 + $0x1b4] ss:$8 sps:$4 sm:$0xff]   ;;  %v1388_v63 = vld [vmem:[%s1673_s9 + $0xa4] ss:$8 sps:$4 sm:$0xff]   ;;  %v1387_v1 = vld [vmem:[%s1673_s9 + $0x1b0] ss:$8 sps:$4 sm:$0xff]  }
  0x53   : > { %v567_v0 = vld [vmem:[%s1781_s2 + $0x8] sm:$0xff]  ;;  %v1394_v4 = vld [vmem:[%s1673_s9 + $0x94] ss:$8 sps:$4 sm:$0xff]   ;;  %v1396_v7 = vld [vmem:[%s1673_s9 + $0x90] ss:$8 sps:$4 sm:$0xff]  }
  0x54   : > { %976 = vmatpush1.bf16.msra.mxu0 %v1336_v30  ;;  %1019 = vmatpush1.bf16.msra.mxu1 %v1339_v32  ;;  %v1391_v2 = vld [vmem:[%s1673_s9 + $0x1a4] ss:$8 sps:$4 sm:$0xff]   ;;  %v1390_v3 = vld [vmem:[%s1673_s9 + $0xa0] ss:$8 sps:$4 sm:$0xff]   ;;  %v1397_v6 = vld [vmem:[%s1673_s9 + $0x194] ss:$8 sps:$4 sm:$0xff]  }
  0x55   : > { %977 = vmatprep.subr.bf16.mxu0 %v1340_v31  ;;  %1020 = vmatprep.subr.bf16.mxu1 %v1343_v33  ;;  %v1393_v5 = vld [vmem:[%s1673_s9 + $0x1a0] ss:$8 sps:$4 sm:$0xff]   ;;  %v1400_v8 = vld [vmem:[%s1673_s9 + $0x84] ss:$8 sps:$4 sm:$0xff]   ;;  %v1399_v10 = vld [vmem:[%s1673_s9 + $0x190] ss:$8 sps:$4 sm:$0xff]  }
  0x56   : > { %575 = vperm.xlu0 %1309, %v567_v0   ;;  %v1403_v11 = vld [vmem:[%s1673_s9 + $0x184] ss:$8 sps:$4 sm:$0xff]   ;;  %v1402_v12 = vld [vmem:[%s1673_s9 + $0x80] ss:$8 sps:$4 sm:$0xff]   ;;  %v1411_v13 = vld [vmem:[%s1673_s9 + $0x234] ss:$8 sps:$4 sm:$0xff]  }
  0x57   : > { %v1408_v14 = vld [vmem:[%s1673_s9 + $0x180] ss:$8 sps:$4 sm:$0xff]   ;;  %v1409_v16 = vld [vmem:[%s1673_s9 + $0x230] ss:$8 sps:$4 sm:$0xff]   ;;  %v1417_v18 = vld [vmem:[%s1673_s9 + $0x224] ss:$8 sps:$4 sm:$0xff]  }
  0x58   : > { %978 = vmatpush1.bf16.msra.mxu0 %v1342_v34  ;;  %1021 = vmatpush1.bf16.msra.mxu1 %v1345_v36  ;;  %v1405_v15 = vld [vmem:[%s1779_s0] ss:$20 sps:$4 sm:$0xff]   ;;  %v1412_v17 = vld [vmem:[%s1779_s0 + $0x8] ss:$20 sps:$4 sm:$0xff]   ;;  %v1418_v21 = vld [vmem:[%s1673_s9 + $0x210] ss:$8 sps:$4 sm:$0xff]  }
  0x59   : > { %979 = vmatprep.subr.bf16.mxu0 %v1346_v35  ;;  %1022 = vmatprep.subr.bf16.mxu1 %v1349_v37  ;;  %v1415_v19 = vld [vmem:[%s1673_s9 + $0x220] ss:$8 sps:$4 sm:$0xff]   ;;  %v1420_v20 = vld [vmem:[%s1673_s9 + $0x214] ss:$8 sps:$4 sm:$0xff]   ;;  %v1423_v22 = vld [vmem:[%s1673_s9 + $0x204] ss:$8 sps:$4 sm:$0xff]  }
  0x5a   : > { %v1421_v23 = vld [vmem:[%s1673_s9 + $0x200] ss:$8 sps:$4 sm:$0xff]   ;;  %v1424_v24 = vld [vmem:[%s1779_s0 + $0x10] ss:$20 sps:$4 sm:$0xff]  }
  0x5c   : > { %980 = vmatpush1.bf16.msra.mxu0 %v1348_v38  ;;  %1023 = vmatpush1.bf16.msra.mxu1 %v1351_v40 }
  0x5d   : > { %981 = vmatprep.subr.bf16.mxu0 %v1352_v39  ;;  %1024 = vmatprep.subr.bf16.mxu1 %v1355_v41 }
  0x60   : > { %982 = vmatpush1.bf16.msra.mxu0 %v1354_v42  ;;  %1025 = vmatpush1.bf16.msra.mxu1 %v1357_v44 }
  0x61   : > { %983 = vmatprep.subr.bf16.mxu0 %v1358_v43  ;;  %1026 = vmatprep.subr.bf16.mxu1 %v1361_v45 }
  0x64   : > { %984 = vmatpush2.bf16.msra.mxu0 %v1360_v46  ;;  %1027 = vmatpush2.bf16.msra.mxu1 %v1363_v48 }
  0x65   : > { %985 = vmatprep.subr.bf16.mxu0 %v1364_v47  ;;  %1028 = vmatprep.subr.bf16.mxu1 %v1367_v49 }
  0x68   : > { %986 = vmatpush2.bf16.msra.mxu0 %v1366_v50  ;;  %1029 = vmatpush2.bf16.msra.mxu1 %v1369_v52 }
  0x69   : > { %987 = vmatprep.subr.bf16.mxu0 %v1370_v51  ;;  %1030 = vmatprep.subr.bf16.mxu1 %v1373_v53 }
  0x6c   : > { %988 = vmatpush2.bf16.msra.mxu0 %v1372_v54  ;;  %1031 = vmatpush2.bf16.msra.mxu1 %v1375_v56 }
  0x6d   : > { %989 = vmatprep.subr.bf16.mxu0 %v1376_v55  ;;  %1032 = vmatprep.subr.bf16.mxu1 %v1379_v57 }
  0x70   : > { %990 = vmatpush2.bf16.msra.mxu0 %v1378_v58  ;;  %1033 = vmatpush2.bf16.msra.mxu1 %v1381_v60 }
  0x71   : > { %991 = vmatprep.subr.bf16.mxu0 %v1382_v59  ;;  %1034 = vmatprep.subr.bf16.mxu1 %v1385_v61 }
  0x74   : > { %992 = vmatpush2.bf16.msra.mxu0 %v1384_v62  ;;  %1035 = vmatpush2.bf16.msra.mxu1 %v1387_v1 }
  0x75   : > { %993 = vmatprep.subr.bf16.mxu0 %v1388_v63  ;;  %1036 = vmatprep.subr.bf16.mxu1 %v1391_v2 }
  0x78   : > { %994 = vmatpush2.bf16.msra.mxu0 %v1390_v3  ;;  %1037 = vmatpush2.bf16.msra.mxu1 %v1393_v5 }
  0x79   : > { %995 = vmatprep.subr.bf16.mxu0 %v1394_v4  ;;  %1038 = vmatprep.subr.bf16.mxu1 %v1397_v6 }
  0x7c   : > { %996 = vmatpush2.bf16.msra.mxu0 %v1396_v7  ;;  %1039 = vmatpush2.bf16.msra.mxu1 %v1399_v10 }
  0x7d   : > { %997 = vmatprep.subr.bf16.mxu0 %v1400_v8  ;;  %1040 = vmatprep.subr.bf16.mxu1 %v1403_v11 }
  0x80   : > { %998 = vmatpush2.bf16.msra.mxu0 %v1402_v12  ;;  %1041 = vmatpush2.bf16.msra.mxu1 %v1408_v14 }
  0x81   : > { %1061 = vmatprep.subr.bf16.mxu0 %v1411_v13 }
  0x83   : > { %1000 = vmatmul.mubr.bf16.vlgmr.msra.gmra.mxu0 %v1405_v15  ;;  %1043 = vmatmul.mubr.bf16.vlgmr.msra.gmra.mxu1 %v1412_v17 }
  0x84   : > { %1062 = vmatpush1.bf16.msra.mxu0 %v1409_v16  ;;  %1085 = vmatprep.mubr.bf16.mxu0 %v1449_v9 }
  0x85   : > { %1063 = vmatprep.subr.bf16.mxu0 %v1417_v18 }
  0x88   : > { %1064 = vmatpush1.bf16.msra.mxu0 %v1415_v19 }
  0x89   : > { %1065 = vmatprep.subr.bf16.mxu0 %v1420_v20 }
  0x8c   : > { %1066 = vmatpush1.bf16.msra.mxu0 %v1418_v21 }
  0x8d   : > { %1067 = vmatprep.subr.bf16.mxu0 %v1423_v22 }
  0x90   : > { %1068 = vmatpush1.bf16.msra.mxu0 %v1421_v23 }
  0x93   : > { %1274 = vmatmul.mubr.msk.bf16.vlgmr.msra.gmra.mxu0 %vm963_vm0, %v1424_v24 }
  0xbd   : > { %v571_v9 = vpop.permute.xlu0 %570 }
  0xd1   : > { %v576_v31 = vpop.permute.xlu0 %575 }
 0x143   : > { %v1001_v25 = vpop.f32.mrf.mxu0  ;;  %v1044_v27 = vpop.f32.mrf.mxu1 }
 0x144   : > { %v1002_v30 = vadd.f32 %v1001_v25, %v571_v9 }
 0x145   : > { %v1003_v26 = vpop.f32.mrf.mxu0  ;;  %v1046_v29 = vpop.f32.mrf.mxu1 }
 0x146   : > { %v1004_v32 = vadd.f32 %v1003_v26, %v571_v9  ;;  %v1045_v35 = vadd.f32 %v1044_v27, %v1002_v30 }
 0x147   : > { %v1005_v28 = vpop.f32.mrf.mxu0  ;;  %v1048_v34 = vpop.f32.mrf.mxu1 }
 0x148   : > { %v1006_v36 = vadd.f32 %v1005_v28, %v576_v31  ;;  %v1047_v38 = vadd.f32 %v1046_v29, %v1004_v32 }
 0x149   : > { %v1007_v33 = vpop.f32.mrf.mxu0  ;;  %v1050_v41 = vpop.f32.mrf.mxu1 }
 0x14a   : > { %v1008_v39 = vadd.f32 %v1007_v33, %v576_v31  ;;  %v1049_v43 = vadd.f32 %v1048_v34, %v1006_v36 }
 0x14c   : > { %v1051_v46 = vadd.f32 %v1050_v41, %v1008_v39 }
 0x153   : > { %v1087_v37 = vpop.f32.mrf.mxu0 }
 0x154   : > { %v1088_v40 = vadd.f32 %v1087_v37, %v1045_v35 }
 0x155   : > { %v1089_v42 = vpop.f32.mrf.mxu0 }
 0x156   : > { %1096 = vst [vmem:[%s484_s26] sm:$0xff] %v1088_v40  ;;  %v1090_v44 = vadd.f32 %v1089_v42, %v1047_v38 }
 0x157   : > { %v1091_v45 = vpop.f32.mrf.mxu0 }
 0x158   : > { %1097 = vst [vmem:[%s484_s26 + $0x8] sm:$0xff] %v1090_v44  ;;  %v1092_v47 = vadd.f32 %v1091_v45, %v1049_v43  ;;  %1106 = sbr.rel (!%p1500_p5) target bundleno = 357 (0x165), region = 74 }
 0x159   : > { %v1093_v48 = vpop.f32.mrf.mxu0 }
 0x15a   : > { %1098 = vst [vmem:[%s484_s26 + $0x10] sm:$0xff] %v1092_v47  ;;  %v1094_v49 = vadd.f32 %v1093_v48, %v1051_v46 }
 0x15c   : > { %1099 = vst [vmem:[%s484_s26 + $0x18] sm:$0xff] %v1094_v49 }
 0x15d   : > { %v1122_v50 = vld [vmem:[%s484_s26] sm:$0xff] }
 0x15e   : > { %1123 = vst [vmem:[%s1109_s29] sm:$0xff] %v1122_v50 }
 0x15f   : > { %v1124_v51 = vld [vmem:[%s484_s26 + $0x8] sm:$0xff] }
 0x160   : > { %1125 = vst [vmem:[%s1109_s29 + $0x8] sm:$0xff] %v1124_v51 }
 0x161   : > { %v1126_v52 = vld [vmem:[%s484_s26 + $0x10] sm:$0xff] }
 0x162   : > { %1127 = vst [vmem:[%s1109_s29 + $0x20] sm:$0xff] %v1126_v52 }
 0x163   : > { %v1128_v53 = vld [vmem:[%s484_s26 + $0x18] sm:$0xff] }
 0x164   : > { %1129 = vst [vmem:[%s1109_s29 + $0x28] sm:$0xff] %v1128_v53 }
 0x165 PF: > { %p10_p10 = scmp.ge.s32.totalorder %s1487_s16, 4   ;;  %s1784_s12 = smov %s1443_s13 }
 0x166   : > { %s1785_s13 = smov %s1498_s19  ;;  %s1786_s14 = smov %s1487_s16 }
 0x167   :  { %12 = sbr.rel (!%p10_p10) target bundleno = 2 (0x2), region = 128 }

</bundles_post_ra>
